<compile_context>
chip_gen: v7x
topology: tpu7x:2x2x1
jax: 0.10.0
libtpu: 0.0.40
codegen_flags: <defaults>
</compile_context>

<pallas_src>
import functools

import numpy as np
import jax
import jax.numpy as jnp
from jax import lax
from jax.experimental import pallas as pl
from jax.experimental.pallas import tpu as pltpu


def _make_divisible(v, divisor, min_value=None):
    if min_value is None:
        min_value = divisor
    new_v = max(min_value, int(v + divisor / 2) // divisor * divisor)
    if new_v < 0.9 * v:
        new_v += divisor
    return new_v


def _silu(x):
    return x * jax.nn.sigmoid(x)


def mbconv_kernel(stride, identity, B, H, W, hidden, *refs):
    if stride == 2:
        (x_ref, w_exp_ref, bn1_ref, wdw_ref, bn2_ref, sel_h_ref, sel_w_ref,
         w_fc1_ref, b_fc1_ref, w_fc2_ref, b_fc2_ref, w_proj_ref, bn3_ref, o_ref) = refs
    else:
        (x_ref, w_exp_ref, bn1_ref, wdw_ref, bn2_ref,
         w_fc1_ref, b_fc1_ref, w_fc2_ref, b_fc2_ref, w_proj_ref, bn3_ref, o_ref) = refs

    f32, bf16 = jnp.float32, jnp.bfloat16
    Ho = (H - 1) // stride + 1
    Wo = (W - 1) // stride + 1
    M = B * H                      # slab rows (whole batch in one step)
    WH = W * hidden                # full-resolution lane width of the expanded slab
    WC = x_ref.shape[2]            # W * Cin

    # ---- 1x1 expand conv in the (rows, W*Cin) slab layout --------------------
    # Block-diagonal weight (BN1 scale folded, bf16); f32 accumulation on the MXU.
    x_slab = x_ref[...].astype(f32).reshape(M, WC)                 # f32, reused by residual
    t = jnp.dot(x_slab.astype(bf16), w_exp_ref[...],
                preferred_element_type=f32)                        # (M, W*hidden)
    t = _silu(t + bn1_ref[...])

    # ---- 3x3 depthwise conv: 9 taps via XLU rolls + pad-edge masks (no scratch)
    row = lax.broadcasted_iota(jnp.int32, (M, 1), 0)
    lane = lax.broadcasted_iota(jnp.int32, (1, WH), 1)
    not_top = (row % H) != 0               # tap source row h-1 exists (same image)
    not_bot = (row % H) != (H - 1)         # tap source row h+1 exists (same image)
    not_left = lane >= hidden              # tap source column w-1 exists
    not_right = lane < (W - 1) * hidden    # tap source column w+1 exists

    # roll(x, s)[i] == x[i - s]; the masks zero the wrapped / cross-image borders,
    # reproducing the pad=1 semantics of the depthwise conv.
    t_up = jnp.where(not_top, pltpu.roll(t, 1, axis=0), 0.0)       # t[r-1]
    t_dn = jnp.where(not_bot, pltpu.roll(t, M - 1, axis=0), 0.0)   # t[r+1]
    rows3 = (t_up, t, t_dn)

    wdw = wdw_ref[...]                                             # (9, W*hidden) f32
    acc = None
    for dh in range(3):
        base = rows3[dh]
        for dw in range(3):
            if dw == 0:
                tap = jnp.where(not_left, pltpu.roll(base, hidden, axis=1), 0.0)
            elif dw == 2:
                tap = jnp.where(not_right, pltpu.roll(base, WH - hidden, axis=1), 0.0)
            else:
                tap = base
            k = dh * 3 + dw
            term = tap * wdw[k:k + 1, :]
            acc = term if acc is None else acc + term              # f32 accumulate

    # ---- stride=2: exact spatial subsample via 0/1 selection matmuls ---------
    if stride == 2:
        acc = jnp.dot(acc, sel_w_ref[...], preferred_element_type=f32)   # pick even w
        acc = jnp.dot(sel_h_ref[...], acc, preferred_element_type=f32)   # pick even h

    t2 = _silu(acc + bn2_ref[...])                                 # (B*Ho, Wo*hidden)

    # ---- SE: pooled mean folded into fc1, fc2 tiled -> gate already slab-shaped
    WoH = Wo * hidden
    t2_3d = t2.reshape(B, Ho, WoH)
    s1 = jnp.sum(t2_3d, axis=1)                                    # per-image row sums (B, Wo*hidden)
    h1 = _silu(jnp.dot(s1.astype(bf16), w_fc1_ref[...],
                       preferred_element_type=f32) + b_fc1_ref[...])       # (B, se_dim)
    gate = jax.nn.sigmoid(jnp.dot(h1.astype(bf16), w_fc2_ref[...],
                                  preferred_element_type=f32) + b_fc2_ref[...])  # (B, Wo*hidden)
    t2g = (t2_3d * gate[:, None, :]).reshape(B * Ho, WoH)

    # ---- 1x1 project conv (block-diagonal, BN3 scale folded) + shift + residual
    out = jnp.dot(t2g.astype(bf16), w_proj_ref[...],
                  preferred_element_type=f32)                      # (B*Ho, Wo*oup)
    out = out + bn3_ref[...]
    if identity:                      # stride==1 and inp==oup: same slab layout as x
        out = out + x_slab
    o_ref[...] = out.reshape(o_ref.shape).astype(o_ref.dtype)


def mbconv_pallas(x_nchw, params, stride, identity):
    B, Cin, H, W = x_nchw.shape
    hidden = params["w_exp"].shape[1]
    oup = params["w_proj"].shape[1]
    Ho = (H + 2 - 3) // stride + 1
    Wo = (W + 2 - 3) // stride + 1
    f32, bf16 = jnp.float32, jnp.bfloat16

    # NCHW -> NHWC -> lane-dense slab (B, H, W*Cin)
    x = jnp.transpose(x_nchw, (0, 2, 3, 1)).reshape(B, H, W * Cin).astype(f32)

    # Fold BN scales into the conv weights (exact for inference-mode BN).
    w_exp_f = params["w_exp"] * params["bn1_scale"][None, :]
    w_dw_f = params["w_dw"] * params["bn2_scale"][None, None, :]
    w_proj_f = params["w_proj"] * params["bn3_scale"][None, :]

    # Block-diagonal 1x1 weights (bf16) so expand/project run directly on the slab.
    w_exp_bd = jnp.einsum("ab,io->aibo", jnp.eye(W, dtype=f32), w_exp_f
                          ).reshape(W * Cin, W * hidden).astype(bf16)
    w_proj_bd = jnp.einsum("ab,io->aibo", jnp.eye(Wo, dtype=f32), w_proj_f
                           ).reshape(Wo * hidden, Wo * oup).astype(bf16)

    # Depthwise weights tiled across W (lane = w*hidden + c); kept f32 (VPU path).
    wdw_t = jnp.tile(w_dw_f.reshape(9, hidden), (1, W)).astype(f32)

    bn1_b = jnp.tile(params["bn1_shift"], W).reshape(1, W * hidden).astype(f32)
    bn2_b = jnp.tile(params["bn2_shift"], Wo).reshape(1, Wo * hidden).astype(f32)
    bn3_b = jnp.tile(params["bn3_shift"], Wo).reshape(1, Wo * oup).astype(f32)

    # SE: fold the W-block reduction of the spatial mean and the 1/(Ho*Wo) factor
    # into fc1; tile fc2/bias across W so the gate comes out slab-shaped.
    w_fc1_eff = (jnp.tile(params["w_fc1"], (Wo, 1)) / float(Ho * Wo)).astype(bf16)
    b_fc1 = params["b_fc1"].reshape(1, -1).astype(f32)
    w_fc2_t = jnp.tile(params["w_fc2"], (1, Wo)).astype(bf16)
    b_fc2_t = jnp.tile(params["b_fc2"], Wo).reshape(1, Wo * hidden).astype(f32)

    args = [x, w_exp_bd, bn1_b, wdw_t, bn2_b]
    if stride == 2:
        # Exact 0/1 selection matrices for the spatial downsample (even rows/cols).
        r = jnp.arange(B * Ho)
        sel_h = jnp.zeros((B * Ho, B * H), f32).at[
            r, (r // Ho) * H + (r % Ho) * stride].set(1.0)
        pick_w = jnp.zeros((W, Wo), f32).at[
            stride * jnp.arange(Wo), jnp.arange(Wo)].set(1.0)
        sel_w = jnp.einsum("ab,cd->acbd", pick_w, jnp.eye(hidden, dtype=f32)
                           ).reshape(W * hidden, Wo * hidden)
        args += [sel_h, sel_w]
    args += [w_fc1_eff, b_fc1, w_fc2_t, b_fc2_t, w_proj_bd, bn3_b]

    def full_spec(a):
        nd = a.ndim
        return pl.BlockSpec(a.shape, lambda i, _nd=nd: (0,) * _nd)

    out = pl.pallas_call(
        functools.partial(mbconv_kernel, stride, identity, B, H, W, hidden),
        out_shape=jax.ShapeDtypeStruct((B, Ho, Wo * oup), x.dtype),
        grid_spec=pltpu.PrefetchScalarGridSpec(
            num_scalar_prefetch=0,
            grid=(1,),                      # whole batch in one step at toy shapes
            in_specs=[full_spec(a) for a in args],
            out_specs=pl.BlockSpec((B, Ho, Wo * oup), lambda i: (0, 0, 0)),
        ),
        compiler_params=pltpu.CompilerParams(
            dimension_semantics=("arbitrary",),
            # Explicit, <= physical VMEM on v5e/v6e/v7x; re-derive for real shapes.
            vmem_limit_bytes=32 * 1024 * 1024,
        ),
    )(*args)

    # lane-dense output slab -> NHWC -> NCHW
    return jnp.transpose(out.reshape(B, Ho, Wo, oup), (0, 3, 1, 2))


def mbconv_ref(x_nchw, params, stride, identity):
    """Pure-JAX f32 reference (same inference-mode BN semantics, un-folded params)."""
    x = jnp.transpose(x_nchw, (0, 2, 3, 1)).astype(jnp.float32)
    dn = ("NHWC", "HWIO", "NHWC")
    hidden = params["w_exp"].shape[1]
    t = lax.conv_general_dilated(x, params["w_exp"][None, None], (1, 1), "VALID",
                                 dimension_numbers=dn)
    t = t * params["bn1_scale"] + params["bn1_shift"]
    t = t * jax.nn.sigmoid(t)
    wdw = params["w_dw"][:, :, None, :]              # (3, 3, 1, hidden)
    t = lax.conv_general_dilated(t, wdw, (stride, stride), ((1, 1), (1, 1)),
                                 dimension_numbers=dn, feature_group_count=hidden)
    t = t * params["bn2_scale"] + params["bn2_shift"]
    t = t * jax.nn.sigmoid(t)
    y = jnp.mean(t, axis=(1, 2))
    h1 = y @ params["w_fc1"] + params["b_fc1"]
    h1 = h1 * jax.nn.sigmoid(h1)
    gate = jax.nn.sigmoid(h1 @ params["w_fc2"] + params["b_fc2"])
    t = t * gate[:, None, None, :]
    out = lax.conv_general_dilated(t, params["w_proj"][None, None], (1, 1), "VALID",
                                   dimension_numbers=dn)
    out = out * params["bn3_scale"] + params["bn3_shift"]
    if identity:
        out = out + x
    return jnp.transpose(out, (0, 3, 1, 2))


if __name__ == "__main__":
    def normal(k, shape, s=0.1):
        return (s * jax.random.normal(k, shape)).astype(jnp.float32)

    def unif(k, shape):
        return jax.random.uniform(k, shape, jnp.float32, 0.5, 1.5)

    def bn_fold(key, c, eps=1e-5):
        kg, kb, km, kv = jax.random.split(key, 4)
        gamma, beta = unif(kg, (c,)), normal(kb, (c,))
        mean, var = normal(km, (c,)), unif(kv, (c,))
        scale = gamma / jnp.sqrt(var + eps)
        return scale, beta - mean * scale

    def make_params(key, inp, oup, expand_ratio):
        hidden = round(inp * expand_ratio)
        se_dim = _make_divisible(inp // 4, 8)       # SELayer(inp, hidden), reduction=4
        ks = jax.random.split(key, 10)
        bn1_s, bn1_b = bn_fold(ks[0], hidden)
        bn2_s, bn2_b = bn_fold(ks[1], hidden)
        bn3_s, bn3_b = bn_fold(ks[2], oup)
        return dict(
            w_exp=normal(ks[3], (inp, hidden), 0.2),      # 1x1 expand conv
            bn1_scale=bn1_s, bn1_shift=bn1_b,
            w_dw=normal(ks[4], (3, 3, hidden), 0.2),      # depthwise 3x3
            bn2_scale=bn2_s, bn2_shift=bn2_b,
            w_fc1=normal(ks[5], (hidden, se_dim), 0.2),   # SE fc1 (weight.T)
            b_fc1=normal(ks[6], (se_dim,)),
            w_fc2=normal(ks[7], (se_dim, hidden), 0.2),   # SE fc2 (weight.T)
            b_fc2=normal(ks[8], (hidden,)),
            w_proj=normal(ks[9], (hidden, oup), 0.2),     # 1x1 project conv
            bn3_scale=bn3_s, bn3_shift=bn3_b,
        )

    key = jax.random.PRNGKey(0)
    k_p1, k_p2, k_x1, k_x2 = jax.random.split(key, 4)
    B, H, W = 2, 16, 16
    # bf16 MXU operands (f32 accumulation / f32 elementwise) => relaxed tolerance.
    TOL = 5e-2

    # Test 1: MBConv(inp=8, oup=8, stride=1, expand_ratio=4, use_se=True) -> identity residual
    cin1, oup1, s1 = 8, 8, 1
    p1 = make_params(k_p1, cin1, oup1, 4)
    x1 = jax.random.normal(k_x1, (B, cin1, H, W), jnp.float32)
    id1 = (s1 == 1 and cin1 == oup1)
    out1 = jax.block_until_ready(mbconv_pallas(x1, p1, s1, id1))
    ref1 = jax.block_until_ready(mbconv_ref(x1, p1, s1, id1))
    np.testing.assert_allclose(np.asarray(out1), np.asarray(ref1), rtol=TOL, atol=TOL)

    # Test 2: MBConv(inp=8, oup=16, stride=2, expand_ratio=4, use_se=True) -> downsampling block
    cin2, oup2, s2 = 8, 16, 2
    p2 = make_params(k_p2, cin2, oup2, 4)
    x2 = jax.random.normal(k_x2, (B, cin2, H, W), jnp.float32)
    id2 = (s2 == 1 and cin2 == oup2)
    out2 = jax.block_until_ready(mbconv_pallas(x2, p2, s2, id2))
    ref2 = jax.block_until_ready(mbconv_ref(x2, p2, s2, id2))
    np.testing.assert_allclose(np.asarray(out2), np.asarray(ref2), rtol=TOL, atol=TOL)

    print("KERNEL_OK")
</pallas_src>

<mosaic_0001>
module attributes {stable_mosaic.version = 11 : i64} {
  func.func @mbconv_kernel(%arg0: i32, %arg1: memref<2x16x128xf32, #tpu.memory_space<vmem>>, %arg2: memref<128x512xbf16, #tpu.memory_space<vmem>>, %arg3: memref<1x512xf32, #tpu.memory_space<vmem>>, %arg4: memref<9x512xf32, #tpu.memory_space<vmem>>, %arg5: memref<1x512xf32, #tpu.memory_space<vmem>>, %arg6: memref<512x8xbf16, #tpu.memory_space<vmem>>, %arg7: memref<1x8xf32, #tpu.memory_space<vmem>>, %arg8: memref<8x512xbf16, #tpu.memory_space<vmem>>, %arg9: memref<1x512xf32, #tpu.memory_space<vmem>>, %arg10: memref<512x128xbf16, #tpu.memory_space<vmem>>, %arg11: memref<1x128xf32, #tpu.memory_space<vmem>>, %arg12: memref<2x16x128xf32, #tpu.memory_space<vmem>>) attributes {dimension_semantics = [#tpu.dimension_semantics<arbitrary>], iteration_bounds = array<i64: 1>, scalar_prefetch = 0 : i64, scratch_operands = 0 : i64, tpu.core_type = #tpu.core_type<tc>, window_params = [{pipeline_mode = #tpu.pipeline_mode<synchronous>, transform_indices = @transform_0, window_bounds = array<i64: 2, 16, 128>}, {pipeline_mode = #tpu.pipeline_mode<synchronous>, transform_indices = @transform_1, window_bounds = array<i64: 128, 512>}, {pipeline_mode = #tpu.pipeline_mode<synchronous>, transform_indices = @transform_2, window_bounds = array<i64: 1, 512>}, {pipeline_mode = #tpu.pipeline_mode<synchronous>, transform_indices = @transform_3, window_bounds = array<i64: 9, 512>}, {pipeline_mode = #tpu.pipeline_mode<synchronous>, transform_indices = @transform_4, window_bounds = array<i64: 1, 512>}, {pipeline_mode = #tpu.pipeline_mode<synchronous>, transform_indices = @transform_5, window_bounds = array<i64: 512, 8>}, {pipeline_mode = #tpu.pipeline_mode<synchronous>, transform_indices = @transform_6, window_bounds = array<i64: 1, 8>}, {pipeline_mode = #tpu.pipeline_mode<synchronous>, transform_indices = @transform_7, window_bounds = array<i64: 8, 512>}, {pipeline_mode = #tpu.pipeline_mode<synchronous>, transform_indices = @transform_8, window_bounds = array<i64: 1, 512>}, {pipeline_mode = #tpu.pipeline_mode<synchronous>, transform_indices = @transform_9, window_bounds = array<i64: 512, 128>}, {pipeline_mode = #tpu.pipeline_mode<synchronous>, transform_indices = @transform_10, window_bounds = array<i64: 1, 128>}, {pipeline_mode = #tpu.pipeline_mode<synchronous>, transform_indices = @transform_11, window_bounds = array<i64: 2, 16, 128>}]} {
    %c0 = arith.constant 0 : index
    %c0_0 = arith.constant 0 : index
    %c0_1 = arith.constant 0 : index
    %0 = vector.load %arg1[%c0, %c0_0, %c0_1] : memref<2x16x128xf32, #tpu.memory_space<vmem>>, vector<2x16x128xf32>
    %1 = vector.shape_cast %0 : vector<2x16x128xf32> to vector<32x128xf32>
    %2 = arith.truncf %1 : vector<32x128xf32> to vector<32x128xbf16>
    %c0_2 = arith.constant 0 : index
    %c0_3 = arith.constant 0 : index
    %3 = vector.load %arg2[%c0_2, %c0_3] : memref<128x512xbf16, #tpu.memory_space<vmem>>, vector<128x512xbf16>
    %cst = arith.constant dense<0.000000e+00> : vector<32x512xf32>
    %4 = tpu.matmul %2, %3, %cst {dimension_numbers = #tpu.dot_dimension_numbers<[1], [0], [0], [1], [0, 0, 1, 1], [], []>} : vector<32x128xbf16>, vector<128x512xbf16>, vector<32x512xf32> -> vector<32x512xf32>
    %c0_4 = arith.constant 0 : index
    %c0_5 = arith.constant 0 : index
    %5 = vector.load %arg3[%c0_4, %c0_5] : memref<1x512xf32, #tpu.memory_space<vmem>>, vector<1x512xf32>
    %6 = vector.broadcast %5 : vector<1x512xf32> to vector<32x512xf32>
    %7 = arith.addf %4, %6 : vector<32x512xf32>
    %8 = arith.negf %7 : vector<32x512xf32>
    %9 = math.exp %8 : vector<32x512xf32>
    %cst_6 = arith.constant 1.000000e+00 : f32
    %10 = vector.broadcast %cst_6 : f32 to vector<32x512xf32>
    %11 = arith.addf %10, %9 : vector<32x512xf32>
    %12 = arith.divf %10, %11 : vector<32x512xf32>
    %13 = arith.mulf %7, %12 : vector<32x512xf32>
    %14 = tpu.iota {dimensions = array<i32: 0>} : vector<32x1xi32>
    %15 = tpu.iota {dimensions = array<i32: 1>} : vector<1x512xi32>
    %c16_i32 = arith.constant 16 : i32
    %c0_i32 = arith.constant 0 : i32
    %16 = arith.cmpi eq, %c16_i32, %c0_i32 : i32
    %c1_i32 = arith.constant 1 : i32
    %17 = arith.select %16, %c1_i32, %c16_i32 : i32
    %18 = vector.broadcast %17 : i32 to vector<32x1xi32>
    %19 = arith.remsi %14, %18 : vector<32x1xi32>
    %c0_i32_7 = arith.constant 0 : i32
    %20 = vector.broadcast %c0_i32_7 : i32 to vector<32x1xi32>
    %21 = arith.cmpi ne, %19, %20 : vector<32x1xi32>
    %c0_i32_8 = arith.constant 0 : i32
    %22 = vector.broadcast %c0_i32_8 : i32 to vector<32x1xi32>
    %23 = arith.cmpi slt, %19, %22 : vector<32x1xi32>
    %c0_i32_9 = arith.constant 0 : i32
    %24 = arith.cmpi slt, %17, %c0_i32_9 : i32
    %25 = vector.broadcast %24 : i1 to vector<32x1xi1>
    %26 = vector.broadcast %25 : vector<32x1xi1> to vector<32x1xi1>
    %27 = arith.xori %23, %26 : vector<32x1xi1>
    %28 = arith.andi %27, %21 : vector<32x1xi1>
    %29 = vector.broadcast %17 : i32 to vector<32x1xi32>
    %30 = arith.addi %19, %29 : vector<32x1xi32>
    %31 = arith.select %28, %30, %19 : vector<32x1xi1>, vector<32x1xi32>
    %c0_i32_10 = arith.constant 0 : i32
    %32 = vector.broadcast %c0_i32_10 : i32 to vector<32x1xi32>
    %33 = arith.cmpi ne, %31, %32 : vector<32x1xi32>
    %c16_i32_11 = arith.constant 16 : i32
    %c0_i32_12 = arith.constant 0 : i32
    %34 = arith.cmpi eq, %c16_i32_11, %c0_i32_12 : i32
    %c1_i32_13 = arith.constant 1 : i32
    %35 = arith.select %34, %c1_i32_13, %c16_i32_11 : i32
    %36 = vector.broadcast %35 : i32 to vector<32x1xi32>
    %37 = arith.remsi %14, %36 : vector<32x1xi32>
    %c0_i32_14 = arith.constant 0 : i32
    %38 = vector.broadcast %c0_i32_14 : i32 to vector<32x1xi32>
    %39 = arith.cmpi ne, %37, %38 : vector<32x1xi32>
    %c0_i32_15 = arith.constant 0 : i32
    %40 = vector.broadcast %c0_i32_15 : i32 to vector<32x1xi32>
    %41 = arith.cmpi slt, %37, %40 : vector<32x1xi32>
    %c0_i32_16 = arith.constant 0 : i32
    %42 = arith.cmpi slt, %35, %c0_i32_16 : i32
    %43 = vector.broadcast %42 : i1 to vector<32x1xi1>
    %44 = vector.broadcast %43 : vector<32x1xi1> to vector<32x1xi1>
    %45 = arith.xori %41, %44 : vector<32x1xi1>
    %46 = arith.andi %45, %39 : vector<32x1xi1>
    %47 = vector.broadcast %35 : i32 to vector<32x1xi32>
    %48 = arith.addi %37, %47 : vector<32x1xi32>
    %49 = arith.select %46, %48, %37 : vector<32x1xi1>, vector<32x1xi32>
    %c15_i32 = arith.constant 15 : i32
    %50 = vector.broadcast %c15_i32 : i32 to vector<32x1xi32>
    %51 = arith.cmpi ne, %49, %50 : vector<32x1xi32>
    %c32_i32 = arith.constant 32 : i32
    %52 = vector.broadcast %c32_i32 : i32 to vector<1x512xi32>
    %53 = arith.cmpi sge, %15, %52 : vector<1x512xi32>
    %c480_i32 = arith.constant 480 : i32
    %54 = vector.broadcast %c480_i32 : i32 to vector<1x512xi32>
    %55 = arith.cmpi slt, %15, %54 : vector<1x512xi32>
    %c1_i32_17 = arith.constant 1 : i32
    %56 = tpu.dynamic_rotate %13 by %c1_i32_17 dim 0 : vector<32x512xf32>, i32 -> vector<32x512xf32>
    %cst_18 = arith.constant 0.000000e+00 : f32
    %57 = vector.shape_cast %33 : vector<32x1xi1> to vector<32x1xi1>
    %58 = vector.broadcast %57 : vector<32x1xi1> to vector<32x512xi1>
    %59 = vector.broadcast %cst_18 : f32 to vector<32x512xf32>
    %60 = arith.select %58, %56, %59 : vector<32x512xi1>, vector<32x512xf32>
    %c31_i32 = arith.constant 31 : i32
    %61 = tpu.dynamic_rotate %13 by %c31_i32 dim 0 : vector<32x512xf32>, i32 -> vector<32x512xf32>
    %cst_19 = arith.constant 0.000000e+00 : f32
    %62 = vector.shape_cast %51 : vector<32x1xi1> to vector<32x1xi1>
    %63 = vector.broadcast %62 : vector<32x1xi1> to vector<32x512xi1>
    %64 = vector.broadcast %cst_19 : f32 to vector<32x512xf32>
    %65 = arith.select %63, %61, %64 : vector<32x512xi1>, vector<32x512xf32>
    %c0_20 = arith.constant 0 : index
    %c0_21 = arith.constant 0 : index
    %66 = vector.load %arg4[%c0_20, %c0_21] : memref<9x512xf32, #tpu.memory_space<vmem>>, vector<9x512xf32>
    %c32_i32_22 = arith.constant 32 : i32
    %67 = tpu.dynamic_rotate %60 by %c32_i32_22 dim 1 : vector<32x512xf32>, i32 -> vector<32x512xf32>
    %cst_23 = arith.constant 0.000000e+00 : f32
    %68 = vector.shape_cast %53 : vector<1x512xi1> to vector<1x512xi1>
    %69 = vector.broadcast %68 : vector<1x512xi1> to vector<32x512xi1>
    %70 = vector.broadcast %cst_23 : f32 to vector<32x512xf32>
    %71 = arith.select %69, %67, %70 : vector<32x512xi1>, vector<32x512xf32>
    %72 = vector.extract_strided_slice %66 {offsets = [0, 0], sizes = [1, 512], strides = [1, 1]} : vector<9x512xf32> to vector<1x512xf32>
    %73 = vector.broadcast %72 : vector<1x512xf32> to vector<32x512xf32>
    %74 = arith.mulf %71, %73 : vector<32x512xf32>
    %75 = vector.extract_strided_slice %66 {offsets = [1, 0], sizes = [1, 512], strides = [1, 1]} : vector<9x512xf32> to vector<1x512xf32>
    %76 = vector.broadcast %75 : vector<1x512xf32> to vector<32x512xf32>
    %77 = arith.mulf %60, %76 : vector<32x512xf32>
    %78 = arith.addf %74, %77 : vector<32x512xf32>
    %c480_i32_24 = arith.constant 480 : i32
    %79 = tpu.dynamic_rotate %60 by %c480_i32_24 dim 1 : vector<32x512xf32>, i32 -> vector<32x512xf32>
    %cst_25 = arith.constant 0.000000e+00 : f32
    %80 = vector.shape_cast %55 : vector<1x512xi1> to vector<1x512xi1>
    %81 = vector.broadcast %80 : vector<1x512xi1> to vector<32x512xi1>
    %82 = vector.broadcast %cst_25 : f32 to vector<32x512xf32>
    %83 = arith.select %81, %79, %82 : vector<32x512xi1>, vector<32x512xf32>
    %84 = vector.extract_strided_slice %66 {offsets = [2, 0], sizes = [1, 512], strides = [1, 1]} : vector<9x512xf32> to vector<1x512xf32>
    %85 = vector.broadcast %84 : vector<1x512xf32> to vector<32x512xf32>
    %86 = arith.mulf %83, %85 : vector<32x512xf32>
    %87 = arith.addf %78, %86 : vector<32x512xf32>
    %c32_i32_26 = arith.constant 32 : i32
    %88 = tpu.dynamic_rotate %13 by %c32_i32_26 dim 1 : vector<32x512xf32>, i32 -> vector<32x512xf32>
    %cst_27 = arith.constant 0.000000e+00 : f32
    %89 = vector.shape_cast %53 : vector<1x512xi1> to vector<1x512xi1>
    %90 = vector.broadcast %89 : vector<1x512xi1> to vector<32x512xi1>
    %91 = vector.broadcast %cst_27 : f32 to vector<32x512xf32>
    %92 = arith.select %90, %88, %91 : vector<32x512xi1>, vector<32x512xf32>
    %93 = vector.extract_strided_slice %66 {offsets = [3, 0], sizes = [1, 512], strides = [1, 1]} : vector<9x512xf32> to vector<1x512xf32>
    %94 = vector.broadcast %93 : vector<1x512xf32> to vector<32x512xf32>
    %95 = arith.mulf %92, %94 : vector<32x512xf32>
    %96 = arith.addf %87, %95 : vector<32x512xf32>
    %97 = vector.extract_strided_slice %66 {offsets = [4, 0], sizes = [1, 512], strides = [1, 1]} : vector<9x512xf32> to vector<1x512xf32>
    %98 = vector.broadcast %97 : vector<1x512xf32> to vector<32x512xf32>
    %99 = arith.mulf %13, %98 : vector<32x512xf32>
    %100 = arith.addf %96, %99 : vector<32x512xf32>
    %c480_i32_28 = arith.constant 480 : i32
    %101 = tpu.dynamic_rotate %13 by %c480_i32_28 dim 1 : vector<32x512xf32>, i32 -> vector<32x512xf32>
    %cst_29 = arith.constant 0.000000e+00 : f32
    %102 = vector.shape_cast %55 : vector<1x512xi1> to vector<1x512xi1>
    %103 = vector.broadcast %102 : vector<1x512xi1> to vector<32x512xi1>
    %104 = vector.broadcast %cst_29 : f32 to vector<32x512xf32>
    %105 = arith.select %103, %101, %104 : vector<32x512xi1>, vector<32x512xf32>
    %106 = vector.extract_strided_slice %66 {offsets = [5, 0], sizes = [1, 512], strides = [1, 1]} : vector<9x512xf32> to vector<1x512xf32>
    %107 = vector.broadcast %106 : vector<1x512xf32> to vector<32x512xf32>
    %108 = arith.mulf %105, %107 : vector<32x512xf32>
    %109 = arith.addf %100, %108 : vector<32x512xf32>
    %c32_i32_30 = arith.constant 32 : i32
    %110 = tpu.dynamic_rotate %65 by %c32_i32_30 dim 1 : vector<32x512xf32>, i32 -> vector<32x512xf32>
    %cst_31 = arith.constant 0.000000e+00 : f32
    %111 = vector.shape_cast %53 : vector<1x512xi1> to vector<1x512xi1>
    %112 = vector.broadcast %111 : vector<1x512xi1> to vector<32x512xi1>
    %113 = vector.broadcast %cst_31 : f32 to vector<32x512xf32>
    %114 = arith.select %112, %110, %113 : vector<32x512xi1>, vector<32x512xf32>
    %115 = vector.extract_strided_slice %66 {offsets = [6, 0], sizes = [1, 512], strides = [1, 1]} : vector<9x512xf32> to vector<1x512xf32>
    %116 = vector.broadcast %115 : vector<1x512xf32> to vector<32x512xf32>
    %117 = arith.mulf %114, %116 : vector<32x512xf32>
    %118 = arith.addf %109, %117 : vector<32x512xf32>
    %119 = vector.extract_strided_slice %66 {offsets = [7, 0], sizes = [1, 512], strides = [1, 1]} : vector<9x512xf32> to vector<1x512xf32>
    %120 = vector.broadcast %119 : vector<1x512xf32> to vector<32x512xf32>
    %121 = arith.mulf %65, %120 : vector<32x512xf32>
    %122 = arith.addf %118, %121 : vector<32x512xf32>
    %c480_i32_32 = arith.constant 480 : i32
    %123 = tpu.dynamic_rotate %65 by %c480_i32_32 dim 1 : vector<32x512xf32>, i32 -> vector<32x512xf32>
    %cst_33 = arith.constant 0.000000e+00 : f32
    %124 = vector.shape_cast %55 : vector<1x512xi1> to vector<1x512xi1>
    %125 = vector.broadcast %124 : vector<1x512xi1> to vector<32x512xi1>
    %126 = vector.broadcast %cst_33 : f32 to vector<32x512xf32>
    %127 = arith.select %125, %123, %126 : vector<32x512xi1>, vector<32x512xf32>
    %128 = vector.extract_strided_slice %66 {offsets = [8, 0], sizes = [1, 512], strides = [1, 1]} : vector<9x512xf32> to vector<1x512xf32>
    %129 = vector.broadcast %128 : vector<1x512xf32> to vector<32x512xf32>
    %130 = arith.mulf %127, %129 : vector<32x512xf32>
    %131 = arith.addf %122, %130 : vector<32x512xf32>
    %c0_34 = arith.constant 0 : index
    %c0_35 = arith.constant 0 : index
    %132 = vector.load %arg5[%c0_34, %c0_35] : memref<1x512xf32, #tpu.memory_space<vmem>>, vector<1x512xf32>
    %133 = vector.broadcast %132 : vector<1x512xf32> to vector<32x512xf32>
    %134 = arith.addf %131, %133 : vector<32x512xf32>
    %135 = arith.negf %134 : vector<32x512xf32>
    %136 = math.exp %135 : vector<32x512xf32>
    %cst_36 = arith.constant 1.000000e+00 : f32
    %137 = vector.broadcast %cst_36 : f32 to vector<32x512xf32>
    %138 = arith.addf %137, %136 : vector<32x512xf32>
    %139 = arith.divf %137, %138 : vector<32x512xf32>
    %140 = arith.mulf %134, %139 : vector<32x512xf32>
    %141 = vector.shape_cast %140 : vector<32x512xf32> to vector<2x16x512xf32>
    %cst_37 = arith.constant dense<0.000000e+00> : vector<2x512xf32>
    %142 = vector.multi_reduction <add>, %141, %cst_37 [1] : vector<2x16x512xf32> to vector<2x512xf32>
    %143 = arith.truncf %142 : vector<2x512xf32> to vector<2x512xbf16>
    %c0_38 = arith.constant 0 : index
    %c0_39 = arith.constant 0 : index
    %144 = vector.load %arg6[%c0_38, %c0_39] : memref<512x8xbf16, #tpu.memory_space<vmem>>, vector<512x8xbf16>
    %cst_40 = arith.constant dense<0.000000e+00> : vector<2x8xf32>
    %145 = tpu.matmul %143, %144, %cst_40 {dimension_numbers = #tpu.dot_dimension_numbers<[1], [0], [0], [1], [0, 0, 1, 1], [], []>} : vector<2x512xbf16>, vector<512x8xbf16>, vector<2x8xf32> -> vector<2x8xf32>
    %c0_41 = arith.constant 0 : index
    %c0_42 = arith.constant 0 : index
    %146 = vector.load %arg7[%c0_41, %c0_42] : memref<1x8xf32, #tpu.memory_space<vmem>>, vector<1x8xf32>
    %147 = vector.broadcast %146 : vector<1x8xf32> to vector<2x8xf32>
    %148 = arith.addf %145, %147 : vector<2x8xf32>
    %149 = arith.negf %148 : vector<2x8xf32>
    %150 = math.exp %149 : vector<2x8xf32>
    %cst_43 = arith.constant 1.000000e+00 : f32
    %151 = vector.broadcast %cst_43 : f32 to vector<2x8xf32>
    %152 = arith.addf %151, %150 : vector<2x8xf32>
    %153 = arith.divf %151, %152 : vector<2x8xf32>
    %154 = arith.mulf %148, %153 : vector<2x8xf32>
    %155 = arith.truncf %154 : vector<2x8xf32> to vector<2x8xbf16>
    %c0_44 = arith.constant 0 : index
    %c0_45 = arith.constant 0 : index
    %156 = vector.load %arg8[%c0_44, %c0_45] : memref<8x512xbf16, #tpu.memory_space<vmem>>, vector<8x512xbf16>
    %cst_46 = arith.constant dense<0.000000e+00> : vector<2x512xf32>
    %157 = tpu.matmul %155, %156, %cst_46 {dimension_numbers = #tpu.dot_dimension_numbers<[1], [0], [0], [1], [0, 0, 1, 1], [], []>} : vector<2x8xbf16>, vector<8x512xbf16>, vector<2x512xf32> -> vector<2x512xf32>
    %c0_47 = arith.constant 0 : index
    %c0_48 = arith.constant 0 : index
    %158 = vector.load %arg9[%c0_47, %c0_48] : memref<1x512xf32, #tpu.memory_space<vmem>>, vector<1x512xf32>
    %159 = vector.broadcast %158 : vector<1x512xf32> to vector<2x512xf32>
    %160 = arith.addf %157, %159 : vector<2x512xf32>
    %161 = arith.negf %160 : vector<2x512xf32>
    %162 = math.exp %161 : vector<2x512xf32>
    %cst_49 = arith.constant 1.000000e+00 : f32
    %163 = vector.broadcast %cst_49 : f32 to vector<2x512xf32>
    %164 = arith.addf %163, %162 : vector<2x512xf32>
    %165 = arith.divf %163, %164 : vector<2x512xf32>
    %166 = vector.shape_cast %165 : vector<2x512xf32> to vector<2x1x512xf32>
    %167 = vector.broadcast %166 : vector<2x1x512xf32> to vector<2x16x512xf32>
    %168 = arith.mulf %141, %167 : vector<2x16x512xf32>
    %169 = vector.shape_cast %168 : vector<2x16x512xf32> to vector<32x512xf32>
    %170 = arith.truncf %169 : vector<32x512xf32> to vector<32x512xbf16>
    %c0_50 = arith.constant 0 : index
    %c0_51 = arith.constant 0 : index
    %171 = vector.load %arg10[%c0_50, %c0_51] : memref<512x128xbf16, #tpu.memory_space<vmem>>, vector<512x128xbf16>
    %cst_52 = arith.constant dense<0.000000e+00> : vector<32x128xf32>
    %172 = tpu.matmul %170, %171, %cst_52 {dimension_numbers = #tpu.dot_dimension_numbers<[1], [0], [0], [1], [0, 0, 1, 1], [], []>} : vector<32x512xbf16>, vector<512x128xbf16>, vector<32x128xf32> -> vector<32x128xf32>
    %c0_53 = arith.constant 0 : index
    %c0_54 = arith.constant 0 : index
    %173 = vector.load %arg11[%c0_53, %c0_54] : memref<1x128xf32, #tpu.memory_space<vmem>>, vector<1x128xf32>
    %174 = vector.broadcast %173 : vector<1x128xf32> to vector<32x128xf32>
    %175 = arith.addf %172, %174 : vector<32x128xf32>
    %176 = arith.addf %175, %1 : vector<32x128xf32>
    %177 = vector.shape_cast %176 : vector<32x128xf32> to vector<2x16x128xf32>
    %c0_55 = arith.constant 0 : index
    %c0_56 = arith.constant 0 : index
    %c0_57 = arith.constant 0 : index
    %178 = vector.load %arg12[%c0_55, %c0_56, %c0_57] : memref<2x16x128xf32, #tpu.memory_space<vmem>>, vector<2x16x128xf32>
    tpu.vector_store %arg12[%c0_55, %c0_56, %c0_57], %177 {strides = array<i32>} : memref<2x16x128xf32, #tpu.memory_space<vmem>>, vector<2x16x128xf32>,
    return
  }
  func.func @transform_0(%arg0: i32) -> (i32, i32, i32) {
    %c0_i32 = arith.constant 0 : i32
    %c0_i32_0 = arith.constant 0 : i32
    %c0_i32_1 = arith.constant 0 : i32
    %c0_i32_2 = arith.constant 0 : i32
    return %c0_i32, %c0_i32_0, %c0_i32_1 : i32, i32, i32
  }
  func.func @transform_1(%arg0: i32) -> (i32, i32) {
    %c0_i32 = arith.constant 0 : i32
    %c0_i32_0 = arith.constant 0 : i32
    %c0_i32_1 = arith.constant 0 : i32
    return %c0_i32, %c0_i32_0 : i32, i32
  }
  func.func @transform_2(%arg0: i32) -> (i32, i32) {
    %c0_i32 = arith.constant 0 : i32
    %c0_i32_0 = arith.constant 0 : i32
    %c0_i32_1 = arith.constant 0 : i32
    return %c0_i32, %c0_i32_0 : i32, i32
  }
  func.func @transform_3(%arg0: i32) -> (i32, i32) {
    %c0_i32 = arith.constant 0 : i32
    %c0_i32_0 = arith.constant 0 : i32
    %c0_i32_1 = arith.constant 0 : i32
    return %c0_i32, %c0_i32_0 : i32, i32
  }
  func.func @transform_4(%arg0: i32) -> (i32, i32) {
    %c0_i32 = arith.constant 0 : i32
    %c0_i32_0 = arith.constant 0 : i32
    %c0_i32_1 = arith.constant 0 : i32
    return %c0_i32, %c0_i32_0 : i32, i32
  }
  func.func @transform_5(%arg0: i32) -> (i32, i32) {
    %c0_i32 = arith.constant 0 : i32
    %c0_i32_0 = arith.constant 0 : i32
    %c0_i32_1 = arith.constant 0 : i32
    return %c0_i32, %c0_i32_0 : i32, i32
  }
  func.func @transform_6(%arg0: i32) -> (i32, i32) {
    %c0_i32 = arith.constant 0 : i32
    %c0_i32_0 = arith.constant 0 : i32
    %c0_i32_1 = arith.constant 0 : i32
    return %c0_i32, %c0_i32_0 : i32, i32
  }
  func.func @transform_7(%arg0: i32) -> (i32, i32) {
    %c0_i32 = arith.constant 0 : i32
    %c0_i32_0 = arith.constant 0 : i32
    %c0_i32_1 = arith.constant 0 : i32
    return %c0_i32, %c0_i32_0 : i32, i32
  }
  func.func @transform_8(%arg0: i32) -> (i32, i32) {
    %c0_i32 = arith.constant 0 : i32
    %c0_i32_0 = arith.constant 0 : i32
    %c0_i32_1 = arith.constant 0 : i32
    return %c0_i32, %c0_i32_0 : i32, i32
  }
  func.func @transform_9(%arg0: i32) -> (i32, i32) {
    %c0_i32 = arith.constant 0 : i32
    %c0_i32_0 = arith.constant 0 : i32
    %c0_i32_1 = arith.constant 0 : i32
    return %c0_i32, %c0_i32_0 : i32, i32
  }
  func.func @transform_10(%arg0: i32) -> (i32, i32) {
    %c0_i32 = arith.constant 0 : i32
    %c0_i32_0 = arith.constant 0 : i32
    %c0_i32_1 = arith.constant 0 : i32
    return %c0_i32, %c0_i32_0 : i32, i32
  }
  func.func @transform_11(%arg0: i32) -> (i32, i32, i32) {
    %c0_i32 = arith.constant 0 : i32
    %c0_i32_0 = arith.constant 0 : i32
    %c0_i32_1 = arith.constant 0 : i32
    %c0_i32_2 = arith.constant 0 : i32
    return %c0_i32, %c0_i32_0, %c0_i32_1 : i32, i32, i32
  }
}

</mosaic_0001>

<bundles_post_ra>
// kernel: tpu_custom_call.1
= control target key start
LH: loop header
LB: loop body
LE: loop exit
PB: predicated region body
PF: predicated region fallthrough
CT: control target
= control target key end

     0   :  { %16 = vsyncpa [#allocation3], 0  ;;  %s5597_s0 = inlined_call_operand.hbm [shape: f32[2,16,128], index: 0, kind: input, shape index: {}]   ;;  %s5598_s1 = inlined_call_operand.vmem [shape: bf16[128,512], index: 1, kind: input, shape index: {}]   ;;  %s5599_s2 = inlined_call_operand.hbm [shape: f32[1,512], index: 2, kind: input, shape index: {}]   ;;  %s5600_s3 = inlined_call_operand.hbm [shape: f32[9,512], index: 3, kind: input, shape index: {}]   ;;  %s5601_s4 = inlined_call_operand.hbm [shape: f32[1,512], index: 4, kind: input, shape index: {}]   ;;  %s5602_s5 = inlined_call_operand.vmem [shape: bf16[512,8], index: 5, kind: input, shape index: {}]   ;;  %s5603_s6 = inlined_call_operand.vmem [shape: f32[1,8], index: 6, kind: input, shape index: {}]   ;;  %s5604_s7 = inlined_call_operand.vmem [shape: bf16[8,512], index: 7, kind: input, shape index: {}]   ;;  %s5605_s8 = inlined_call_operand.vmem [shape: f32[1,512], index: 8, kind: input, shape index: {}]   ;;  %s5606_s9 = inlined_call_operand.hbm [shape: bf16[512,128], index: 9, kind: input, shape index: {}]   ;;  %s5607_s10 = inlined_call_operand.vmem [shape: f32[1,128], index: 10, kind: input, shape index: {}]   ;;  %s5608_s11 = inlined_call_operand.hbm [shape: f32[2,16,128], index: 11, kind: output, shape index: {}]  }
   0x1   :  { %17 = vsyncpa [#allocation6], 0 }
   0x2   :  { %18 = vsyncpa [#allocation9], 0 }
   0x3   :  { %19 = vsyncpa [#allocation4], 0  ;;  %s3465_s17 = smov [#allocation5]   ;;  %s3466_s19 = smov [#allocation8]  }
   0x4   :  { %s40_s18 = sshll.u32 %s3465_s17, 4  ;;  %s62_s20 = sshll.u32 %s3466_s19, 4  ;;  %s41_s18 = int_to_ptr.vmem [resolvable:$true] %s40_s18  ;;  %s63_s20 = int_to_ptr.vmem [resolvable:$true] %s62_s20 }
   0x5   :  { %s3325_s23 = scalar_lea.hbm %s5599_s2, 64 }
   0x6   :  { %p3326_p0 = scmp.ne.s32.totalorder %s5599_s2, %s3325_s23  ;;  %p3329_p1 = scmp.lt.u32.totalorder %s3325_s23, %s5599_s2 }
   0x8   :  { %p3331_p2 = pnand %p3329_p1, %p3326_p0 }
   0xa   :  { %3334 = shalt.err (!%p3331_p2)
}
   0xb   :  { %s3335_s28 = scalar_lea.vmem %s41_s18, 64  ;;  %p3340_p4 = scmp.lt.s32.totalorder %s41_s18, %s41_s18 }
   0xc   :  { %p3336_p3 = scmp.ne.s32.totalorder %s41_s18, %s3335_s28  ;;  %p3341_p5 = scmp.lt.s32.totalorder %s3335_s28, %s3335_s28 }
   0xe   :  { %p3342_p6 = por %p3341_p5, %p3340_p4 }
  0x10   :  { %p3343_p7 = pnand %p3342_p6, %p3336_p3 }
  0x12   :  { %3346 = shalt.err (!%p3343_p7)
}
  0x13   :  { %43 = dma.hbm_to_vmem [thread:$0]  %s5599_s2, 64, %s41_s18, [#allocation6]  }
  0x14   :  { %s3347_s14 = scalar_lea.hbm %s5601_s4, 64 }
  0x15   :  { %p3348_p8 = scmp.ne.s32.totalorder %s5601_s4, %s3347_s14  ;;  %p3351_p9 = scmp.lt.u32.totalorder %s3347_s14, %s5601_s4 }
  0x17   :  { %p3353_p10 = pnand %p3351_p9, %p3348_p8 }
  0x19   :  { %3356 = shalt.err (!%p3353_p10)
}
  0x1a   :  { %s3357_s21 = scalar_lea.vmem %s63_s20, 64  ;;  %p3362_p12 = scmp.lt.s32.totalorder %s63_s20, %s63_s20 }
  0x1b   :  { %p3358_p11 = scmp.ne.s32.totalorder %s63_s20, %s3357_s21  ;;  %p3363_p13 = scmp.lt.s32.totalorder %s3357_s21, %s3357_s21 }
  0x1d   :  { %p3364_p0 = por %p3363_p13, %p3362_p12 }
  0x1f   :  { %p3365_p1 = pnand %p3364_p0, %p3358_p11 }
  0x21   :  { %3368 = shalt.err (!%p3365_p1)
}
  0x22   :  { %65 = dma.hbm_to_vmem [thread:$0]  %s5601_s4, 64, %s63_s20, [#allocation9]  }
  0x23   :  { %s3467_s22 = smov [#allocation2]   ;;  %s3369_s26 = scalar_lea.hbm %s5597_s0, 512 }
  0x24   :  { %s25_s23 = sshll.u32 %s3467_s22, 4  ;;  %p3370_p2 = scmp.ne.s32.totalorder %s5597_s0, %s3369_s26  ;;  %s26_s23 = int_to_ptr.vmem [resolvable:$true] %s25_s23 }
  0x25   :  { %p3373_p3 = scmp.lt.u32.totalorder %s3369_s26, %s5597_s0 }
  0x27   :  { %p3375_p4 = pnand %p3373_p3, %p3370_p2 }
  0x29   :  { %3378 = shalt.err (!%p3375_p4)
}
  0x2a   :  { %s3379_s12 = scalar_lea.vmem %s26_s23, 512  ;;  %p3384_p6 = scmp.lt.s32.totalorder %s26_s23, %s26_s23 }
  0x2b   :  { %p3380_p5 = scmp.ne.s32.totalorder %s26_s23, %s3379_s12  ;;  %p3385_p7 = scmp.lt.s32.totalorder %s3379_s12, %s3379_s12 }
  0x2d   :  { %p3386_p8 = por %p3385_p7, %p3384_p6 }
  0x2f   :  { %p3387_p9 = pnand %p3386_p8, %p3380_p5 }
  0x31   :  { %3390 = shalt.err (!%p3387_p9)
}
  0x32   :  { %s3468_s4 = smov 128   ;;  %s3469_s20 = smov 8  }
  0x33   :  { %31 = dma.hbm_to_vmem [thread:$0]  %s5597_s0, 512, %s26_s23, [#allocation3], %s3468_s4, %s3468_s4, %s3469_s20  }
  0x34   :  { %s3470_s15 = smov [#allocation7]   ;;  %s3391_s21 = scalar_lea.hbm %s5600_s3, 1024 }
  0x35   :  { %s49_s16 = sshll.u32 %s3470_s15, 4  ;;  %p3392_p10 = scmp.ne.s32.totalorder %s5600_s3, %s3391_s21  ;;  %s50_s16 = int_to_ptr.vmem [resolvable:$true] %s49_s16 }
  0x36   :  { %p3395_p11 = scmp.lt.u32.totalorder %s3391_s21, %s5600_s3 }
  0x38   :  { %p3397_p12 = pnand %p3395_p11, %p3392_p10 }
  0x3a   :  { %3400 = shalt.err (!%p3397_p12)
}
  0x3b   :  { %s3401_s25 = scalar_lea.vmem %s50_s16, 1024  ;;  %p3406_p0 = scmp.lt.s32.totalorder %s50_s16, %s50_s16 }
  0x3c   :  { %p3402_p13 = scmp.ne.s32.totalorder %s50_s16, %s3401_s25  ;;  %p3407_p1 = scmp.lt.s32.totalorder %s3401_s25, %s3401_s25 }
  0x3e   :  { %p3408_p2 = por %p3407_p1, %p3406_p0 }
  0x40   :  { %p3409_p3 = pnand %p3408_p2, %p3402_p13 }
  0x42   :  { %3412 = shalt.err (!%p3409_p3)
}
  0x43   :  { %s3471_s0 = smov 512   ;;  %s3472_s23 = smov 32  }
  0x44   :  { %55 = dma.hbm_to_vmem [thread:$0]  %s5600_s3, 1024, %s50_s16, [#allocation6], %s3471_s0, %s3471_s0, %s3472_s23  }
  0x45   :  { %s3473_s28 = smov [#allocation10]   ;;  %s3413_s13 = scalar_lea.hbm %s5606_s9, 4096 }
  0x46   :  { %s79_s29 = sshll.u32 %s3473_s28, 4  ;;  %p3414_p4 = scmp.ne.s32.totalorder %s5606_s9, %s3413_s13  ;;  %s80_s29 = int_to_ptr.vmem [resolvable:$true] %s79_s29 }
  0x47   :  { %p3417_p5 = scmp.lt.u32.totalorder %s3413_s13, %s5606_s9 }
  0x49   :  { %p3419_p6 = pnand %p3417_p5, %p3414_p4 }
  0x4b   :  { %3422 = shalt.err (!%p3419_p6)
}
  0x4c   :  { %s3423_s21 = scalar_lea.vmem %s80_s29, 4096  ;;  %p3428_p8 = scmp.lt.s32.totalorder %s80_s29, %s80_s29 }
  0x4d   :  { %p3424_p7 = scmp.ne.s32.totalorder %s80_s29, %s3423_s21  ;;  %p3429_p9 = scmp.lt.s32.totalorder %s3423_s21, %s3423_s21 }
  0x4f   :  { %p3430_p10 = por %p3429_p9, %p3428_p8 }
  0x51   :  { %p3431_p11 = pnand %p3430_p10, %p3424_p7 }
  0x53   :  { %3434 = shalt.err (!%p3431_p11)
}
  0x54   :  { %s3474_s3 = smov 64   ;;  %s3475_s16 = smov 4  }
  0x55   :  { %85 = dma.hbm_to_vmem [thread:$0]  %s5606_s9, 4096, %s80_s29, [#allocation9], %s3474_s3, %s3474_s3, %s3475_s16  }
  0x56   :  { %3457 = dma.done.wait [#allocation3], 512  }
  0x57   :  { %3458 = vsyncadd [#allocation3], 4294966784 }
  0x58   :  { %3459 = dma.done.wait [#allocation6], 1088  }
  0x59   :  { %3460 = vsyncadd [#allocation6], 4294966208 }
  0x5a   :  { %3461 = dma.done.wait [#allocation9], 4160  }
  0x5b   :  { %3462 = vsyncadd [#allocation9], 4294963136  ;;  %v5609_v0 = vmov 0   ;;  %v3057_v1 = vld [vmem:[%s5598_s1 + $0x4] ss:$16 sps:$4 sm:$0xff]   ;;  %v105_v34 = vld [vmem:[#allocation2 + $0x8] sm:$0xff]  ;;  %v5611_v39 = vlaneseq }
  0x5c   :  { %356 = vmatprep.mubr.bf16.mxu0 %v5609_v0  ;;  %409 = vmatprep.mubr.bf16.mxu1 %v5609_v0  ;;  %v3059_v2 = vld [vmem:[%s5598_s1 + $0xc] ss:$16 sps:$4 sm:$0xff]   ;;  %v3061_v3 = vld [vmem:[%s5598_s1] ss:$16 sps:$4 sm:$0xff]   ;;  %v3062_v4 = vld [vmem:[%s5598_s1 + $0x8] ss:$16 sps:$4 sm:$0xff]  }
  0x5d   :  { %324 = vmatprep.subr.bf16.mxu0 %v3057_v1  ;;  %377 = vmatprep.subr.bf16.mxu1 %v3059_v2  ;;  %v3063_v5 = vld [vmem:[%s5598_s1 + $0x24] ss:$16 sps:$4 sm:$0xff]   ;;  %v3065_v6 = vld [vmem:[%s5598_s1 + $0x2c] ss:$16 sps:$4 sm:$0xff]   ;;  %v3067_v7 = vld [vmem:[%s5598_s1 + $0x20] ss:$16 sps:$4 sm:$0xff]  }
  0x5e   :  { %325 = vmatpush1.bf16.msra.mxu0 %v3061_v3  ;;  %378 = vmatpush1.bf16.msra.mxu1 %v3062_v4  ;;  %v3068_v8 = vld [vmem:[%s5598_s1 + $0x28] ss:$16 sps:$4 sm:$0xff]   ;;  %v3069_v9 = vld [vmem:[%s5598_s1 + $0x44] ss:$16 sps:$4 sm:$0xff]   ;;  %v3071_v10 = vld [vmem:[%s5598_s1 + $0x4c] ss:$16 sps:$4 sm:$0xff]  }
  0x5f   :  { %326 = vmatprep.subr.bf16.mxu0 %v3063_v5  ;;  %379 = vmatprep.subr.bf16.mxu1 %v3065_v6  ;;  %v3073_v11 = vld [vmem:[%s5598_s1 + $0x40] ss:$16 sps:$4 sm:$0xff]   ;;  %v3074_v12 = vld [vmem:[%s5598_s1 + $0x48] ss:$16 sps:$4 sm:$0xff]   ;;  %v3075_v13 = vld [vmem:[%s5598_s1 + $0x64] ss:$16 sps:$4 sm:$0xff]  }
  0x60   :  { %v3077_v14 = vld [vmem:[%s5598_s1 + $0x6c] ss:$16 sps:$4 sm:$0xff]   ;;  %v3079_v15 = vld [vmem:[%s5598_s1 + $0x60] ss:$16 sps:$4 sm:$0xff]   ;;  %v3080_v16 = vld [vmem:[%s5598_s1 + $0x68] ss:$16 sps:$4 sm:$0xff]  }
  0x61   :  { %v3081_v17 = vld [vmem:[%s5598_s1 + $0x84] ss:$16 sps:$4 sm:$0xff]   ;;  %v3083_v18 = vld [vmem:[%s5598_s1 + $0x8c] ss:$16 sps:$4 sm:$0xff]   ;;  %v3085_v19 = vld [vmem:[%s5598_s1 + $0x80] ss:$16 sps:$4 sm:$0xff]  }
  0x62   :  { %327 = vmatpush1.bf16.msra.mxu0 %v3067_v7  ;;  %380 = vmatpush1.bf16.msra.mxu1 %v3068_v8  ;;  %v3086_v20 = vld [vmem:[%s5598_s1 + $0x88] ss:$16 sps:$4 sm:$0xff]   ;;  %v3087_v21 = vld [vmem:[%s5598_s1 + $0xa4] ss:$16 sps:$4 sm:$0xff]   ;;  %v3089_v22 = vld [vmem:[%s5598_s1 + $0xac] ss:$16 sps:$4 sm:$0xff]  }
  0x63   :  { %328 = vmatprep.subr.bf16.mxu0 %v3069_v9  ;;  %381 = vmatprep.subr.bf16.mxu1 %v3071_v10  ;;  %v3091_v23 = vld [vmem:[%s5598_s1 + $0xa0] ss:$16 sps:$4 sm:$0xff]   ;;  %v3092_v24 = vld [vmem:[%s5598_s1 + $0xa8] ss:$16 sps:$4 sm:$0xff]   ;;  %v3093_v25 = vld [vmem:[%s5598_s1 + $0xc4] ss:$16 sps:$4 sm:$0xff]  }
  0x64   :  { %v3095_v26 = vld [vmem:[%s5598_s1 + $0xcc] ss:$16 sps:$4 sm:$0xff]   ;;  %v3097_v27 = vld [vmem:[%s5598_s1 + $0xc0] ss:$16 sps:$4 sm:$0xff]   ;;  %v3098_v28 = vld [vmem:[%s5598_s1 + $0xc8] ss:$16 sps:$4 sm:$0xff]  }
  0x65   :  { %v3099_v29 = vld [vmem:[%s5598_s1 + $0xe4] ss:$16 sps:$4 sm:$0xff]   ;;  %v3101_v30 = vld [vmem:[%s5598_s1 + $0xec] ss:$16 sps:$4 sm:$0xff]   ;;  %v3103_v31 = vld [vmem:[%s5598_s1 + $0xe0] ss:$16 sps:$4 sm:$0xff]  }
  0x66   :  { %329 = vmatpush1.bf16.msra.mxu0 %v3073_v11  ;;  %382 = vmatpush1.bf16.msra.mxu1 %v3074_v12  ;;  %v3104_v32 = vld [vmem:[%s5598_s1 + $0xe8] ss:$16 sps:$4 sm:$0xff]   ;;  %v104_v33 = vld [vmem:[#allocation2] sm:$0xff]  ;;  %v106_v36 = vld [vmem:[#allocation2 + $0x10] sm:$0xff]  ;;  %v3705_v40 = vshrl.u32 %v5611_v39, 7  ;;  %s3477_s1 = smov 96  }
  0x67   :  { %330 = vmatprep.subr.bf16.mxu0 %v3075_v13  ;;  %383 = vmatprep.subr.bf16.mxu1 %v3077_v14  ;;  %v108_v35 = vpack.c.bf16 %v105_v34, %v104_v33  ;;  %v107_v37 = vld [vmem:[#allocation2 + $0x18] sm:$0xff]  ;;  %v142_v43 = vld [vmem:[#allocation5] sm:$0xf]  ;;  %vm1857_vm10 = vcmask 1041409   ;;  %vm2188_vm11 = vcmask 1043456   ;;  %vm2184_vm12 = vcmask 64512  }
  0x68   :  { %v109_v38 = vpack.c.bf16 %v107_v37, %v106_v36  ;;  %5692 = vst [vmem:[#allocation16_spill] sm:$0xff] %v3705_v40  ;;  %v3708_v41 = vsub.s32 0, %v3705_v40  ;;  %v3711_v42 = vsub.s32 2, %v3705_v40  ;;  %v3714_v44 = vsub.s32 1, %v3705_v40 }
  0x69   :  { %v3717_v45 = vsub.s32 3, %v3705_v40  ;;  %vm632_vm0 = vcmp.lt.s32.totalorder %v3705_v40, 1  ;;  %vm689_vm1 = vcmp.lt.s32.totalorder %v3705_v40, 7 }
  0x6a   :  { %331 = vmatpush1.bf16.msra.mxu0 %v3079_v15  ;;  %384 = vmatpush1.bf16.msra.mxu1 %v3080_v16  ;;  %5693 = vst [vmem:[#allocation17_spill] sm:$0xff] %v3708_v41  ;;  %5694 = vst [vmem:[#allocation18_spill] sm:$0xff] %v3711_v42  ;;  %v147_v46 = vrot.slane %v142_v43, %v3708_v41  ;;  %v155_v47 = vrot.slane %v142_v43, %v3711_v42 }
  0x6b   :  { %332 = vmatprep.subr.bf16.mxu0 %v3081_v17  ;;  %385 = vmatprep.subr.bf16.mxu1 %v3083_v18  ;;  %5695 = vst [vmem:[#allocation19_spill] sm:$0xff] %v3714_v44  ;;  %5696 = vst [vmem:[#allocation20_spill] sm:$0xff] %v3717_v45  ;;  %v151_v48 = vrot.slane %v142_v43, %v3714_v44  ;;  %v159_v49 = vrot.slane %v142_v43, %v3717_v45 }
  0x6e   :  { %333 = vmatpush1.bf16.msra.mxu0 %v3085_v19  ;;  %386 = vmatpush1.bf16.msra.mxu1 %v3086_v20 }
  0x6f   :  { %334 = vmatprep.subr.bf16.mxu0 %v3087_v21  ;;  %387 = vmatprep.subr.bf16.mxu1 %v3089_v22 }
  0x72   :  { %335 = vmatpush1.bf16.msra.mxu0 %v3091_v23  ;;  %388 = vmatpush1.bf16.msra.mxu1 %v3092_v24 }
  0x73   :  { %336 = vmatprep.subr.bf16.mxu0 %v3093_v25  ;;  %389 = vmatprep.subr.bf16.mxu1 %v3095_v26 }
  0x76   :  { %337 = vmatpush1.bf16.msra.mxu0 %v3097_v27  ;;  %390 = vmatpush1.bf16.msra.mxu1 %v3098_v28 }
  0x77   :  { %338 = vmatprep.subr.bf16.mxu0 %v3099_v29  ;;  %391 = vmatprep.subr.bf16.mxu1 %v3101_v30 }
  0x7a   :  { %339 = vmatpush1.bf16.msra.mxu0 %v3103_v31  ;;  %392 = vmatpush1.bf16.msra.mxu1 %v3104_v32 }
  0x7d   :  { %357 = vmatmul.mubr.bf16.vlgmr.msra.gmra.mrb[0].mxu0 %v108_v35  ;;  %410 = vmatmul.mubr.bf16.vlgmr.msra.gmra.mrb[0].mxu1 %v108_v35 }
  0x7e   :  { %366 = vmatprep.mubr.bf16.mxu0 %v5609_v0  ;;  %419 = vmatprep.mubr.bf16.mxu1 %v5609_v0 }
  0x85   :  { %367 = vmatmul.mubr.bf16.gmra.mrb[4].mxu0 %v109_v38  ;;  %420 = vmatmul.mubr.bf16.gmra.mrb[4].mxu1 %v109_v38 }
 0x150   :  { %v358_v50 = vpop.f32.mrb[0].mxu0  ;;  %v411_v51 = vpop.f32.mrb[0].mxu1 }
 0x151   :  { %v3723_v52 = vadd.f32 %v358_v50, %v147_v46  ;;  %v3725_v53 = vadd.f32 %v411_v51, %v155_v47  ;;  %v360_v54 = vpop.f32.mrb[1].mxu0  ;;  %v413_v55 = vpop.f32.mrb[1].mxu1 }
 0x152   :  { %v3727_v56 = vadd.f32 %v360_v54, %v151_v48  ;;  %v3729_v57 = vadd.f32 %v413_v55, %v159_v49  ;;  %v362_v58 = vpop.f32.mrb[2].mxu0  ;;  %v415_v59 = vpop.f32.mrb[2].mxu1 }
 0x153   :  { %v2827_v60 = vmul.f32 -1.442695, %v3723_v52  ;;  %v2829_v61 = vmul.f32 -1.442695, %v3725_v53  ;;  %v3733_v62 = vadd.f32 %v362_v58, %v147_v46  ;;  %v3735_v63 = vadd.f32 %v415_v59, %v155_v47  ;;  %v364_v1 = vpop.f32.mrb[3].mxu0  ;;  %v417_v2 = vpop.f32.mrb[3].mxu1 }
 0x154   :  { %v2828_v3 = vmul.f32 -1.442695, %v3727_v56  ;;  %v2830_v4 = vmul.f32 -1.442695, %v3729_v57  ;;  %v3739_v5 = vadd.f32 %v364_v1, %v151_v48  ;;  %v3741_v6 = vadd.f32 %v417_v2, %v159_v49 }
 0x155   :  { %3173 = vpow2.f32 %v2827_v60  ;;  %v2831_v7 = vmul.f32 -1.442695, %v3733_v62  ;;  %v2833_v8 = vmul.f32 -1.442695, %v3735_v63 }
 0x156   :  { %3175 = vpow2.f32 %v2829_v61  ;;  %v2832_v9 = vmul.f32 -1.442695, %v3739_v5  ;;  %v2834_v10 = vmul.f32 -1.442695, %v3741_v6 }
 0x157   :  { %3177 = vpow2.f32 %v2828_v3 }
 0x158   :  { %3179 = vpow2.f32 %v2830_v4  ;;  %v368_v11 = vpop.f32.mrb[4].mxu0  ;;  %v421_v12 = vpop.f32.mrb[4].mxu1 }
 0x159   :  { %3181 = vpow2.f32 %v2831_v7  ;;  %v3747_v13 = vadd.f32 %v368_v11, %v147_v46  ;;  %v3749_v14 = vadd.f32 %v421_v12, %v155_v47  ;;  %v370_v15 = vpop.f32.mrb[5].mxu0  ;;  %v423_v16 = vpop.f32.mrb[5].mxu1 }
 0x15a   :  { %3183 = vpow2.f32 %v2833_v8  ;;  %v3751_v17 = vadd.f32 %v370_v15, %v151_v48  ;;  %v3753_v18 = vadd.f32 %v423_v16, %v159_v49  ;;  %v372_v19 = vpop.f32.mrb[6].mxu0  ;;  %v425_v20 = vpop.f32.mrb[6].mxu1 }
 0x15b   :  { %3185 = vpow2.f32 %v2832_v9  ;;  %v2835_v21 = vmul.f32 -1.442695, %v3747_v13  ;;  %v2837_v22 = vmul.f32 -1.442695, %v3749_v14  ;;  %v3757_v23 = vadd.f32 %v372_v19, %v147_v46  ;;  %v374_v24 = vpop.f32.mrb[7].mxu0  ;;  %v427_v25 = vpop.f32.mrb[7].mxu1 }
 0x15c   :  { %3187 = vpow2.f32 %v2834_v10  ;;  %v2836_v26 = vmul.f32 -1.442695, %v3751_v17  ;;  %v2838_v27 = vmul.f32 -1.442695, %v3753_v18  ;;  %v3761_v28 = vadd.f32 %v425_v20, %v155_v47 }
 0x15d   :  { %3189 = vpow2.f32 %v2835_v21  ;;  %v2839_v29 = vmul.f32 -1.442695, %v3757_v23  ;;  %v3764_v30 = vadd.f32 %v374_v24, %v151_v48  ;;  %v3766_v31 = vadd.f32 %v427_v25, %v159_v49 }
 0x15e   :  { %3191 = vpow2.f32 %v2837_v22  ;;  %v2841_v8 = vmul.f32 -1.442695, %v3761_v28 }
 0x15f   :  { %v3174_v32 = vpop.eup %3173  ;;  %3193 = vpow2.f32 %v2836_v26  ;;  %v2840_v11 = vmul.f32 -1.442695, %v3764_v30  ;;  %v2842_v16 = vmul.f32 -1.442695, %v3766_v31 }
 0x160   :  { %v3176_v33 = vpop.eup %3175  ;;  %v478_v34 = vadd.f32 1.0, %v3174_v32  ;;  %3195 = vpow2.f32 %v2838_v27 }
 0x161   :  { %v3178_v35 = vpop.eup %3177  ;;  %v480_v36 = vadd.f32 1.0, %v3176_v33  ;;  %3197 = vpow2.f32 %v2839_v29 }
 0x162   :  { %v3180_v37 = vpop.eup %3179  ;;  %3199 = vrcp.f32 %v478_v34  ;;  %v479_v38 = vadd.f32 1.0, %v3178_v35 }
 0x163   :  { %v3182_v43 = vpop.eup %3181  ;;  %3201 = vrcp.f32 %v480_v36  ;;  %v481_v46 = vadd.f32 1.0, %v3180_v37 }
 0x164   :  { %v3184_v47 = vpop.eup %3183  ;;  %3203 = vrcp.f32 %v479_v38  ;;  %v482_v48 = vadd.f32 1.0, %v3182_v43 }
 0x165   :  { %v3186_v49 = vpop.eup %3185  ;;  %3205 = vrcp.f32 %v481_v46  ;;  %v484_v50 = vadd.f32 1.0, %v3184_v47 }
 0x166   :  { %v3188_v51 = vpop.eup %3187  ;;  %3207 = vrcp.f32 %v482_v48  ;;  %v483_v54 = vadd.f32 1.0, %v3186_v49 }
 0x167   :  { %v3190_v55 = vpop.eup %3189  ;;  %3209 = vrcp.f32 %v484_v50  ;;  %v485_v58 = vadd.f32 1.0, %v3188_v51 }
 0x168   :  { %v3192_v59 = vpop.eup %3191  ;;  %3211 = vrcp.f32 %v483_v54  ;;  %v486_v60 = vadd.f32 1.0, %v3190_v55 }
 0x169   :  { %v3194_v61 = vpop.eup %3193  ;;  %3213 = vrcp.f32 %v485_v58  ;;  %v488_v1 = vadd.f32 1.0, %v3192_v59 }
 0x16a   :  { %v3196_v2 = vpop.eup %3195  ;;  %3215 = vrcp.f32 %v486_v60  ;;  %v487_v3 = vadd.f32 1.0, %v3194_v61 }
 0x16b   :  { %v3198_v4 = vpop.eup %3197  ;;  %3217 = vrcp.f32 %v488_v1  ;;  %v489_v7 = vadd.f32 1.0, %v3196_v2 }
 0x16c   :  { %v3200_v9 = vpop.eup %3199  ;;  %3219 = vrcp.f32 %v487_v3  ;;  %v490_v10 = vadd.f32 1.0, %v3198_v4 }
 0x16d   :  { %v3202_v12 = vpop.eup %3201  ;;  %v3771_v15 = vmul.f32 %v3200_v9, %v3723_v52  ;;  %3221 = vrcp.f32 %v489_v7 }
 0x16e   :  { %v3204_v19 = vpop.eup %3203  ;;  %3223 = vrcp.f32 %v490_v10  ;;  %v3777_v22 = vmul.f32 %v3202_v12, %v3725_v53 }
 0x16f   :  { %5697 = vst [vmem:[#allocation21_spill] sm:$0xff] %v3771_v15  ;;  %v3206_v20 = vpop.eup %3205  ;;  %3225 = vpow2.f32 %v2841_v8  ;;  %1012 = vrot.lane.b32.xlu0 %v3771_v15, %s3472_s23  ;;  %v3785_v26 = vmul.f32 %v3204_v19, %v3727_v56  ;;  %v616_v53 = vrot.slane %v3771_v15, 7  ;;  %v673_v29 = vrot.slane %v3771_v15, 1 }
 0x170   :  { %v3208_v21 = vpop.eup %3207  ;;  %5698 = vst [vmem:[#allocation22_spill] sm:$0xff] %v3777_v22  ;;  %3227 = vpow2.f32 %v2840_v11  ;;  %v675_v43 = vrot.slane %v3777_v22, 1 }
 0x171   :  { %v3210_v24 = vpop.eup %3209  ;;  %v3780_v25 = vmul.f32 %v3208_v21, %v3733_v62  ;;  %3229 = vpow2.f32 %v2842_v16  ;;  %5699 = vst [vmem:[#allocation23_spill] sm:$0xff] %v3785_v26  ;;  %v3793_v62 = vmul.f32 %v3206_v20, %v3729_v57  ;;  %v618_v57 = vrot.slane %v3777_v22, 7 }
 0x172   :  { %v3212_v52 = vpop.eup %3211  ;;  %v3788_v27 = vmul.f32 %v3210_v24, %v3735_v63  ;;  %v617_v49 = vrot.slane %v3785_v26, 7  ;;  %v674_v60 = vrot.slane %v3785_v26, 1 }
 0x173   :  { %v3214_v32 = vpop.eup %3213  ;;  %5700 = vst [vmem:[#allocation24_spill] sm:$0xff] %v3793_v62  ;;  %v3796_v33 = vmul.f32 %v3212_v52, %v3739_v5  ;;  %1014 = vrot.lane.b32.xlu1 %v3780_v25, %s3472_s23  ;;  %1028 = vrot.lane.b32.xlu0 %v3777_v22, %s3472_s23  ;;  %v620_v56 = vrot.slane %v3780_v25, 7  ;;  %v5612_v63 = vrot.slane %v3780_v25, 1  ;;  %v619_v55 = vrot.slane %v3793_v62, 7 }
 0x174   :  { %v3216_v34 = vpop.eup %3215  ;;  %v3805_v35 = vmul.f32 %v3214_v32, %v3741_v6  ;;  %v622_v36 = vrot.slane %v3788_v27, 7  ;;  %v679_v5 = vrot.slane %v3788_v27, 1  ;;  %v676_v3 = vrot.slane %v3793_v62, 1 }
 0x175   :  { %v3218_v37 = vpop.eup %3217  ;;  %v3816_v38 = vsel %vm632_vm0, %v616_v53, %v620_v56  ;;  %v3824_v6 = vsel %vm689_vm1, %v673_v29, %v5612_v63  ;;  %v621_v46 = vrot.slane %v3796_v33, 7  ;;  %v678_v61 = vrot.slane %v3796_v33, 1 }
 0x176   :  { %5701 = vst [vmem:[#allocation25_spill] sm:$0xff] %v3824_v6  ;;  %v3220_v47 = vpop.eup %3219  ;;  %v3832_v48 = vsel %vm632_vm0, %v618_v57, %v622_v36  ;;  %v3836_v51 = vmul.f32 %v3218_v37, %v3749_v14  ;;  %v3846_v54 = vsel %vm689_vm1, %v675_v43, %v679_v5  ;;  %v623_v58 = vrot.slane %v3805_v35, 7 }
 0x177   :  { %v3222_v50 = vpop.eup %3221  ;;  %1030 = vrot.lane.b32.xlu1 %v3788_v27, %s3472_s23  ;;  %1188 = vrot.lane.b32.xlu0 %v3777_v22, %s3477_s1  ;;  %5703 = vst [vmem:[#allocation27_spill] sm:$0xff] %v3846_v54  ;;  %v3854_v14 = vsel %vm632_vm0, %v617_v49, %v621_v46  ;;  %v680_v4 = vrot.slane %v3805_v35, 1  ;;  %v3867_v8 = vmul.f32 %v3220_v47, %v3751_v17 }
 0x178   :  { %5702 = vst [vmem:[#allocation26_spill] sm:$0xff] %v3836_v51  ;;  %v3224_v59 = vpop.eup %3223  ;;  %v3862_v2 = vsel %vm632_vm0, %v619_v55, %v623_v58  ;;  %v3873_v10 = vsel %vm689_vm1, %v674_v60, %v678_v61  ;;  %v3876_v12 = vmul.f32 %v3222_v50, %v3753_v18  ;;  %v626_v19 = vrot.slane %v3836_v51, 7 }
 0x179   :  { %v3226_v1 = vpop.eup %3225  ;;  %5704 = vst [vmem:[#allocation28_spill] sm:$0xff] %v3867_v8  ;;  %5705 = vst [vmem:[#allocation29_spill] sm:$0xff] %v3873_v10  ;;  %v3886_v17 = vsel %vm689_vm1, %v676_v3, %v680_v4  ;;  %v3890_v20 = vmul.f32 %v3216_v34, %v3747_v13  ;;  %v3893_v18 = vmul.f32 %v3224_v59, %v3757_v23  ;;  %v683_v52 = vrot.slane %v3836_v51, 1 }
 0x17a   :  { %v3228_v7 = vpop.eup %3227  ;;  %v492_v9 = vadd.f32 1.0, %v3226_v1  ;;  %5706 = vst [vmem:[#allocation30_spill] sm:$0xff] %v3876_v12  ;;  %v3897_v24 = vsel %vm632_vm0, %v622_v36, %v626_v19  ;;  %v625_v13 = vrot.slane %v3867_v8, 7  ;;  %v627_v23 = vrot.slane %v3876_v12, 7 }
 0x17b   :  { %v3230_v11 = vpop.eup %3229  ;;  %v491_v16 = vadd.f32 1.0, %v3228_v7  ;;  %1190 = vrot.lane.b32.xlu1 %v3788_v27, %s3477_s1  ;;  %1172 = vrot.lane.b32.xlu0 %v3771_v15, %s3477_s1  ;;  %5707 = vst [vmem:[#allocation31_spill] sm:$0xff] %v3890_v20  ;;  %5708 = vst [vmem:[#allocation32_spill] sm:$0xff] %v3893_v18  ;;  %v624_v32 = vrot.slane %v3890_v20, 7  ;;  %v3909_v34 = vsel %vm689_vm1, %v679_v5, %v683_v52  ;;  %v628_v36 = vrot.slane %v3893_v18, 7 }
 0x17c   :  { %3231 = vrcp.f32 %v492_v9  ;;  %v493_v21 = vadd.f32 1.0, %v3230_v11  ;;  %v3914_v37 = vsel %vm632_vm0, %v621_v46, %v625_v13  ;;  %v3918_v47 = vsel %vm632_vm0, %v623_v58, %v627_v23 }
 0x17d   :  { %3233 = vrcp.f32 %v491_v16  ;;  %v681_v50 = vrot.slane %v3890_v20, 1  ;;  %v3925_v59 = vsel %vm632_vm0, %v624_v32, %v628_v36  ;;  %v685_v5 = vrot.slane %v3893_v18, 1 }
 0x17e   :  { %3235 = vrcp.f32 %v493_v21  ;;  %5709 = vst [vmem:[#allocation33_spill] sm:$0xff] %v3925_v59  ;;  %v682_v46 = vrot.slane %v3867_v8, 1  ;;  %v684_v9 = vrot.slane %v3876_v12, 1  ;;  %v3948_v11 = vsel %vm632_vm0, %v628_v36, %v616_v53 }
 0x17f   :  { %1174 = vrot.lane.b32.xlu1 %v3780_v25, %s3477_s1  ;;  %1020 = vrot.lane.b32.xlu0 %v3785_v26, %s3472_s23  ;;  %v3937_v58 = vsel %vm689_vm1, %v681_v50, %v685_v5 }
 0x180   :  { %v3941_v1 = vsel %vm689_vm1, %v678_v61, %v682_v46  ;;  %v3962_v39 = vsel %vm689_vm1, %v680_v4, %v684_v9 }
 0x183   :  { %1022 = vrot.lane.b32.xlu1 %v3796_v33, %s3472_s23  ;;  %1036 = vrot.lane.b32.xlu0 %v3793_v62, %s3472_s23 }
 0x186   :  { %v3232_v7 = vpop.eup %3231 }
 0x187   :  { %v3234_v16 = vpop.eup %3233  ;;  %v3951_v21 = vmul.f32 %v3232_v7, %v3761_v28  ;;  %1038 = vrot.lane.b32.xlu1 %v3805_v35, %s3472_s23  ;;  %1180 = vrot.lane.b32.xlu0 %v3785_v26, %s3477_s1 }
 0x188   :  { %v3236_v61 = vpop.eup %3235  ;;  %v3958_v0 = vmul.f32 %v3234_v16, %v3764_v30 }
 0x189   :  { %5710 = vst [vmem:[#allocation34_spill] sm:$0xff] %v3951_v21  ;;  %v3965_v53 = vmul.f32 %v3236_v61, %v3766_v31  ;;  %v630_v28 = vrot.slane %v3951_v21, 7  ;;  %v687_v36 = vrot.slane %v3951_v21, 1 }
 0x18a   :  { %5711 = vst [vmem:[#allocation35_spill] sm:$0xff] %v3958_v0  ;;  %v629_v7 = vrot.slane %v3958_v0, 7 }
 0x18b   :  { %5712 = vst [vmem:[#allocation36_spill] sm:$0xff] %v3965_v53  ;;  %1182 = vrot.lane.b32.xlu1 %v3796_v33, %s3477_s1  ;;  %1196 = vrot.lane.b32.xlu0 %v3793_v62, %s3477_s1  ;;  %v3975_v30 = vsel %vm632_vm0, %v626_v19, %v630_v28  ;;  %v3979_v4 = vsel %vm689_vm1, %v683_v52, %v687_v36  ;;  %v631_v61 = vrot.slane %v3965_v53, 7  ;;  %v686_v19 = vrot.slane %v3958_v0, 1 }
 0x18c   :  { %5713 = vst [vmem:[#allocation37_spill] sm:$0xff] %v3975_v30  ;;  %5714 = vst [vmem:[#allocation38_spill] sm:$0xff] %v3979_v4  ;;  %v3985_v31 = vsel %vm632_vm0, %v630_v28, %v618_v57  ;;  %v3990_v16 = vsel %vm632_vm0, %v625_v13, %v629_v7  ;;  %v688_v63 = vrot.slane %v3965_v53, 1  ;;  %v3999_v52 = vsel %vm689_vm1, %v685_v5, %v673_v29 }
 0x18d   :  { %5715 = vst [vmem:[#allocation39_spill] sm:$0xff] %v3990_v16  ;;  %v4005_v57 = vsel %vm689_vm1, %v687_v36, %v675_v43  ;;  %v4013_v13 = vsel %vm632_vm0, %v627_v23, %v631_v61  ;;  %v4017_v29 = vsel %vm689_vm1, %v682_v46, %v686_v19  ;;  %v4027_v43 = vsel %vm632_vm0, %v629_v7, %v617_v49 }
 0x18e   :  { %5716 = vst [vmem:[#allocation40_spill] sm:$0xff] %v4013_v13  ;;  %5717 = vst [vmem:[#allocation41_spill] sm:$0xff] %v4017_v29  ;;  %v4021_v5 = vsel %vm689_vm1, %v684_v9, %v688_v63  ;;  %v4033_v23 = vsel %vm632_vm0, %v631_v61, %v619_v55  ;;  %v4043_v46 = vsel %vm689_vm1, %v686_v19, %v674_v60  ;;  %v544_v60 = vadd.s32 8, %v3705_v40 }
 0x18f   :  { %1198 = vrot.lane.b32.xlu1 %v3805_v35, %s3477_s1  ;;  %740 = vrot.lane.b32.xlu0 %v3816_v38, %s3472_s23  ;;  %5718 = vst [vmem:[#allocation42_spill] sm:$0xff] %v4021_v5  ;;  %v4049_v49 = vsel %vm689_vm1, %v688_v63, %v676_v3  ;;  %v545_v63 = vadd.s32 16, %v3705_v40  ;;  %v637_v9 = vsel %vm632_vm0, %v620_v56, %v624_v32  ;;  %v5724_v56 = vrot.slane %v3780_v25, 1 }
 0x190   :  { %v563_v28 = vand.u32 15, %v544_v60  ;;  %v5728_v3 = vlaneseq }
 0x191   :  { %v570_v55 = vand.u32 15, %v545_v63  ;;  %v694_v32 = vsel %vm689_vm1, %v5724_v56, %v681_v50 }
 0x192   :  { %vm4132_vm3 = vcmp.ne.s32.totalorder %v563_v28, 15 }
 0x193   :  { %756 = vrot.lane.b32.xlu1 %v3832_v48, %s3472_s23  ;;  %1284 = vrot.lane.b32.xlu0 %v3824_v6, %s3472_s23  ;;  %vm4109_vm2 = vcmp.ne.s32.totalorder %v570_v55, 0  ;;  %v4153_v19 = vsel %vm4132_vm3, %v3909_v34, 0.0  ;;  %v4209_v62 = vsel %vm4132_vm3, %v3941_v1, 0.0 }
 0x194   :  { %v4121_v36 = vsel %vm4109_vm2, %v637_v9, 0.0  ;;  %v4126_v7 = vsel %vm4109_vm2, %v3897_v24, 0.0  ;;  %v4144_v24 = vsel %vm4132_vm3, %v694_v32, 0.0  ;;  %5726 = vst [vmem:[#allocation45_spill] sm:$0xff] %v4153_v19  ;;  %v4162_v50 = vsel %vm4109_vm2, %v3914_v37, 0.0  ;;  %5731 = vst [vmem:[#allocation49_spill] sm:$0xff] %v4209_v62 }
 0x195   :  { %5721 = vst [vmem:[#allocation43_spill] sm:$0xff] %v4126_v7  ;;  %5725 = vst [vmem:[#allocation44_spill] sm:$0xff] %v4144_v24  ;;  %v4171_v34 = vsel %vm4109_vm2, %v3918_v47, 0.0  ;;  %v4190_v9 = vand.u32 127, %v5728_v3  ;;  %v556_v32 = vand.u32 15, %v3705_v40 }
 0x196   :  { %5727 = vst [vmem:[#allocation46_spill] sm:$0xff] %v4171_v34 }
 0x197   :  { %909 = vrot.lane.b32.xlu1 %v3832_v48, %s3477_s1  ;;  %1300 = vrot.lane.b32.xlu0 %v3846_v54, %s3472_s23  ;;  %vm770_vm4 = vcmp.lt.s32.totalorder %v4190_v9, 32  ;;  %vm4211_vm5 = vcmp.ne.s32.totalorder %v556_v32, 0  ;;  %vm923_vm6 = vcmp.lt.s32.totalorder %v4190_v9, 96  ;;  %vm608_vm8 = vcmp.ge.s32.totalorder %v4190_v9, 32 }
 0x198   :  { %v4227_v1 = vsel %vm4211_vm5, %v3948_v11, 0.0 }
 0x199   :  { %5734 = vst [vmem:[#allocation50_spill] sm:$0xff] %v4227_v1 }
 0x19b   :  { %893 = vrot.lane.b32.xlu1 %v3816_v38, %s3477_s1  ;;  %1460 = vrot.lane.b32.xlu0 %v3846_v54, %s3477_s1 }
 0x19f   :  { %748 = vrot.lane.b32.xlu1 %v3854_v14, %s3472_s23  ;;  %1444 = vrot.lane.b32.xlu0 %v3824_v6, %s3477_s1 }
 0x1a3   :  { %764 = vrot.lane.b32.xlu1 %v3862_v2, %s3472_s23  ;;  %1292 = vrot.lane.b32.xlu0 %v3873_v10, %s3472_s23 }
 0x1a7   :  { %901 = vrot.lane.b32.xlu1 %v3854_v14, %s3477_s1  ;;  %1308 = vrot.lane.b32.xlu0 %v3886_v17, %s3472_s23 }
 0x1ab   :  { %917 = vrot.lane.b32.xlu1 %v3862_v2, %s3477_s1  ;;  %1452 = vrot.lane.b32.xlu0 %v3873_v10, %s3477_s1 }
 0x1af   :  { %1018 = vrot.lane.b32.xlu1 %v3893_v18, %s3472_s23  ;;  %1016 = vrot.lane.b32.xlu0 %v3890_v20, %s3472_s23 }
 0x1b3   :  { %1034 = vrot.lane.b32.xlu1 %v3951_v21, %s3472_s23  ;;  %1032 = vrot.lane.b32.xlu0 %v3836_v51, %s3472_s23 }
 0x1b7   :  { %1194 = vrot.lane.b32.xlu1 %v3951_v21, %s3477_s1  ;;  %1192 = vrot.lane.b32.xlu0 %v3836_v51, %s3477_s1 }
 0x1bb   :  { %1178 = vrot.lane.b32.xlu1 %v3893_v18, %s3477_s1  ;;  %1176 = vrot.lane.b32.xlu0 %v3890_v20, %s3477_s1  ;;  %v4326_v18 = vld [vmem:[#allocation7 + $0x10] sm:$0xff] }
 0x1bf   :  { %1026 = vrot.lane.b32.xlu1 %v3958_v0, %s3472_s23  ;;  %1024 = vrot.lane.b32.xlu0 %v3867_v8, %s3472_s23 }
 0x1c3   :  { %1042 = vrot.lane.b32.xlu1 %v3965_v53, %s3472_s23  ;;  %1040 = vrot.lane.b32.xlu0 %v3876_v12, %s3472_s23 }
 0x1c7   :  { %1186 = vrot.lane.b32.xlu1 %v3958_v0, %s3477_s1  ;;  %1184 = vrot.lane.b32.xlu0 %v3867_v8, %s3477_s1 }
 0x1cb   :  { %1202 = vrot.lane.b32.xlu1 %v3965_v53, %s3477_s1  ;;  %1200 = vrot.lane.b32.xlu0 %v3876_v12, %s3477_s1 }
 0x1cf   :  { %742 = vrot.lane.b32.xlu1 %v4121_v36, %s3472_s23  ;;  %758 = vrot.lane.b32.xlu0 %v4126_v7, %s3472_s23 }
 0x1d3   :  { %1286 = vrot.lane.b32.xlu1 %v4144_v24, %s3472_s23  ;;  %911 = vrot.lane.b32.xlu0 %v4126_v7, %s3477_s1 }
 0x1d7   :  { %1302 = vrot.lane.b32.xlu1 %v4153_v19, %s3472_s23  ;;  %895 = vrot.lane.b32.xlu0 %v4121_v36, %s3477_s1 }
 0x1db   :  { %1462 = vrot.lane.b32.xlu1 %v4153_v19, %s3477_s1  ;;  %750 = vrot.lane.b32.xlu0 %v4162_v50, %s3472_s23  ;;  %v4360_v19 = vrot.slane %v4326_v18, %v3708_v41 }
 0x1dd   :  { %5749 = vst [vmem:[#allocation63_spill] sm:$0xff] %v4360_v19 }
 0x1df   :  { %1446 = vrot.lane.b32.xlu1 %v4144_v24, %s3477_s1  ;;  %766 = vrot.lane.b32.xlu0 %v4171_v34, %s3472_s23 }
 0x1e1   :  { %v1013_v63 = vpop.permute.xlu0 %1012 }
 0x1e3   :  { %744 = vrot.lane.b32.xlu1 %v3925_v59, %s3472_s23  ;;  %903 = vrot.lane.b32.xlu0 %v4162_v50, %s3477_s1 }
 0x1e5   :  { %v1015_v37 = vpop.permute.xlu1 %1014  ;;  %v1029_v55 = vpop.permute.xlu0 %1028 }
 0x1e7   :  { %760 = vrot.lane.b32.xlu1 %v3975_v30, %s3472_s23  ;;  %919 = vrot.lane.b32.xlu0 %v4171_v34, %s3477_s1 }
 0x1e9   :  { %v1031_v47 = vpop.permute.xlu1 %1030  ;;  %v1189_v60 = vpop.permute.xlu0 %1188 }
 0x1eb   :  { %913 = vrot.lane.b32.xlu1 %v3975_v30, %s3477_s1  ;;  %1288 = vrot.lane.b32.xlu0 %v3937_v58, %s3472_s23 }
 0x1ed   :  { %v1191_v28 = vpop.permute.xlu1 %1190  ;;  %v1173_v56 = vpop.permute.xlu0 %1172 }
 0x1ef   :  { %897 = vrot.lane.b32.xlu1 %v3925_v59, %s3477_s1  ;;  %1304 = vrot.lane.b32.xlu0 %v3979_v4, %s3472_s23 }
 0x1f1   :  { %v1175_v53 = vpop.permute.xlu1 %1174  ;;  %v1021_v21 = vpop.permute.xlu0 %1020 }
 0x1f2   :  { %v4200_v0 = vsel %vm770_vm4, %v1021_v21, %v1029_v55  ;;  %v4204_v3 = vsel %vm770_vm4, %v1013_v63, %v1021_v21  ;;  %v4222_v21 = vsel %vm4132_vm3, %v3962_v39, 0.0 }
 0x1f3   :  { %5729 = vst [vmem:[#allocation47_spill] sm:$0xff] %v4200_v0  ;;  %5730 = vst [vmem:[#allocation48_spill] sm:$0xff] %v4204_v3  ;;  %1294 = vrot.lane.b32.xlu1 %v4209_v62, %s3472_s23  ;;  %1464 = vrot.lane.b32.xlu0 %v3979_v4, %s3477_s1  ;;  %v4335_v4 = vrot.slane %v4326_v18, %v3714_v44 }
 0x1f5   :  { %v1023_v0 = vpop.permute.xlu1 %1022  ;;  %v1037_v26 = vpop.permute.xlu0 %1036  ;;  %5744 = vst [vmem:[#allocation58_spill] sm:$0xff] %v4335_v4  ;;  %v865_v54 = vmul.f32 %v4335_v4, %v3832_v48 }
 0x1f6   :  { %v4231_v32 = vsel %vm770_vm4, %v1023_v0, %v1031_v47  ;;  %v4235_v3 = vsel %vm770_vm4, %v1015_v37, %v1023_v0  ;;  %v4239_v15 = vsel %vm770_vm4, %v1029_v55, %v1037_v26  ;;  %v4243_v39 = vsel %vm770_vm4, %v1037_v26, %v1013_v63 }
 0x1f7   :  { %5735 = vst [vmem:[#allocation51_spill] sm:$0xff] %v4239_v15  ;;  %5736 = vst [vmem:[#allocation52_spill] sm:$0xff] %v4243_v39  ;;  %1310 = vrot.lane.b32.xlu1 %v4222_v21, %s3472_s23  ;;  %738 = vrot.lane.b32.xlu0 %v4227_v1, %s3472_s23  ;;  %v4253_v0 = vsel %vm4211_vm5, %v3985_v31, 0.0 }
 0x1f8   :  { %5737 = vst [vmem:[#allocation53_spill] sm:$0xff] %v4253_v0 }
 0x1f9   :  { %v1039_v11 = vpop.permute.xlu1 %1038  ;;  %v1181_v61 = vpop.permute.xlu0 %1180 }
 0x1fa   :  { %v4257_v55 = vsel %vm770_vm4, %v1031_v47, %v1039_v11  ;;  %v4261_v26 = vsel %vm770_vm4, %v1039_v11, %v1015_v37  ;;  %v4265_v63 = vsel %vm923_vm6, %v1181_v61, %v1189_v60  ;;  %v4269_v15 = vsel %vm923_vm6, %v1173_v56, %v1181_v61 }
 0x1fb   :  { %5738 = vst [vmem:[#allocation54_spill] sm:$0xff] %v4265_v63  ;;  %5739 = vst [vmem:[#allocation55_spill] sm:$0xff] %v4269_v15  ;;  %1454 = vrot.lane.b32.xlu1 %v4209_v62, %s3477_s1  ;;  %754 = vrot.lane.b32.xlu0 %v4253_v0, %s3472_s23 }
 0x1fd   :  { %v1183_v31 = vpop.permute.xlu1 %1182  ;;  %v1197_v47 = vpop.permute.xlu0 %1196 }
 0x1fe   :  { %v4277_v37 = vsel %vm923_vm6, %v1183_v31, %v1191_v28  ;;  %v4281_v11 = vsel %vm923_vm6, %v1175_v53, %v1183_v31  ;;  %v4285_v61 = vsel %vm923_vm6, %v1189_v60, %v1197_v47  ;;  %v4289_v63 = vsel %vm923_vm6, %v1197_v47, %v1173_v56 }
 0x1ff   :  { %5740 = vst [vmem:[#allocation56_spill] sm:$0xff] %v4285_v61  ;;  %5741 = vst [vmem:[#allocation57_spill] sm:$0xff] %v4289_v63  ;;  %752 = vrot.lane.b32.xlu1 %v3990_v16, %s3472_s23  ;;  %907 = vrot.lane.b32.xlu0 %v4253_v0, %s3477_s1  ;;  %v546_v56 = vadd.s32 24, %v3705_v40  ;;  %v4331_v0 = vld [vmem:[#allocation7] sm:$0xff] }
 0x201   :  { %v1199_v15 = vpop.permute.xlu1 %1198  ;;  %v741_v39 = vpop.permute.xlu0 %740 }
 0x202   :  { %v4297_v31 = vsel %vm923_vm6, %v1191_v28, %v1199_v15  ;;  %v4301_v60 = vsel %vm923_vm6, %v1199_v15, %v1175_v53  ;;  %v577_v28 = vand.u32 15, %v546_v56  ;;  %v1126_v56 = vsub.s32 4, %v3705_v40 }
 0x203   :  { %768 = vrot.lane.b32.xlu1 %v4013_v13, %s3472_s23  ;;  %891 = vrot.lane.b32.xlu0 %v4227_v1, %s3477_s1  ;;  %v4345_v1 = vld [vmem:[#allocation7 + $0x18] sm:$0xff] }
 0x204   :  { %vm4322_vm7 = vcmp.ne.s32.totalorder %v577_v28, 15  ;;  %v4373_v24 = vrot.slane %v4331_v0, %v1126_v56  ;;  %v4376_v10 = vrot.slane %v4326_v18, %v1126_v56 }
 0x205   :  { %v757_v47 = vpop.permute.xlu1 %756  ;;  %v4308_v61 = vpop.permute.xlu0 %1284  ;;  %v4350_v62 = vsel %vm4322_vm7, %v3999_v52, 0.0  ;;  %v4370_v52 = vrot.slane %v4345_v1, %v3714_v44  ;;  %v4397_v48 = vsel %vm4322_vm7, %v4005_v57, 0.0 }
 0x206   :  { %5747 = vst [vmem:[#allocation61_spill] sm:$0xff] %v4350_v62  ;;  %5752 = vst [vmem:[#allocation66_spill] sm:$0xff] %v4397_v48 }
 0x207   :  { %905 = vrot.lane.b32.xlu1 %v3990_v16, %s3477_s1  ;;  %1296 = vrot.lane.b32.xlu0 %v4017_v29, %s3472_s23  ;;  %v4328_v16 = vld [vmem:[#allocation7 + $0x8] sm:$0xff]  ;;  %5750 = vst [vmem:[#allocation64_spill] sm:$0xff] %v4370_v52 }
 0x208   :  { %v4356_v59 = vrot.slane %v4328_v16, %v3708_v41  ;;  %v4385_v51 = vrot.slane %v4328_v16, %v1126_v56 }
 0x209   :  { %v4314_v15 = vpop.permute.xlu1 %909  ;;  %v4316_v53 = vpop.permute.xlu0 %1300 }
 0x20a   :  { %5748 = vst [vmem:[#allocation62_spill] sm:$0xff] %v4356_v59 }
 0x20b   :  { %921 = vrot.lane.b32.xlu1 %v4013_v13, %s3477_s1  ;;  %1312 = vrot.lane.b32.xlu0 %v4021_v5, %s3472_s23  ;;  %v4339_v13 = vrot.slane %v4328_v16, %v3714_v44 }
 0x20d   :  { %5745 = vst [vmem:[#allocation59_spill] sm:$0xff] %v4339_v13  ;;  %v4341_v28 = vpop.permute.xlu1 %893  ;;  %v4343_v30 = vpop.permute.xlu0 %1460 }
 0x20e   :  { %5746 = vst [vmem:[#allocation60_spill] sm:$0xff] %v4343_v30  ;;  %v4366_v30 = vrot.slane %v4331_v0, %v3714_v44  ;;  %v4388_v44 = vrot.slane %v4345_v1, %v1126_v56 }
 0x20f   :  { %1290 = vrot.lane.b32.xlu1 %v4350_v62, %s3472_s23  ;;  %1456 = vrot.lane.b32.xlu0 %v4017_v29, %s3477_s1  ;;  %v864_v29 = vmul.f32 %v4339_v13, %v3854_v14  ;;  %v4402_v14 = vsel %vm4211_vm5, %v4027_v43, 0.0  ;;  %v866_v43 = vmul.f32 %v4370_v52, %v3862_v2 }
 0x210   :  { %5753 = vst [vmem:[#allocation67_spill] sm:$0xff] %v4402_v14  ;;  %v863_v57 = vmul.f32 %v4366_v30, %v3816_v38  ;;  %v4430_v38 = vsel %vm4211_vm5, %v4033_v23, 0.0  ;;  %v4457_v23 = vrot.slane %v4328_v16, %v3711_v42 }
 0x211   :  { %v749_v6 = vpop.permute.xlu1 %748  ;;  %v4382_v12 = vpop.permute.xlu0 %1444  ;;  %5756 = vst [vmem:[#allocation70_spill] sm:$0xff] %v4430_v38 }
 0x212   :  { %5751 = vst [vmem:[#allocation65_spill] sm:$0xff] %v4382_v12  ;;  %v776_v8 = vsel %vm770_vm4, %v749_v6, %v757_v47  ;;  %v780_v20 = vsel %vm770_vm4, %v741_v39, %v749_v6  ;;  %v4410_v6 = vrot.slane %v4345_v1, %v3708_v41  ;;  %5760 = vst [vmem:[#allocation74_spill] sm:$0xff] %v4457_v23 }
 0x213   :  { %v832_v12 = vmul.f32 %v4356_v59, %v780_v20  ;;  %v833_v56 = vmul.f32 %v4360_v19, %v776_v8  ;;  %1306 = vrot.lane.b32.xlu1 %v4397_v48, %s3472_s23  ;;  %746 = vrot.lane.b32.xlu0 %v4402_v14, %s3472_s23  ;;  %v4420_v20 = vrot.slane %v4328_v16, %v3717_v45 }
 0x214   :  { %5754 = vst [vmem:[#allocation68_spill] sm:$0xff] %v4410_v6  ;;  %v4424_v8 = vrot.slane %v4331_v0, %v3708_v41 }
 0x215   :  { %v880_v34 = vadd.f32 %v864_v29, %v832_v12  ;;  %v881_v4 = vadd.f32 %v865_v54, %v833_v56  ;;  %v765_v7 = vpop.permute.xlu1 %764  ;;  %v1293_v19 = vpop.permute.xlu0 %1292  ;;  %v4453_v29 = vrot.slane %v4331_v0, %v3711_v42  ;;  %v4476_v56 = vrot.slane %v4345_v1, %v3717_v45 }
 0x216   :  { %5755 = vst [vmem:[#allocation69_spill] sm:$0xff] %v4424_v8  ;;  %v772_v2 = vsel %vm770_vm4, %v757_v47, %v765_v7  ;;  %v784_v52 = vsel %vm770_vm4, %v765_v7, %v741_v39  ;;  %v4439_v41 = vsel %vm770_vm4, %v1293_v19, %v4316_v53  ;;  %v4444_v54 = vsel %vm770_vm4, %v4308_v61, %v1293_v19 }
 0x217   :  { %5757 = vst [vmem:[#allocation71_spill] sm:$0xff] %v4439_v41  ;;  %5758 = vst [vmem:[#allocation72_spill] sm:$0xff] %v4444_v54  ;;  %v799_v22 = vsel %vm608_vm8, %v784_v52, 0.0  ;;  %v834_v12 = vmul.f32 %v4410_v6, %v772_v2  ;;  %1466 = vrot.lane.b32.xlu1 %v4397_v48, %s3477_s1  ;;  %762 = vrot.lane.b32.xlu0 %v4430_v38, %s3472_s23  ;;  %v4463_v7 = vrot.slane %v4326_v18, %v3717_v45 }
 0x218   :  { %5759 = vst [vmem:[#allocation73_spill] sm:$0xff] %v4453_v29  ;;  %v1238_v19 = vsub.s32 5, %v3705_v40  ;;  %v4467_v39 = vadd.s32 384, %v4190_v9  ;;  %v831_v47 = vmul.f32 %v4424_v8, %v799_v22  ;;  %v4472_v52 = vrot.slane %v4331_v0, %v3717_v45 }
 0x219   :  { %v1064_v2 = vsel %vm608_vm8, %v4261_v26, 0.0  ;;  %v882_v41 = vadd.f32 %v866_v43, %v834_v12  ;;  %v902_v54 = vpop.permute.xlu1 %901  ;;  %v1309_v48 = vpop.permute.xlu0 %1308  ;;  %v4503_v43 = vrot.slane %v4326_v18, %v3711_v42 }
 0x21a   :  { %v879_v40 = vadd.f32 %v863_v57, %v831_v47  ;;  %v929_v22 = vsel %vm923_vm6, %v902_v54, %v4314_v15  ;;  %v933_v6 = vsel %vm923_vm6, %v4341_v28, %v902_v54  ;;  %v4490_v45 = vsel %vm770_vm4, %v4316_v53, %v1309_v48 }
 0x21b   :  { %5761 = vst [vmem:[#allocation75_spill] sm:$0xff] %v4490_v45  ;;  %v984_v13 = vmul.f32 %v4453_v29, %v933_v6  ;;  %v985_v26 = vmul.f32 %v4457_v23, %v929_v22  ;;  %1450 = vrot.lane.b32.xlu1 %v4350_v62, %s3477_s1  ;;  %v4499_v57 = vsel %vm770_vm4, %v1309_v48, %v4308_v61  ;;  %vm615_vm9 = vcmp.lt.s32.totalorder %v4467_v39, 480  ;;  %v5779_v62 = vld [vmem:[#allocation43_spill] sm:$0xff] }
 0x21c   :  { %5762 = vst [vmem:[#allocation76_spill] sm:$0xff] %v4499_v57  ;;  %v4506_v54 = vrot.slane %v4331_v0, %v1238_v19  ;;  %v4509_v53 = vrot.slane %v4328_v16, %v1238_v19  ;;  %v4514_v6 = vrot.slane %v4345_v1, %v3711_v42  ;;  %899 = vrot.lane.b32.xlu0 %v4402_v14, %s3477_s1 }
 0x21d   :  { %v1097_v61 = vmul.f32 %v4420_v20, %v4235_v3  ;;  %v1096_v48 = vmul.f32 %v4472_v52, %v1064_v2  ;;  %v1000_v12 = vadd.f32 %v984_v13, %v879_v40  ;;  %v1001_v47 = vadd.f32 %v985_v26, %v880_v34  ;;  %v918_v22 = vpop.permute.xlu1 %917  ;;  %v4521_v45 = vpop.permute.xlu0 %1452 }
 0x21e   :  { %5763 = vst [vmem:[#allocation77_spill] sm:$0xff] %v4521_v45  ;;  %v1144_v57 = vmul.f32 %v4373_v24, %v3780_v25  ;;  %v925_v42 = vsel %vm923_vm6, %v4314_v15, %v918_v22  ;;  %v937_v14 = vsel %vm923_vm6, %v918_v22, %v4341_v28  ;;  %v1145_v3 = vmul.f32 %v4385_v51, %v3796_v33 }
 0x21f   :  { %v1112_v2 = vadd.f32 %v1096_v48, %v1000_v12  ;;  %v1113_v40 = vadd.f32 %v1097_v61, %v1001_v47  ;;  %v955_v13 = vsel %vm615_vm9, %v937_v14, 0.0  ;;  %v986_v34 = vmul.f32 %v4503_v43, %v925_v42  ;;  %1470 = vrot.lane.b32.xlu1 %v4222_v21, %s3477_s1 }
 0x220   :  { %v1098_v25 = vmul.f32 %v4463_v7, %v4231_v32  ;;  %v1256_v15 = vmul.f32 %v4506_v54, %v4281_v11  ;;  %v4543_v28 = vrot.slane %v4326_v18, %v1238_v19  ;;  %v987_v33 = vmul.f32 %v4514_v6, %v955_v13  ;;  %915 = vrot.lane.b32.xlu0 %v4430_v38, %s3477_s1 }
 0x221   :  { %v1257_v42 = vmul.f32 %v4509_v53, %v4277_v37  ;;  %v1160_v14 = vadd.f32 %v1144_v57, %v1112_v2  ;;  %v1002_v26 = vadd.f32 %v986_v34, %v881_v4  ;;  %v1019_v61 = vpop.permute.xlu1 %1018  ;;  %v1017_v48 = vpop.permute.xlu0 %1016  ;;  %v1161_v12 = vadd.f32 %v1145_v3, %v1113_v40 }
 0x222   :  { %v1099_v32 = vmul.f32 %v4476_v56, %v4257_v55  ;;  %v1003_v11 = vadd.f32 %v987_v33, %v882_v41  ;;  %v4555_v47 = vsel %vm4322_vm7, %v4043_v46, 0.0  ;;  %v1146_v22 = vmul.f32 %v4376_v10, %v3788_v27 }
 0x223   :  { %5764 = vst [vmem:[#allocation78_spill] sm:$0xff] %v4555_v47  ;;  %v1227_v37 = vsel %vm615_vm9, %v4301_v60, 0.0  ;;  %v1114_v4 = vadd.f32 %v1098_v25, %v1002_v26  ;;  %1298 = vrot.lane.b32.xlu1 %v4555_v47, %s3472_s23  ;;  %v4564_v57 = vadd.f32 %v1257_v42, %v1161_v12  ;;  %v4566_v55 = vadd.f32 %v1256_v15, %v1160_v14 }
 0x224   :  { %v4569_v41 = vrot.slane %v4345_v1, %v1238_v19  ;;  %v1115_v46 = vadd.f32 %v1099_v32, %v1003_v11  ;;  %1448 = vrot.lane.b32.xlu0 %v3937_v58, %s3477_s1  ;;  %v1147_v27 = vmul.f32 %v4388_v44, %v3805_v35  ;;  %v1258_v60 = vmul.f32 %v4543_v28, %v4297_v31 }
 0x225   :  { %v1035_v3 = vpop.permute.xlu1 %1034  ;;  %v1033_v2 = vpop.permute.xlu0 %1032  ;;  %v1162_v40 = vadd.f32 %v1146_v22, %v1114_v4  ;;  %v4581_v19 = vsel %vm4322_vm7, %v4049_v49, 0.0 }
 0x226   :  { %v1259_v13 = vmul.f32 %v4569_v41, %v1227_v37  ;;  %5765 = vst [vmem:[#allocation79_spill] sm:$0xff] %v4581_v19  ;;  %v1163_v34 = vadd.f32 %v1147_v27, %v1115_v46 }
 0x227   :  { %1314 = vrot.lane.b32.xlu1 %v4581_v19, %s3472_s23  ;;  %v4585_v25 = vadd.f32 %v1258_v60, %v1162_v40 }
 0x228   :  { %1468 = vrot.lane.b32.xlu0 %v3886_v17, %s3477_s1  ;;  %v4589_v35 = vadd.f32 %v1259_v13, %v1163_v34 }
 0x229   :  { %v1195_v31 = vpop.permute.xlu1 %1194  ;;  %v1193_v15 = vpop.permute.xlu0 %1192 }
 0x22b   :  { %1458 = vrot.lane.b32.xlu1 %v4555_v47, %s3477_s1 }
 0x22c   :  { %1472 = vrot.lane.b32.xlu0 %v4021_v5, %s3477_s1 }
 0x22d   :  { %v1179_v49 = vpop.permute.xlu1 %1178  ;;  %v1177_v63 = vpop.permute.xlu0 %1176 }
 0x22f   :  { %1474 = vrot.lane.b32.xlu1 %v4581_v19, %s3477_s1  ;;  %v5776_v19 = vld [vmem:[#allocation59_spill] sm:$0xff] }
 0x230   :  { %v868_v47 = vmul.f32 %v5776_v19, %v4162_v50  ;;  %v5780_v19 = vld [vmem:[#allocation58_spill] sm:$0xff] }
 0x231   :  { %v1027_v33 = vpop.permute.xlu1 %1026  ;;  %v1025_v42 = vpop.permute.xlu0 %1024 }
 0x232   :  { %v4599_v14 = vsel %vm770_vm4, %v1027_v33, %v1035_v3  ;;  %v4603_v26 = vsel %vm770_vm4, %v1019_v61, %v1027_v33  ;;  %v4607_v12 = vsel %vm770_vm4, %v1025_v42, %v1033_v2  ;;  %v1054_v32 = vsel %vm770_vm4, %v1017_v48, %v1025_v42 }
 0x233   :  { %5766 = vst [vmem:[#allocation80_spill] sm:$0xff] %v4599_v14  ;;  %5767 = vst [vmem:[#allocation81_spill] sm:$0xff] %v4603_v26  ;;  %v867_v26 = vmul.f32 %v4366_v30, %v4121_v36 }
 0x235   :  { %v1043_v11 = vpop.permute.xlu1 %1042  ;;  %v1041_v22 = vpop.permute.xlu0 %1040 }
 0x236   :  { %v4613_v37 = vsel %vm770_vm4, %v1035_v3, %v1043_v11  ;;  %v4617_v4 = vsel %vm770_vm4, %v1043_v11, %v1019_v61  ;;  %v4621_v46 = vsel %vm770_vm4, %v1033_v2, %v1041_v22  ;;  %v1058_v27 = vsel %vm770_vm4, %v1041_v22, %v1017_v48 }
 0x237   :  { %5768 = vst [vmem:[#allocation82_spill] sm:$0xff] %v4613_v37  ;;  %5769 = vst [vmem:[#allocation83_spill] sm:$0xff] %v4617_v4 }
 0x239   :  { %v1187_v60 = vpop.permute.xlu1 %1186  ;;  %v1185_v40 = vpop.permute.xlu0 %1184 }
 0x23a   :  { %v4627_v13 = vsel %vm923_vm6, %v1187_v60, %v1195_v31  ;;  %v4631_v3 = vsel %vm923_vm6, %v1179_v49, %v1187_v60  ;;  %v1210_v61 = vsel %vm923_vm6, %v1185_v40, %v1193_v15  ;;  %v1214_v2 = vsel %vm923_vm6, %v1177_v63, %v1185_v40 }
 0x23b   :  { %5770 = vst [vmem:[#allocation84_spill] sm:$0xff] %v4627_v13  ;;  %5771 = vst [vmem:[#allocation85_spill] sm:$0xff] %v4631_v3 }
 0x23d   :  { %v1203_v34 = vpop.permute.xlu1 %1202  ;;  %v1201_v33 = vpop.permute.xlu0 %1200 }
 0x23e   :  { %v4639_v48 = vsel %vm923_vm6, %v1195_v31, %v1203_v34  ;;  %v4643_v42 = vsel %vm923_vm6, %v1203_v34, %v1179_v49  ;;  %v4647_v11 = vsel %vm923_vm6, %v1193_v15, %v1201_v33  ;;  %v4651_v22 = vsel %vm923_vm6, %v1201_v33, %v1177_v63 }
 0x23f   :  { %5772 = vst [vmem:[#allocation86_spill] sm:$0xff] %v4639_v48  ;;  %5773 = vst [vmem:[#allocation87_spill] sm:$0xff] %v4643_v42 }
 0x241   :  { %v743_v60 = vpop.permute.xlu1 %742  ;;  %v759_v40 = vpop.permute.xlu0 %758 }
 0x245   :  { %v4653_v45 = vpop.permute.xlu1 %1286  ;;  %v912_v3 = vpop.permute.xlu0 %911 }
 0x249   :  { %v4655_v37 = vpop.permute.xlu1 %1302  ;;  %v896_v31 = vpop.permute.xlu0 %895 }
 0x24d   :  { %v4657_v48 = vpop.permute.xlu1 %1462  ;;  %v751_v49 = vpop.permute.xlu0 %750 }
 0x24e   :  { %5774 = vst [vmem:[#allocation88_spill] sm:$0xff] %v4657_v48  ;;  %v777_v34 = vsel %vm770_vm4, %v751_v49, %v759_v40  ;;  %v781_v15 = vsel %vm770_vm4, %v743_v60, %v751_v49  ;;  %v1068_v49 = vsel %vm608_vm8, %v1058_v27, 0.0  ;;  %v5783_v48 = vld [vmem:[#allocation68_spill] sm:$0xff] }
 0x24f   :  { %v836_v13 = vmul.f32 %v4356_v59, %v781_v15  ;;  %v5778_v59 = vld [vmem:[#allocation63_spill] sm:$0xff] }
 0x250   :  { %v837_v5 = vmul.f32 %v5778_v59, %v777_v34  ;;  %v1101_v59 = vmul.f32 %v4420_v20, %v1054_v32 }
 0x251   :  { %v4663_v42 = vpop.permute.xlu1 %1446  ;;  %v767_v63 = vpop.permute.xlu0 %766 }
 0x252   :  { %5775 = vst [vmem:[#allocation89_spill] sm:$0xff] %v4663_v42  ;;  %v785_v33 = vsel %vm770_vm4, %v767_v63, %v743_v60  ;;  %v773_v38 = vsel %vm770_vm4, %v759_v40, %v767_v63  ;;  %v869_v40 = vmul.f32 %v5780_v19, %v5779_v62  ;;  %v5781_v63 = vld [vmem:[#allocation46_spill] sm:$0xff] }
 0x253   :  { %v803_v14 = vsel %vm608_vm8, %v785_v33, 0.0  ;;  %v838_v34 = vmul.f32 %v5783_v48, %v773_v38  ;;  %v5785_v38 = vld [vmem:[#allocation28_spill] sm:$0xff] }
 0x254   :  { %v835_v4 = vmul.f32 %v4424_v8, %v803_v14  ;;  %v884_v8 = vadd.f32 %v868_v47, %v836_v13  ;;  %v1149_v48 = vmul.f32 %v4385_v51, %v5785_v38  ;;  %v5788_v38 = vld [vmem:[#allocation16_spill] sm:$0xff] }
 0x255   :  { %v4679_v60 = vpop.permute.xlu1 %744  ;;  %v904_v15 = vpop.permute.xlu0 %903 }
 0x256   :  { %5777 = vst [vmem:[#allocation90_spill] sm:$0xff] %v4679_v60  ;;  %v883_v33 = vadd.f32 %v867_v26, %v835_v4  ;;  %v930_v36 = vsel %vm923_vm6, %v904_v15, %v912_v3  ;;  %v934_v14 = vsel %vm923_vm6, %v896_v31, %v904_v15  ;;  %v5782_v60 = vld [vmem:[#allocation64_spill] sm:$0xff]  ;;  %v5784_v26 = vld [vmem:[#allocation31_spill] sm:$0xff]  ;;  %v1100_v15 = vmul.f32 %v4472_v52, %v1068_v49 }
 0x257   :  { %v988_v50 = vmul.f32 %v4453_v29, %v934_v14  ;;  %v989_v27 = vmul.f32 %v4457_v23, %v930_v36  ;;  %v870_v42 = vmul.f32 %v5782_v60, %v5781_v63  ;;  %v1148_v4 = vmul.f32 %v4373_v24, %v5784_v26 }
 0x258   :  { %v885_v23 = vadd.f32 %v869_v40, %v837_v5  ;;  %v1102_v49 = vmul.f32 %v4463_v7, %v4607_v12  ;;  %v1260_v5 = vmul.f32 %v4506_v54, %v1214_v2  ;;  %v3106_v12 = vld [vmem:[%s5602_s5] sm:$0xff]   ;;  %v3107_v2 = vld [vmem:[%s5602_s5 + $0x48] sm:$0xff]  }
 0x259   :  { %v1004_v47 = vadd.f32 %v988_v50, %v883_v33  ;;  %v1005_v13 = vadd.f32 %v989_v27, %v884_v8  ;;  %v4697_v14 = vpop.permute.xlu1 %760  ;;  %v920_v36 = vpop.permute.xlu0 %919  ;;  %v886_v33 = vadd.f32 %v870_v42, %v838_v34  ;;  %v1261_v50 = vmul.f32 %v4509_v53, %v1210_v61  ;;  %v5786_v61 = vld [vmem:[#allocation26_spill] sm:$0xff] }
 0x25a   :  { %v926_v62 = vsel %vm923_vm6, %v912_v3, %v920_v36  ;;  %v938_v63 = vsel %vm923_vm6, %v920_v36, %v896_v31  ;;  %v3105_v31 = vld [vmem:[%s5602_s5 + $0x40] sm:$0xff]   ;;  %v1103_v42 = vmul.f32 %v4476_v56, %v4621_v46 }
 0x25b   :  { %v1116_v26 = vadd.f32 %v1100_v15, %v1004_v47  ;;  %v1117_v29 = vadd.f32 %v1101_v59, %v1005_v13  ;;  %v959_v32 = vsel %vm615_vm9, %v938_v63, 0.0  ;;  %v990_v8 = vmul.f32 %v4503_v43, %v926_v62  ;;  %2942 = vmatprep.subr.bf16.mxu0 %v3105_v31  ;;  %v3108_v62 = vld [vmem:[%s5602_s5 + $0x8] sm:$0xff]  }
 0x25c   :  { %v991_v3 = vmul.f32 %v4514_v6, %v959_v32  ;;  %2943 = vmatpush3.bf16.msra.mxu0 %v3106_v12  ;;  %v3113_v63 = vld [vmem:[%s5602_s5 + $0xc8] sm:$0xff]   ;;  %v3117_v12 = vld [vmem:[%s5602_s5 + $0xd0] sm:$0xff]  }
 0x25d   :  { %v1164_v59 = vadd.f32 %v1148_v4, %v1116_v26  ;;  %v1006_v27 = vadd.f32 %v990_v8, %v885_v23  ;;  %v4716_v40 = vpop.permute.xlu1 %913  ;;  %v4718_v15 = vpop.permute.xlu0 %1288  ;;  %v1165_v47 = vadd.f32 %v1149_v48, %v1117_v29  ;;  %v1150_v23 = vmul.f32 %v4376_v10, %v5786_v61  ;;  %v3109_v29 = vld [vmem:[%s5602_s5 + $0xc0] sm:$0xff]   ;;  %v5789_v8 = vld [vmem:[#allocation30_spill] sm:$0xff]  ;;  %2944 = vmatprep.subr.bf16.mxu0 %v3107_v2 }
 0x25e   :  { %v1007_v34 = vadd.f32 %v991_v3, %v886_v33  ;;  %v3110_v48 = vld [vmem:[%s5602_s5 + $0x80] sm:$0xff]   ;;  %v1231_v4 = vsel %vm615_vm9, %v4651_v22, 0.0  ;;  %v1398_v26 = vsub.s32 7, %v5788_v38  ;;  %v1151_v22 = vmul.f32 %v4388_v44, %v5789_v8  ;;  %2964 = vmatprep.subr.bf16.mxu1 %v3109_v29  ;;  %v3115_v29 = vld [vmem:[%s5602_s5 + $0x58] sm:$0xff]  }
 0x25f   :  { %v1118_v13 = vadd.f32 %v1102_v49, %v1006_v27  ;;  %v4739_v36 = vadd.f32 %v1261_v50, %v1165_v47  ;;  %v4741_v46 = vadd.f32 %v1260_v5, %v1164_v59  ;;  %v3111_v49 = vld [vmem:[%s5602_s5 + $0x50] sm:$0xff]   ;;  %v1350_v5 = vsub.s32 6, %v5788_v38  ;;  %2965 = vmatpush3.bf16.msra.mxu1 %v3110_v48  ;;  %v3114_v59 = vld [vmem:[%s5602_s5 + $0x88] sm:$0xff]  }
 0x260   :  { %v1119_v32 = vadd.f32 %v1103_v42, %v1007_v34  ;;  %v1262_v33 = vmul.f32 %v4543_v28, %v4647_v11  ;;  %v1263_v27 = vmul.f32 %v4569_v41, %v1231_v4  ;;  %2966 = vmatprep.subr.bf16.mxu1 %v3113_v63  ;;  %2945 = vmatpush3.bf16.msra.mxu0 %v3108_v62  ;;  %v3112_v11 = vld [vmem:[%s5602_s5 + $0x10] sm:$0xff]   ;;  %v5800_v38 = vld [vmem:[#allocation44_spill] sm:$0xff] }
 0x261   :  { %5787 = vst [vmem:[#allocation43_spill] sm:$0xff] %v4741_v46  ;;  %v4758_v3 = vpop.permute.xlu1 %897  ;;  %v4760_v31 = vpop.permute.xlu0 %1304  ;;  %v1166_v50 = vadd.f32 %v1150_v23, %v1118_v13  ;;  %v4775_v42 = vrot.slane %v4331_v0, %v1398_v26  ;;  %v4778_v34 = vrot.slane %v4326_v18, %v1398_v26  ;;  %v4781_v61 = vrot.slane %v4328_v16, %v1398_v26 }
 0x262   :  { %v1167_v47 = vadd.f32 %v1151_v22, %v1119_v32  ;;  %2946 = vmatprep.subr.bf16.mxu0 %v3111_v49  ;;  %v4789_v48 = vrot.slane %v4345_v1, %v1398_v26  ;;  %v4792_v4 = vrot.slane %v4328_v16, %v1350_v5  ;;  %v4795_v13 = vrot.slane %v4326_v18, %v1350_v5  ;;  %v3118_v32 = vld [vmem:[%s5602_s5 + $0x90] sm:$0xff]   ;;  %v3121_v18 = vld [vmem:[%s5602_s5 + $0xd8] sm:$0xff]  }
 0x263   :  { %v4769_v2 = vadd.f32 %v1262_v33, %v1166_v50  ;;  %2967 = vmatpush3.bf16.msra.mxu1 %v3114_v59  ;;  %v3116_v49 = vld [vmem:[%s5602_s5 + $0x18] sm:$0xff]   ;;  %v5792_v33 = vld [vmem:[#allocation25_spill] sm:$0xff]  ;;  %v5794_v59 = vld [vmem:[#allocation27_spill] sm:$0xff] }
 0x264   :  { %v4783_v23 = vadd.f32 %v1263_v27, %v1167_v47  ;;  %2968 = vmatprep.subr.bf16.mxu1 %v3117_v12  ;;  %2947 = vmatpush3.bf16.msra.mxu0 %v3112_v11  ;;  %v4818_v50 = vmul.f32 %v4775_v42, %v5792_v33  ;;  %v4822_v27 = vmul.f32 %v4778_v34, %v5794_v59  ;;  %v5796_v47 = vld [vmem:[#allocation29_spill] sm:$0xff]  ;;  %v3119_v11 = vld [vmem:[%s5602_s5 + $0x60] sm:$0xff]  }
 0x265   :  { %5790 = vst [vmem:[#allocation58_spill] sm:$0xff] %v4769_v2  ;;  %v1295_v62 = vpop.permute.xlu1 %1294  ;;  %v4797_v63 = vpop.permute.xlu0 %1464  ;;  %v4826_v12 = vmul.f32 %v4781_v61, %v5796_v47  ;;  %2948 = vmatprep.subr.bf16.mxu0 %v3115_v29  ;;  %v3122_v29 = vld [vmem:[%s5602_s5 + $0x98] sm:$0xff]  }
 0x266   :  { %5791 = vst [vmem:[#allocation46_spill] sm:$0xff] %v4783_v23  ;;  %v1321_v8 = vsel %vm770_vm4, %v1295_v62, %v4655_v37  ;;  %v1325_v16 = vsel %vm770_vm4, %v4653_v45, %v1295_v62  ;;  %5793 = vst [vmem:[#allocation64_spill] sm:$0xff] %v4818_v50  ;;  %v4833_v62 = vmul.f32 %v4789_v48, %v3886_v17  ;;  %v5820_v23 = vld [vmem:[#allocation40_spill] sm:$0xff] }
 0x267   :  { %v1369_v26 = vmul.f32 %v4792_v4, %v1325_v16  ;;  %v1370_v22 = vmul.f32 %v4795_v13, %v1321_v8  ;;  %5795 = vst [vmem:[#allocation31_spill] sm:$0xff] %v4822_v27  ;;  %5797 = vst [vmem:[#allocation28_spill] sm:$0xff] %v4826_v12  ;;  %v4836_v8 = vrot.slane %v4345_v1, %v1350_v5  ;;  %2969 = vmatpush3.bf16.msra.mxu1 %v3118_v32  ;;  %v5801_v32 = vld [vmem:[#allocation45_spill] sm:$0xff] }
 0x268   :  { %5798 = vst [vmem:[#allocation26_spill] sm:$0xff] %v4833_v62  ;;  %v1416_v17 = vmul.f32 %v4775_v42, %v5800_v38  ;;  %v4850_v62 = vrot.slane %v4331_v0, %v1350_v5  ;;  %2970 = vmatprep.subr.bf16.mxu1 %v3121_v18  ;;  %v5803_v38 = vld [vmem:[#allocation33_spill] sm:$0xff]  ;;  %2949 = vmatpush3.bf16.msra.mxu0 %v3116_v49  ;;  %v3123_v49 = vld [vmem:[%s5602_s5 + $0x68] sm:$0xff]  }
 0x269   :  { %v1385_v16 = vadd.f32 %v1369_v26, %v4564_v57  ;;  %v4840_v33 = vadd.f32 %v1370_v22, %v4585_v25  ;;  %v1311_v59 = vpop.permute.xlu1 %1310  ;;  %v4842_v47 = vpop.permute.xlu0 %738  ;;  %v3125_v25 = vld [vmem:[%s5602_s5 + $0xe0] sm:$0xff]   ;;  %v4863_v26 = vmul.f32 %v4778_v34, %v5801_v32  ;;  %v4867_v0 = vmul.f32 %v4366_v30, %v5803_v38  ;;  %v5805_v22 = vld [vmem:[#allocation49_spill] sm:$0xff]  ;;  %v5806_v32 = vld [vmem:[#allocation50_spill] sm:$0xff]  ;;  %2950 = vmatprep.subr.bf16.mxu0 %v3119_v11 }
 0x26a   :  { %v1317_v1 = vsel %vm770_vm4, %v4655_v37, %v1311_v59  ;;  %v1329_v57 = vsel %vm770_vm4, %v1311_v59, %v4653_v45  ;;  %v3120_v45 = vld [vmem:[%s5602_s5 + $0x20] sm:$0xff]   ;;  %v4877_v18 = vmul.f32 %v4775_v42, %v3937_v58  ;;  %v1417_v59 = vmul.f32 %v4781_v61, %v5805_v22  ;;  %v5809_v58 = vld [vmem:[#allocation38_spill] sm:$0xff] }
 0x26b   :  { %5799 = vst [vmem:[#allocation30_spill] sm:$0xff] %v4840_v33  ;;  %5802 = vst [vmem:[#allocation25_spill] sm:$0xff] %v4863_v26  ;;  %v1336_v37 = vsel %vm608_vm8, %v1329_v57, 0.0  ;;  %v1371_v5 = vmul.f32 %v4836_v8, %v1317_v1  ;;  %v4883_v38 = vmul.f32 %v4366_v30, %v5806_v32  ;;  %v5808_v1 = vld [vmem:[#allocation37_spill] sm:$0xff]  ;;  %v4895_v12 = vmul.f32 %v4778_v34, %v5809_v58  ;;  %v3126_v32 = vld [vmem:[%s5602_s5 + $0xa0] sm:$0xff]  }
 0x26c   :  { %5804 = vst [vmem:[#allocation27_spill] sm:$0xff] %v4877_v18  ;;  %v1368_v57 = vmul.f32 %v4850_v62, %v1336_v37  ;;  %v4891_v27 = vmul.f32 %v5780_v19, %v5808_v1  ;;  %v4899_v22 = vmul.f32 %v4789_v48, %v4222_v21  ;;  %2971 = vmatpush3.bf16.msra.mxu1 %v3122_v29  ;;  %v5813_v1 = vld [vmem:[#allocation53_spill] sm:$0xff]  ;;  %v4913_v58 = vld [vmem:[#allocation7 + $0x20] ss:$0 sm:$0xff] }
 0x26d   :  { %5807 = vst [vmem:[#allocation29_spill] sm:$0xff] %v4883_v38  ;;  %5810 = vst [vmem:[#allocation44_spill] sm:$0xff] %v4895_v12  ;;  %v4902_v30 = vadd.f32 %v1371_v5, %v4589_v35  ;;  %v1455_v11 = vpop.permute.xlu1 %1454  ;;  %v4904_v37 = vpop.permute.xlu0 %754  ;;  %v4911_v50 = vmul.f32 %v5780_v19, %v5813_v1  ;;  %v4915_v12 = vld [vmem:[#allocation7 + $0x28] ss:$0 sm:$0xff]  ;;  %v5817_v18 = vld [vmem:[#allocation89_spill] sm:$0xff]  ;;  %2972 = vmatprep.subr.bf16.mxu1 %v3125_v25  ;;  %2951 = vmatpush3.bf16.msra.mxu0 %v3120_v45 }
 0x26e   :  { %5811 = vst [vmem:[#allocation45_spill] sm:$0xff] %v4899_v22  ;;  %5815 = vst [vmem:[#allocation50_spill] sm:$0xff] %v4915_v12  ;;  %v1384_v21 = vadd.f32 %v1368_v57, %v4566_v55  ;;  %v5816_v35 = vld [vmem:[#allocation88_spill] sm:$0xff]  ;;  %v1485_v29 = vsel %vm923_vm6, %v5817_v18, %v1455_v11  ;;  %v5818_v1 = vld [vmem:[#allocation39_spill] sm:$0xff]  ;;  %v4933_v55 = vmul.f32 %v5782_v60, %v5820_v23  ;;  %2952 = vmatprep.subr.bf16.mxu0 %v3123_v49 }
 0x26f   :  { %5812 = vst [vmem:[#allocation33_spill] sm:$0xff] %v4902_v30  ;;  %5814 = vst [vmem:[#allocation49_spill] sm:$0xff] %v4911_v50  ;;  %v1481_v5 = vsel %vm923_vm6, %v1455_v11, %v5816_v35  ;;  %v3129_v19 = vld [vmem:[%s5602_s5 + $0xe8] sm:$0xff]   ;;  %v5819_v50 = vld [vmem:[#allocation59_spill] sm:$0xff]  ;;  %v1528_v35 = vmul.f32 %v4913_v58, %v1485_v29  ;;  %v1433_v22 = vadd.f32 %v1417_v59, %v1385_v16 }
 0x270   :  { %v4929_v46 = vmul.f32 %v5819_v50, %v5818_v1  ;;  %v4935_v57 = vld [vmem:[#allocation8] sm:$0xf]  ;;  %v1529_v38 = vmul.f32 %v4915_v12, %v1481_v5  ;;  %v3124_v25 = vld [vmem:[%s5602_s5 + $0x28] sm:$0xff]   ;;  %v5821_v11 = vld [vmem:[#allocation41_spill] sm:$0xff]  ;;  %v1432_v23 = vadd.f32 %v1416_v17, %v1384_v21  ;;  %2973 = vmatpush3.bf16.msra.mxu1 %v3126_v32 }
 0x271   :  { %v4944_v18 = vmul.f32 %v4781_v61, %v5821_v11  ;;  %v5822_v1 = vld [vmem:[#allocation61_spill] sm:$0xff]  ;;  %v5824_v45 = vld [vmem:[#allocation42_spill] sm:$0xff]  ;;  %v5828_v11 = vld [vmem:[#allocation67_spill] sm:$0xff]  ;;  %v753_v17 = vpop.permute.xlu1 %752  ;;  %v4969_v59 = vpop.permute.xlu0 %907  ;;  %2974 = vmatprep.subr.bf16.mxu1 %v3129_v19  ;;  %2953 = vmatpush3.bf16.msra.mxu0 %v3124_v25 }
 0x272   :  { %v4948_v2 = vmul.f32 %v4775_v42, %v5822_v1  ;;  %v3127_v5 = vld [vmem:[%s5602_s5 + $0x70] sm:$0xff]   ;;  %v4955_v29 = vmul.f32 %v4789_v48, %v5824_v45  ;;  %v5826_v30 = vld [vmem:[#allocation66_spill] sm:$0xff]  ;;  %v4963_v33 = vmul.f32 %v5819_v50, %v5828_v11  ;;  %5832 = vst [vmem:[#allocation40_spill] sm:$0xff] %v4969_v59  ;;  %v3130_v49 = vld [vmem:[%s5602_s5 + $0xa8] sm:$0xff]   ;;  %v1544_v1 = vadd.f32 %v1528_v35, %v1432_v23 }
 0x273   :  { %v4959_v26 = vmul.f32 %v4778_v34, %v5826_v30  ;;  %v5830_v42 = vld [vmem:[#allocation70_spill] sm:$0xff]  ;;  %v5835_v30 = vld [vmem:[#allocation19_spill] sm:$0xff]  ;;  %v1545_v45 = vadd.f32 %v1529_v38, %v1433_v22  ;;  %v3128_v22 = vld [vmem:[%s5602_s5 + $0x30] sm:$0xff]   ;;  %2954 = vmatprep.subr.bf16.mxu0 %v3127_v5 }
 0x274   :  { %5823 = vst [vmem:[#allocation37_spill] sm:$0xff] %v4948_v2  ;;  %5825 = vst [vmem:[#allocation38_spill] sm:$0xff] %v4955_v29  ;;  %v4967_v16 = vmul.f32 %v5782_v60, %v5830_v42  ;;  %v5833_v21 = vld [vmem:[#allocation78_spill] sm:$0xff]  ;;  %v4980_v50 = vrot.slane %v4935_v57, %v5835_v30  ;;  %v3133_v60 = vld [vmem:[%s5602_s5 + $0xf0] sm:$0xff]   ;;  %2975 = vmatpush3.bf16.msra.mxu1 %v3130_v49 }
 0x275   :  { %5827 = vst [vmem:[#allocation53_spill] sm:$0xff] %v4959_v26  ;;  %5829 = vst [vmem:[#allocation39_spill] sm:$0xff] %v4963_v33  ;;  %v4976_v34 = vmul.f32 %v4781_v61, %v5833_v21  ;;  %v5837_v32 = vld [vmem:[#allocation79_spill] sm:$0xff]  ;;  %v5839_v42 = vld [vmem:[#allocation32_spill] sm:$0xff]  ;;  %2976 = vmatprep.subr.bf16.mxu1 %v3133_v60  ;;  %2955 = vmatpush3.bf16.msra.mxu0 %v3128_v22 }
 0x276   :  { %5831 = vst [vmem:[#allocation59_spill] sm:$0xff] %v4967_v16  ;;  %5836 = vst [vmem:[#allocation61_spill] sm:$0xff] %v4980_v50  ;;  %v4987_v11 = vmul.f32 %v4789_v48, %v5837_v32  ;;  %v4991_v26 = vmul.f32 %v4373_v24, %v5839_v42  ;;  %v5840_v61 = vld [vmem:[#allocation21_spill] sm:$0xff]  ;;  %v5842_v30 = vld [vmem:[#allocation23_spill] sm:$0xff] }
 0x277   :  { %5834 = vst [vmem:[#allocation41_spill] sm:$0xff] %v4976_v34  ;;  %v4995_v21 = vmul.f32 %v4373_v24, %v5840_v61  ;;  %v4999_v38 = vmul.f32 %v4385_v51, %v5842_v30  ;;  %v5844_v35 = vld [vmem:[#allocation90_spill] sm:$0xff]  ;;  %v5847_v32 = vld [vmem:[#allocation24_spill] sm:$0xff]  ;;  %v5849_v42 = vld [vmem:[#allocation35_spill] sm:$0xff] }
 0x278   :  { %5838 = vst [vmem:[#allocation42_spill] sm:$0xff] %v4987_v11  ;;  %v782_v48 = vsel %vm770_vm4, %v5844_v35, %v753_v17  ;;  %v5845_v19 = vld [vmem:[#allocation22_spill] sm:$0xff]  ;;  %v5013_v24 = vmul.f32 %v4388_v44, %v5847_v32  ;;  %v5017_v30 = vmul.f32 %v4385_v51, %v5849_v42  ;;  %v5850_v61 = vld [vmem:[#allocation52_spill] sm:$0xff]  ;;  %v5851_v2 = vld [vmem:[#allocation17_spill] sm:$0xff]  ;;  %v769_v11 = vpop.permute.xlu1 %768  ;;  %v5029_v32 = vpop.permute.xlu0 %891 }
 0x279   :  { %5841 = vst [vmem:[#allocation66_spill] sm:$0xff] %v4995_v21  ;;  %5843 = vst [vmem:[#allocation67_spill] sm:$0xff] %v4999_v38  ;;  %v5009_v23 = vmul.f32 %v4376_v10, %v5845_v19  ;;  %v3131_v25 = vld [vmem:[%s5602_s5 + $0x78] sm:$0xff]   ;;  %v1060_v34 = vsel %vm608_vm8, %v5850_v61, 0.0  ;;  %v5027_v19 = vrot.slane %v4935_v57, %v5851_v2  ;;  %v5855_v5 = vld [vmem:[#allocation36_spill] sm:$0xff] }
 0x27a   :  { %5848 = vst [vmem:[#allocation78_spill] sm:$0xff] %v5013_v24  ;;  %5853 = vst [vmem:[#allocation32_spill] sm:$0xff] %v5029_v32  ;;  %v5854_v29 = vld [vmem:[#allocation34_spill] sm:$0xff]  ;;  %v5037_v42 = vmul.f32 %v4388_v44, %v5855_v5  ;;  %v3134_v61 = vld [vmem:[%s5602_s5 + $0xb0] sm:$0xff]   ;;  %v786_v44 = vsel %vm770_vm4, %v769_v11, %v5844_v35  ;;  %v5073_v35 = vmul.f32 %v4472_v52, %v1060_v34  ;;  %2956 = vmatprep.subr.bf16.mxu0 %v3131_v25 }
 0x27b   :  { %5846 = vst [vmem:[#allocation70_spill] sm:$0xff] %v5009_v23  ;;  %5852 = vst [vmem:[#allocation79_spill] sm:$0xff] %v5027_v19  ;;  %v5033_v51 = vmul.f32 %v4376_v10, %v5854_v29  ;;  %v5856_v24 = vld [vmem:[#allocation48_spill] sm:$0xff]  ;;  %v5047_v23 = vadd.f32 %v4980_v50, %v1545_v45  ;;  %v778_v10 = vsel %vm770_vm4, %v753_v17, %v4697_v14  ;;  %v3135_v29 = vld [vmem:[%s5602_s5 + $0xf8] sm:$0xff]   ;;  %v807_v17 = vsel %vm608_vm8, %v786_v44, 0.0 }
 0x27c   :  { %v5044_v2 = vmul.f32 %v4420_v20, %v5856_v24  ;;  %v5859_v49 = vld [vmem:[#allocation47_spill] sm:$0xff]  ;;  %v5863_v38 = vld [vmem:[#allocation62_spill] sm:$0xff]  ;;  %5864 = vst [vmem:[#allocation24_spill] sm:$0xff] %v5073_v35  ;;  %v5093_v50 = vpop.permute.xlu0 %1296  ;;  %2977 = vmatpush3.bf16.msra.mxu1 %v3134_v61  ;;  %v5878_v59 = vld [vmem:[#allocation68_spill] sm:$0xff] }
 0x27d   :  { %5858 = vst [vmem:[#allocation23_spill] sm:$0xff] %v5047_v23  ;;  %v5060_v24 = vmul.f32 %v4463_v7, %v5859_v49  ;;  %v5861_v5 = vld [vmem:[#allocation51_spill] sm:$0xff]  ;;  %v840_v21 = vmul.f32 %v5863_v38, %v782_v48  ;;  %v3132_v60 = vld [vmem:[%s5602_s5 + $0x38] sm:$0xff]   ;;  %v5868_v48 = vld [vmem:[#allocation69_spill] sm:$0xff]  ;;  %2978 = vmatprep.subr.bf16.mxu1 %v3135_v29 }
 0x27e   :  { %5857 = vst [vmem:[#allocation21_spill] sm:$0xff] %v5044_v2  ;;  %v5064_v45 = vmul.f32 %v4476_v56, %v5861_v5  ;;  %v5865_v16 = vld [vmem:[#allocation55_spill] sm:$0xff]  ;;  %v5087_v2 = vadd.f32 %v5027_v19, %v1544_v1  ;;  %v3136_v25 = vld [vmem:[%s5602_s5 + $0xb8] sm:$0xff]   ;;  %2957 = vmatpush3.bf16.msra.mxu0 %v3132_v60 }
 0x27f   :  { %5860 = vst [vmem:[#allocation90_spill] sm:$0xff] %v5060_v24  ;;  %v5077_v49 = vmul.f32 %v4506_v54, %v5865_v16  ;;  %v5867_v24 = vld [vmem:[#allocation57_spill] sm:$0xff]  ;;  %v5869_v44 = vld [vmem:[#allocation83_spill] sm:$0xff]  ;;  %v774_v16 = vsel %vm770_vm4, %v4697_v14, %v769_v11  ;;  %v5872_v11 = vld [vmem:[#allocation54_spill] sm:$0xff] }
 0x280   :  { %5862 = vst [vmem:[#allocation22_spill] sm:$0xff] %v5064_v45  ;;  %v1223_v5 = vsel %vm615_vm9, %v5867_v24, 0.0  ;;  %v839_v45 = vmul.f32 %v5868_v48, %v807_v17  ;;  %v1072_v22 = vsel %vm608_vm8, %v5869_v44, 0.0  ;;  %5870 = vst [vmem:[#allocation52_spill] sm:$0xff] %v5087_v2  ;;  %v5871_v34 = vld [vmem:[#allocation63_spill] sm:$0xff]  ;;  %v5108_v61 = vmul.f32 %v4509_v53, %v5872_v11  ;;  %v5874_v44 = vld [vmem:[#allocation73_spill] sm:$0xff]  ;;  %v1313_v60 = vpop.permute.xlu0 %1312  ;;  %2979 = vmatpush3.bf16.msra.mxu1 %v3136_v25 }
 0x281   :  { %5866 = vst [vmem:[#allocation35_spill] sm:$0xff] %v5077_v49  ;;  %v841_v35 = vmul.f32 %v5871_v34, %v778_v10  ;;  %v906_v49 = vpop.permute.xlu1 %905  ;;  %v2852_v24 = vmul.f32 -1.442695, %v5047_v23  ;;  %v888_v10 = vadd.f32 %v4929_v46, %v840_v21  ;;  %v5875_v23 = vld [vmem:[#allocation74_spill] sm:$0xff]  ;;  %v5118_v32 = vmul.f32 %v4569_v41, %v1223_v5 }
 0x282   :  { %v887_v17 = vadd.f32 %v4867_v0, %v839_v45  ;;  %v931_v1 = vsel %vm923_vm6, %v906_v49, %v4716_v40  ;;  %v935_v14 = vsel %vm923_vm6, %v4758_v3, %v906_v49  ;;  %5873 = vst [vmem:[#allocation34_spill] sm:$0xff] %v5108_v61  ;;  %v5876_v0 = vld [vmem:[#allocation56_spill] sm:$0xff]  ;;  %v5877_v49 = vld [vmem:[#allocation81_spill] sm:$0xff]  ;;  %v842_v11 = vmul.f32 %v5878_v59, %v774_v16 }
 0x283   :  { %v992_v19 = vmul.f32 %v5874_v44, %v935_v14  ;;  %v993_v33 = vmul.f32 %v5875_v23, %v931_v1  ;;  %v5115_v45 = vmul.f32 %v4543_v28, %v5876_v0  ;;  %v1105_v29 = vmul.f32 %v4420_v20, %v5877_v49 }
 0x284   :  { %v1104_v61 = vmul.f32 %v4472_v52, %v1072_v22  ;;  %v889_v46 = vadd.f32 %v4891_v27, %v841_v35  ;;  %v2851_v0 = vmul.f32 -1.442695, %v5087_v2  ;;  %3237 = vpow2.f32 %v2852_v24  ;;  %v5148_v49 = vpop.permute.xlu0 %1456 }
 0x285   :  { %v1008_v21 = vadd.f32 %v992_v19, %v887_v17  ;;  %v1009_v14 = vadd.f32 %v993_v33, %v888_v10  ;;  %v922_v1 = vpop.permute.xlu1 %921  ;;  %v5879_v19 = vld [vmem:[#allocation80_spill] sm:$0xff]  ;;  %v890_v22 = vadd.f32 %v4933_v55, %v842_v11  ;;  %v5881_v55 = vld [vmem:[#allocation82_spill] sm:$0xff]  ;;  %v5882_v11 = vld [vmem:[#allocation85_spill] sm:$0xff] }
 0x286   :  { %v927_v5 = vsel %vm923_vm6, %v4716_v40, %v922_v1  ;;  %v939_v20 = vsel %vm923_vm6, %v922_v1, %v4758_v3  ;;  %v1106_v35 = vmul.f32 %v4463_v7, %v5879_v19  ;;  %v1326_v40 = vsel %vm770_vm4, %v4718_v15, %v5093_v50  ;;  %v5880_v3 = vld [vmem:[#allocation84_spill] sm:$0xff]  ;;  %v5883_v1 = vld [vmem:[#allocation87_spill] sm:$0xff] }
 0x287   :  { %v1120_v16 = vadd.f32 %v1104_v61, %v1008_v21  ;;  %v1121_v52 = vadd.f32 %v1105_v29, %v1009_v14  ;;  %v963_v27 = vsel %vm615_vm9, %v939_v20, 0.0  ;;  %v994_v33 = vmul.f32 %v4503_v43, %v927_v5  ;;  %v5884_v20 = vld [vmem:[#allocation72_spill] sm:$0xff] }
 0x288   :  { %v995_v25 = vmul.f32 %v4514_v6, %v963_v27  ;;  %v1265_v24 = vmul.f32 %v4509_v53, %v5880_v3  ;;  %v1107_v29 = vmul.f32 %v4476_v56, %v5881_v55  ;;  %v1264_v21 = vmul.f32 %v4506_v54, %v5882_v11  ;;  %v5886_v54 = vld [vmem:[#allocation76_spill] sm:$0xff] }
 0x289   :  { %v1168_v17 = vadd.f32 %v4991_v26, %v1120_v16  ;;  %v1010_v61 = vadd.f32 %v994_v33, %v889_v46  ;;  %v5146_v10 = vpop.permute.xlu1 %1290  ;;  %v1169_v7 = vadd.f32 %v5017_v30, %v1121_v52  ;;  %3239 = vpow2.f32 %v2851_v0  ;;  %v5885_v16 = vld [vmem:[#allocation71_spill] sm:$0xff]  ;;  %v5887_v27 = vld [vmem:[#allocation60_spill] sm:$0xff]  ;;  %v5888_v33 = vld [vmem:[#allocation77_spill] sm:$0xff] }
 0x28a   :  { %v1011_v14 = vadd.f32 %v995_v25, %v890_v22  ;;  %v1235_v53 = vsel %vm615_vm9, %v5883_v1, 0.0  ;;  %v1373_v26 = vmul.f32 %v4792_v4, %v1326_v40  ;;  %v5163_v30 = vmul.f32 %v4792_v4, %v5884_v20  ;;  %v747_v25 = vpop.permute.xlu0 %746  ;;  %v5891_v1 = vld [vmem:[#allocation75_spill] sm:$0xff] }
 0x28b   :  { %v1122_v46 = vadd.f32 %v1106_v35, %v1010_v61  ;;  %v5159_v5 = vadd.f32 %v1265_v24, %v1169_v7  ;;  %v5167_v56 = vmul.f32 %v4795_v13, %v5885_v16  ;;  %v1332_v0 = vsel %vm608_vm8, %v5886_v54, 0.0  ;;  %v5889_v35 = vld [vmem:[#allocation86_spill] sm:$0xff]  ;;  %v5890_v61 = vld [vmem:[#allocation65_spill] sm:$0xff] }
 0x28c   :  { %v1123_v52 = vadd.f32 %v1107_v29, %v1011_v14  ;;  %v1480_v19 = vsel %vm923_vm6, %v5888_v33, %v5887_v27  ;;  %v1266_v22 = vmul.f32 %v4543_v28, %v5889_v35  ;;  %v5181_v24 = vadd.f32 %v1264_v21, %v1168_v17  ;;  %v5892_v35 = vld [vmem:[#allocation18_spill] sm:$0xff] }
 0x28d   :  { %v5178_v40 = vpop.permute.xlu1 %1306  ;;  %v1170_v3 = vadd.f32 %v5033_v51, %v1122_v46  ;;  %v1484_v7 = vsel %vm923_vm6, %v5890_v61, %v5888_v33  ;;  %v1267_v55 = vmul.f32 %v4569_v41, %v1235_v53  ;;  %v1482_v29 = vsel %vm923_vm6, %v5148_v49, %v4797_v63 }
 0x28e   :  { %v1171_v28 = vadd.f32 %v5037_v42, %v1123_v52  ;;  %v1322_v51 = vsel %vm770_vm4, %v5093_v50, %v4760_v31  ;;  %v1389_v17 = vadd.f32 %v1373_v26, %v4739_v36  ;;  %v1330_v11 = vsel %vm770_vm4, %v1313_v60, %v4718_v15  ;;  %v3238_v41 = vpop.eup %3237  ;;  %v763_v16 = vpop.permute.xlu0 %762 }
 0x28f   :  { %v5201_v21 = vadd.f32 %v1266_v22, %v1170_v3  ;;  %v5204_v14 = vmul.f32 %v4850_v62, %v1332_v0  ;;  %v5208_v42 = vmul.f32 %v4836_v8, %v5891_v1  ;;  %v1318_v50 = vsel %vm770_vm4, %v4760_v31, %v1313_v60  ;;  %v5895_v1 = vld [vmem:[#allocation25_spill] sm:$0xff] }
 0x290   :  { %v5213_v53 = vadd.f32 %v1267_v55, %v1171_v28  ;;  %v5216_v36 = vmul.f32 %v4913_v58, %v1484_v7  ;;  %v5219_v15 = vmul.f32 %v4915_v12, %v1480_v19  ;;  %v1533_v26 = vmul.f32 %v4915_v12, %v1482_v29  ;;  %v5893_v29 = vld [vmem:[#allocation20_spill] sm:$0xff]  ;;  %v5285_v12 = vld [vmem:[#allocation7 + $0x38] ss:$0 sm:$0xff] }
 0x291   :  { %v779_v46 = vsel %vm770_vm4, %v4842_v47, %v747_v25  ;;  %v5225_v20 = vpop.permute.xlu1 %1466  ;;  %v1374_v54 = vmul.f32 %v4795_v13, %v1322_v51  ;;  %v1340_v31 = vsel %vm608_vm8, %v1330_v11, 0.0  ;;  %v775_v60 = vsel %vm770_vm4, %v747_v25, %v4904_v37  ;;  %v5894_v11 = vld [vmem:[#allocation30_spill] sm:$0xff] }
 0x292   :  { %v783_v0 = vsel %vm770_vm4, %v763_v16, %v4842_v47  ;;  %v1375_v52 = vmul.f32 %v4836_v8, %v1318_v50  ;;  %v1437_v33 = vadd.f32 %v4944_v18, %v1389_v17  ;;  %v5242_v22 = vrot.slane %v4935_v57, %v5892_v35 }
 0x293   :  { %v795_v19 = vsel %vm608_vm8, %v783_v0, 0.0  ;;  %v3240_v3 = vpop.eup %3239  ;;  %v1647_v7 = vadd.f32 1.0, %v3238_v41  ;;  %v828_v55 = vmul.f32 %v5863_v38, %v779_v46  ;;  %v5248_v47 = vrot.slane %v4935_v57, %v5893_v29  ;;  %v5896_v0 = vld [vmem:[#allocation33_spill] sm:$0xff]  ;;  %v5898_v38 = vld [vmem:[#allocation58_spill] sm:$0xff] }
 0x294   :  { %v827_v25 = vmul.f32 %v5868_v48, %v795_v19  ;;  %v1372_v28 = vmul.f32 %v4850_v62, %v1340_v31  ;;  %v1549_v18 = vadd.f32 %v1533_v26, %v1437_v33  ;;  %v829_v51 = vmul.f32 %v5871_v34, %v775_v60  ;;  %v5897_v41 = vld [vmem:[#allocation45_spill] sm:$0xff]  ;;  %v900_v26 = vpop.permute.xlu0 %899  ;;  %v5900_v34 = vld [vmem:[#allocation46_spill] sm:$0xff]  ;;  %v5901_v19 = vld [vmem:[#allocation40_spill] sm:$0xff] }
 0x295   :  { %v5252_v17 = vpop.permute.xlu1 %1450  ;;  %v1434_v50 = vadd.f32 %v5895_v1, %v5894_v11  ;;  %v1435_v35 = vadd.f32 %v5897_v41, %v5896_v0  ;;  %v5259_v46 = vadd.f32 %v1374_v54, %v5898_v38  ;;  %v771_v57 = vsel %vm770_vm4, %v4904_v37, %v763_v16  ;;  %v5899_v48 = vld [vmem:[#allocation29_spill] sm:$0xff]  ;;  %v5902_v1 = vld [vmem:[#allocation32_spill] sm:$0xff]  ;;  %v5903_v0 = vld [vmem:[#allocation39_spill] sm:$0xff] }
 0x296   :  { %v875_v31 = vadd.f32 %v5899_v48, %v827_v25  ;;  %v1646_v33 = vadd.f32 1.0, %v3240_v3  ;;  %v5266_v60 = vadd.f32 %v1375_v52, %v5900_v34  ;;  %v928_v11 = vsel %vm923_vm6, %v900_v26, %v5901_v19  ;;  %v5277_v25 = vld [vmem:[#allocation7 + $0x30] ss:$0 sm:$0xff]  ;;  %v5904_v3 = vld [vmem:[#allocation43_spill] sm:$0xff] }
 0x297   :  { %v932_v54 = vsel %vm923_vm6, %v5902_v1, %v900_v26  ;;  %3241 = vrcp.f32 %v1647_v7  ;;  %v876_v41 = vadd.f32 %v5903_v0, %v828_v55  ;;  %v981_v16 = vmul.f32 %v5875_v23, %v928_v11  ;;  %v5905_v38 = vld [vmem:[#allocation61_spill] sm:$0xff]  ;;  %v5907_v0 = vld [vmem:[#allocation88_spill] sm:$0xff] }
 0x298   :  { %v980_v37 = vmul.f32 %v5874_v44, %v932_v54  ;;  %v1388_v52 = vadd.f32 %v1372_v28, %v5904_v3  ;;  %v5281_v48 = vadd.f32 %v5905_v38, %v1549_v18  ;;  %v5906_v34 = vld [vmem:[#allocation49_spill] sm:$0xff]  ;;  %v830_v2 = vmul.f32 %v5878_v59, %v771_v57  ;;  %v916_v11 = vpop.permute.xlu0 %915 }
 0x299   :  { %v877_v29 = vadd.f32 %v5906_v34, %v829_v51  ;;  %v1471_v7 = vpop.permute.xlu1 %1470  ;;  %v997_v55 = vadd.f32 %v981_v16, %v876_v41  ;;  %v5908_v44 = vld [vmem:[#allocation89_spill] sm:$0xff]  ;;  %v924_v59 = vsel %vm923_vm6, %v5901_v19, %v916_v11  ;;  %v936_v57 = vsel %vm923_vm6, %v916_v11, %v5902_v1  ;;  %v5911_v34 = vld [vmem:[#allocation59_spill] sm:$0xff]  ;;  %v5912_v1 = vld [vmem:[#allocation66_spill] sm:$0xff] }
 0x29a   :  { %v996_v26 = vadd.f32 %v980_v37, %v875_v31  ;;  %v1477_v23 = vsel %vm923_vm6, %v5907_v0, %v1471_v7  ;;  %v1489_v28 = vsel %vm923_vm6, %v1471_v7, %v5908_v44  ;;  %v5909_v31 = vld [vmem:[#allocation24_spill] sm:$0xff]  ;;  %v5910_v41 = vld [vmem:[#allocation21_spill] sm:$0xff]  ;;  %v951_v3 = vsel %vm615_vm9, %v936_v57, 0.0 }
 0x29b   :  { %v1499_v18 = vsel %vm615_vm9, %v1489_v28, 0.0  ;;  %v1530_v51 = vmul.f32 %v5277_v25, %v1477_v23  ;;  %v1109_v37 = vadd.f32 %v5910_v41, %v997_v55  ;;  %v878_v7 = vadd.f32 %v5911_v34, %v830_v2 }
 0x29c   :  { %v1108_v54 = vadd.f32 %v5909_v31, %v996_v26  ;;  %v1531_v16 = vmul.f32 %v5285_v12, %v1499_v18  ;;  %v982_v23 = vmul.f32 %v4503_v43, %v924_v59  ;;  %v983_v19 = vmul.f32 %v4514_v6, %v951_v3  ;;  %v5913_v26 = vld [vmem:[#allocation67_spill] sm:$0xff]  ;;  %v5316_v2 = vpop.permute.xlu0 %1448 }
 0x29d   :  { %v1546_v0 = vadd.f32 %v1530_v51, %v1434_v50  ;;  %v1299_v44 = vpop.permute.xlu1 %1298  ;;  %v2856_v28 = vmul.f32 -1.442695, %v5281_v48  ;;  %v1157_v31 = vadd.f32 %v5913_v26, %v1109_v37  ;;  %3243 = vrcp.f32 %v1646_v33  ;;  %v5914_v50 = vld [vmem:[#allocation35_spill] sm:$0xff]  ;;  %v5915_v51 = vld [vmem:[#allocation34_spill] sm:$0xff] }
 0x29e   :  { %v1156_v11 = vadd.f32 %v5912_v1, %v1108_v54  ;;  %v1547_v55 = vadd.f32 %v1531_v16, %v1435_v35  ;;  %v998_v57 = vadd.f32 %v982_v23, %v877_v29  ;;  %v999_v41 = vadd.f32 %v983_v19, %v878_v7  ;;  %v5916_v33 = vld [vmem:[#allocation90_spill] sm:$0xff] }
 0x29f   :  { %v5314_v18 = vadd.f32 %v5242_v22, %v1546_v0  ;;  %v1269_v6 = vadd.f32 %v5915_v51, %v1157_v31  ;;  %v1323_v54 = vsel %vm770_vm4, %v1299_v44, %v5178_v40  ;;  %v5917_v16 = vld [vmem:[#allocation22_spill] sm:$0xff]  ;;  %v1327_v3 = vsel %vm770_vm4, %v5146_v10, %v1299_v44  ;;  %v5922_v44 = vld [vmem:[#allocation28_spill] sm:$0xff] }
 0x2a0   :  { %v1268_v43 = vadd.f32 %v5914_v50, %v1156_v11  ;;  %v5321_v59 = vadd.f32 %v5248_v47, %v1547_v55  ;;  %v1110_v37 = vadd.f32 %v5916_v33, %v998_v57  ;;  %v1111_v29 = vadd.f32 %v5917_v16, %v999_v41  ;;  %v5918_v1 = vld [vmem:[#allocation70_spill] sm:$0xff]  ;;  %v5920_v55 = vld [vmem:[#allocation27_spill] sm:$0xff]  ;;  %v5921_v41 = vld [vmem:[#allocation64_spill] sm:$0xff] }
 0x2a1   :  { %v2853_v35 = vmul.f32 -1.442695, %v5314_v18  ;;  %v5332_v34 = vpop.eup %3241  ;;  %3245 = vpow2.f32 %v2856_v28  ;;  %v1381_v0 = vadd.f32 %v5163_v30, %v1269_v6  ;;  %v1315_v19 = vpop.permute.xlu1 %1314  ;;  %v5919_v26 = vld [vmem:[#allocation78_spill] sm:$0xff]  ;;  %v1436_v57 = vadd.f32 %v5920_v55, %v1388_v52  ;;  %v5923_v16 = vld [vmem:[#allocation79_spill] sm:$0xff] }
 0x2a2   :  { %v1380_v7 = vadd.f32 %v5204_v14, %v1268_v43  ;;  %v2854_v23 = vmul.f32 -1.442695, %v5321_v59  ;;  %v1158_v11 = vadd.f32 %v5918_v1, %v1110_v37  ;;  %v1159_v31 = vadd.f32 %v5919_v26, %v1111_v29  ;;  %v1469_v6 = vpop.permute.xlu0 %1468 }
 0x2a3   :  { %3247 = vpow2.f32 %v2853_v35  ;;  %v1429_v51 = vadd.f32 %v5922_v44, %v1381_v0  ;;  %v1377_v28 = vmul.f32 %v4792_v4, %v1327_v3  ;;  %v1378_v14 = vmul.f32 %v4795_v13, %v1323_v54 }
 0x2a4   :  { %v1428_v50 = vadd.f32 %v5921_v41, %v1380_v7  ;;  %3249 = vpow2.f32 %v2854_v23  ;;  %v1486_v30 = vsel %vm923_vm6, %v5316_v2, %v5148_v49  ;;  %v1319_v43 = vsel %vm770_vm4, %v5178_v40, %v1315_v19 }
 0x2a5   :  { %v1331_v52 = vsel %vm770_vm4, %v1315_v19, %v5146_v10  ;;  %v1541_v4 = vadd.f32 %v5219_v15, %v1429_v51  ;;  %v1532_v13 = vmul.f32 %v4913_v58, %v1486_v30  ;;  %v1379_v33 = vmul.f32 %v4836_v8, %v1319_v43  ;;  %v5927_v51 = vld [vmem:[#allocation44_spill] sm:$0xff]  ;;  %v5928_v30 = vld [vmem:[#allocation42_spill] sm:$0xff] }
 0x2a6   :  { %v1540_v35 = vadd.f32 %v5216_v36, %v1428_v50  ;;  %v1344_v54 = vsel %vm608_vm8, %v1331_v52, 0.0  ;;  %v1270_v40 = vadd.f32 %v5115_v45, %v1158_v11  ;;  %v1271_v37 = vadd.f32 %v5118_v32, %v1159_v31  ;;  %v5926_v31 = vld [vmem:[#allocation38_spill] sm:$0xff]  ;;  %v1473_v41 = vpop.permute.xlu0 %1472 }
 0x2a7   :  { %v1376_v49 = vmul.f32 %v4850_v62, %v1344_v54  ;;  %v5367_v36 = vadd.f32 %v5905_v38, %v1541_v4  ;;  %v1548_v15 = vadd.f32 %v1532_v13, %v1436_v57  ;;  %v1476_v29 = vsel %vm923_vm6, %v5887_v27, %v1469_v6  ;;  %v5372_v3 = vpop.eup %3243  ;;  %v5930_v13 = vld [vmem:[#allocation41_spill] sm:$0xff] }
 0x2a8   :  { %v5364_v10 = vadd.f32 %v5923_v16, %v1540_v35  ;;  %v1395_v8 = vadd.f32 %v1379_v33, %v5213_v53  ;;  %v1382_v45 = vadd.f32 %v5167_v56, %v1270_v40  ;;  %v1383_v32 = vadd.f32 %v5208_v42, %v1271_v37  ;;  %v5925_v53 = vld [vmem:[#allocation26_spill] sm:$0xff]  ;;  %v1459_v42 = vpop.permute.xlu1 %1458 }
 0x2a9   :  { %v1392_v62 = vadd.f32 %v1376_v49, %v5181_v24  ;;  %v2848_v0 = vmul.f32 -1.442695, %v5367_v36  ;;  %v5381_v23 = vadd.f32 %v5923_v16, %v1548_v15  ;;  %v1488_v27 = vsel %vm923_vm6, %v1469_v6, %v5890_v61  ;;  %v5924_v24 = vld [vmem:[#allocation31_spill] sm:$0xff]  ;;  %v5931_v15 = vld [vmem:[#allocation50_spill] sm:$0xff] }
 0x2aa   :  { %v2847_v7 = vmul.f32 -1.442695, %v5364_v10  ;;  %v1393_v19 = vadd.f32 %v1377_v28, %v5159_v5  ;;  %v1430_v1 = vadd.f32 %v5924_v24, %v1382_v45  ;;  %v1431_v11 = vadd.f32 %v5925_v53, %v1383_v32 }
 0x2ab   :  { %v1495_v56 = vsel %vm615_vm9, %v1488_v27, 0.0  ;;  %v5391_v26 = vpop.eup %3245  ;;  %v1439_v55 = vadd.f32 %v5926_v31, %v5266_v60  ;;  %v1526_v57 = vmul.f32 %v5277_v25, %v1476_v29  ;;  %v1394_v50 = vadd.f32 %v1378_v14, %v5201_v21  ;;  %v5929_v60 = vld [vmem:[#allocation37_spill] sm:$0xff] }
 0x2ac   :  { %3251 = vpow2.f32 %v2847_v7  ;;  %v1527_v61 = vmul.f32 %v5285_v12, %v1495_v56  ;;  %v2855_v44 = vmul.f32 -1.442695, %v5381_v23  ;;  %v1438_v28 = vadd.f32 %v5927_v51, %v5259_v46  ;;  %v1475_v45 = vpop.permute.xlu1 %1474 }
 0x2ad   :  { %v3248_v5 = vpop.eup %3247  ;;  %3253 = vpow2.f32 %v2848_v0  ;;  %v1443_v43 = vadd.f32 %v5928_v30, %v1395_v8  ;;  %v1542_v52 = vadd.f32 %v1526_v57, %v1430_v1  ;;  %v1440_v35 = vadd.f32 %v5929_v60, %v1392_v62  ;;  %v5932_v57 = vld [vmem:[#allocation53_spill] sm:$0xff] }
 0x2ae   :  { %v1543_v6 = vadd.f32 %v1527_v61, %v1431_v11  ;;  %v3250_v4 = vpop.eup %3249  ;;  %v1441_v54 = vadd.f32 %v5930_v13, %v1393_v19  ;;  %v1483_v49 = vsel %vm923_vm6, %v1459_v42, %v5225_v20  ;;  %v1487_v21 = vsel %vm923_vm6, %v5252_v17, %v1459_v42 }
 0x2af   :  { %v1478_v46 = vsel %vm923_vm6, %v4797_v63, %v1473_v41  ;;  %v1648_v14 = vadd.f32 1.0, %v3248_v5  ;;  %v5414_v33 = vadd.f32 %v5242_v22, %v1542_v52  ;;  %v1536_v37 = vmul.f32 %v4913_v58, %v1487_v21 }
 0x2b0   :  { %v5417_v40 = vadd.f32 %v5248_v47, %v1543_v6  ;;  %3255 = vpow2.f32 %v2855_v44  ;;  %v1537_v29 = vmul.f32 %v5931_v15, %v1483_v49  ;;  %v1490_v62 = vsel %vm923_vm6, %v1473_v41, %v5316_v2 }
 0x2b1   :  { %v1534_v8 = vmul.f32 %v5277_v25, %v1478_v46  ;;  %v2849_v63 = vmul.f32 -1.442695, %v5414_v33  ;;  %v1552_v7 = vadd.f32 %v1536_v37, %v1440_v35  ;;  %v1503_v0 = vsel %vm615_vm9, %v1490_v62, 0.0  ;;  %v5934_v62 = vld [vmem:[#allocation23_spill] sm:$0xff] }
 0x2b2   :  { %v2850_v32 = vmul.f32 -1.442695, %v5417_v40  ;;  %v1649_v27 = vadd.f32 1.0, %v3250_v4  ;;  %v1553_v58 = vadd.f32 %v1537_v29, %v1441_v54  ;;  %v1535_v19 = vmul.f32 %v5285_v12, %v1503_v0 }
 0x2b3   :  { %v1550_v24 = vadd.f32 %v1534_v8, %v1438_v28  ;;  %3257 = vpow2.f32 %v2849_v63  ;;  %v5431_v1 = vadd.f32 %v5923_v16, %v1552_v7  ;;  %v1479_v2 = vsel %vm923_vm6, %v5225_v20, %v1475_v45 }
 0x2b4   :  { %v1491_v53 = vsel %vm923_vm6, %v1475_v45, %v5252_v17  ;;  %3259 = vpow2.f32 %v2850_v32  ;;  %v5440_v11 = vadd.f32 %v5905_v38, %v1553_v58  ;;  %v1551_v56 = vadd.f32 %v1535_v19, %v1439_v55 }
 0x2b5   :  { %v5443_v42 = vadd.f32 %v5242_v22, %v1550_v24  ;;  %v2859_v16 = vmul.f32 -1.442695, %v5431_v1  ;;  %v1442_v61 = vadd.f32 %v5932_v57, %v1394_v50  ;;  %v1507_v20 = vsel %vm615_vm9, %v1491_v53, 0.0 }
 0x2b6   :  { %v3252_v31 = vpop.eup %3251  ;;  %v1538_v41 = vmul.f32 %v5277_v25, %v1479_v2  ;;  %3261 = vrcp.f32 %v1648_v14  ;;  %v2860_v38 = vmul.f32 -1.442695, %v5440_v11  ;;  %v5452_v55 = vadd.f32 %v5248_v47, %v1551_v56  ;;  %v5933_v14 = vld [vmem:[#allocation52_spill] sm:$0xff] }
 0x2b7   :  { %v3254_v9 = vpop.eup %3253  ;;  %v1642_v17 = vadd.f32 1.0, %v3252_v31  ;;  %3263 = vpow2.f32 %v2859_v16  ;;  %v1539_v44 = vmul.f32 %v5285_v12, %v1507_v20  ;;  %v2857_v50 = vmul.f32 -1.442695, %v5443_v42 }
 0x2b8   :  { %v1643_v5 = vadd.f32 1.0, %v3254_v9  ;;  %v1554_v51 = vadd.f32 %v1538_v41, %v1442_v61  ;;  %v2858_v39 = vmul.f32 -1.442695, %v5452_v55  ;;  %v5468_v37 = vmul.f32 %v5372_v3, %v5933_v14 }
 0x2b9   :  { %3265 = vrcp.f32 %v1642_v17  ;;  %v1555_v25 = vadd.f32 %v1539_v44, %v1443_v43  ;;  %v5475_v8 = vmul.f32 %v5332_v34, %v5934_v62 }
 0x2ba   :  { %3267 = vrcp.f32 %v1643_v5  ;;  %v5458_v28 = vadd.f32 %v5242_v22, %v1554_v51  ;;  %v3256_v30 = vpop.eup %3255 }
 0x2bb   :  { %3269 = vrcp.f32 %v1649_v27  ;;  %v5461_v52 = vadd.f32 %v5248_v47, %v1555_v25  ;;  %v1650_v4 = vadd.f32 1.0, %v3256_v30  ;;  %v1651_v47 = vadd.f32 1.0, %v5391_v26 }
 0x2bc   :  { %3271 = vpow2.f32 %v2860_v38  ;;  %v2861_v6 = vmul.f32 -1.442695, %v5458_v28 }
 0x2bd   :  { %3273 = vpow2.f32 %v2857_v50  ;;  %v3258_v12 = vpop.eup %3257  ;;  %v2862_v60 = vmul.f32 -1.442695, %v5461_v52 }
 0x2be   :  { %3275 = vpow2.f32 %v2858_v39  ;;  %v3260_v35 = vpop.eup %3259  ;;  %v1644_v13 = vadd.f32 1.0, %v3258_v12 }
 0x2bf   :  { %3277 = vpow2.f32 %v2861_v6  ;;  %v1645_v43 = vadd.f32 1.0, %v3260_v35 }
 0x2c0   :  { %3279 = vpow2.f32 %v2862_v60  ;;  %v3262_v22 = vpop.eup %3261 }
 0x2c1   :  { %3281 = vrcp.f32 %v1644_v13  ;;  %v3264_v54 = vpop.eup %3263  ;;  %v5485_v16 = vmul.f32 %v3262_v22, %v5314_v18 }
 0x2c2   :  { %3283 = vrcp.f32 %v1645_v43  ;;  %v1654_v21 = vadd.f32 1.0, %v3264_v54 }
 0x2c3   :  { %v3266_v49 = vpop.eup %3265  ;;  %3285 = vrcp.f32 %v1650_v4 }
 0x2c4   :  { %v3268_v46 = vpop.eup %3267  ;;  %v5471_v15 = vmul.f32 %v3266_v49, %v5364_v10  ;;  %3287 = vrcp.f32 %v1654_v21 }
 0x2c5   :  { %v3270_v29 = vpop.eup %3269  ;;  %v5478_v45 = vmul.f32 %v3268_v46, %v5367_v36  ;;  %3289 = vrcp.f32 %v1651_v47 }
 0x2c6   :  { %v3272_v26 = vpop.eup %3271  ;;  %v1706_v63 = vadd.f32 %v5468_v37, %v5471_v15  ;;  %v5491_v20 = vmul.f32 %v3270_v29, %v5321_v59 }
 0x2c7   :  { %v3274_v32 = vpop.eup %3273  ;;  %v1655_v3 = vadd.f32 1.0, %v3272_v26  ;;  %v1713_v10 = vadd.f32 %v5475_v8, %v5478_v45 }
 0x2c8   :  { %v3276_v7 = vpop.eup %3275  ;;  %v1652_v0 = vadd.f32 1.0, %v3274_v32  ;;  %v1707_v27 = vrot.slane %v1706_v63, 4 }
 0x2c9   :  { %v3278_v58 = vpop.eup %3277  ;;  %3291 = vrcp.f32 %v1655_v3  ;;  %v1653_v34 = vadd.f32 1.0, %v3276_v7  ;;  %v1714_v19 = vrot.slane %v1713_v10, 4 }
 0x2ca   :  { %v3280_v24 = vpop.eup %3279  ;;  %3293 = vrcp.f32 %v1652_v0  ;;  %v1656_v36 = vadd.f32 1.0, %v3278_v58  ;;  %v1708_v56 = vadd.f32 %v1707_v27, %v1706_v63 }
 0x2cb   :  { %v3282_v2 = vpop.eup %3281  ;;  %3295 = vrcp.f32 %v1653_v34  ;;  %v1657_v53 = vadd.f32 1.0, %v3280_v24  ;;  %v1715_v9 = vadd.f32 %v1714_v19, %v1713_v10 }
 0x2cc   :  { %v3284_v31 = vpop.eup %3283  ;;  %v5488_v57 = vmul.f32 %v3282_v2, %v5414_v33  ;;  %3297 = vrcp.f32 %v1656_v36  ;;  %v1709_v5 = vrot.slane %v1708_v56, 2 }
 0x2cd   :  { %v3286_v61 = vpop.eup %3285  ;;  %v5494_v41 = vmul.f32 %v3284_v31, %v5417_v40  ;;  %3299 = vrcp.f32 %v1657_v53  ;;  %v1716_v50 = vrot.slane %v1715_v9, 2 }
 0x2ce   :  { %v1720_v17 = vadd.f32 %v5485_v16, %v5488_v57  ;;  %v3288_v38 = vpop.eup %3287  ;;  %v5501_v33 = vmul.f32 %v3286_v61, %v5381_v23  ;;  %v1710_v6 = vadd.f32 %v1709_v5, %v1708_v56 }
 0x2cf   :  { %v1727_v18 = vadd.f32 %v5491_v20, %v5494_v41  ;;  %v5504_v59 = vmul.f32 %v3288_v38, %v5431_v1  ;;  %v3290_v51 = vpop.eup %3289  ;;  %v1717_v43 = vadd.f32 %v1716_v50, %v1715_v9 }
 0x2d0   :  { %v1721_v44 = vrot.slane %v1720_v17, 4  ;;  %v5509_v35 = vmul.f32 %v3290_v51, %v5281_v48  ;;  %v1711_v14 = vrot.slane %v1710_v6, 1 }
 0x2d1   :  { %v1728_v40 = vrot.slane %v1727_v18, 4  ;;  %v1734_v25 = vadd.f32 %v5504_v59, %v5501_v33  ;;  %v1718_v3 = vrot.slane %v1717_v43, 1 }
 0x2d2   :  { %v1722_v39 = vadd.f32 %v1721_v44, %v1720_v17  ;;  %v1712_v27 = vadd.f32 %v1711_v14, %v1710_v6 }
 0x2d3   :  { %v3292_v30 = vpop.eup %3291  ;;  %v1729_v12 = vadd.f32 %v1728_v40, %v1727_v18  ;;  %v1735_v4 = vrot.slane %v1734_v25, 4 }
 0x2d4   :  { %v3294_v60 = vpop.eup %3293  ;;  %v5512_v23 = vmul.f32 %v3292_v30, %v5440_v11  ;;  %v1723_v13 = vrot.slane %v1722_v39, 2  ;;  %v1762_v61 = vpack.c.bf16 %v1712_v27, %v1712_v27  ;;  %v2150_v27 = vld [vmem:[%s5604_s7] sm:$0xff] }
 0x2d5   :  { %v3296_v1 = vpop.eup %3295  ;;  %v1736_v54 = vadd.f32 %v1735_v4, %v1734_v25  ;;  %v1730_v47 = vrot.slane %v1729_v12, 2  ;;  %v5517_v46 = vmul.f32 %v3294_v60, %v5443_v42 }
 0x2d6   :  { %v3298_v22 = vpop.eup %3297  ;;  %v1741_v49 = vadd.f32 %v5512_v23, %v5509_v35  ;;  %v5523_v62 = vmul.f32 %v3296_v1, %v5452_v55  ;;  %v1724_v63 = vadd.f32 %v1723_v13, %v1722_v39  ;;  %v1849_v30 = vunpack.c.l.b16 %v1762_v61  ;;  %v2863_v61 = vld [vmem:[%s5603_s6] ss:$0 sm:$0xff] }
 0x2d7   :  { %v3300_v21 = vpop.eup %3299  ;;  %v5520_v48 = vmul.f32 %v3298_v22, %v5458_v28  ;;  %v1737_v11 = vrot.slane %v1736_v54, 2  ;;  %v1731_v7 = vadd.f32 %v1730_v47, %v1729_v12 }
 0x2d8   :  { %v1742_v29 = vrot.slane %v1741_v49, 4  ;;  %v5526_v26 = vmul.f32 %v3300_v21, %v5461_v52  ;;  %v1725_v19 = vrot.slane %v1724_v63, 1  ;;  %v1719_v52 = vadd.f32 %v1718_v3, %v1717_v43 }
 0x2d9   :  { %v1748_v32 = vadd.f32 %v5520_v48, %v5517_v46  ;;  %v1738_v10 = vadd.f32 %v1737_v11, %v1736_v54  ;;  %v1732_v53 = vrot.slane %v1731_v7, 1 }
 0x2da   :  { %v1743_v42 = vadd.f32 %v1742_v29, %v1741_v49  ;;  %v1755_v28 = vadd.f32 %v5526_v26, %v5523_v62  ;;  %v1726_v18 = vadd.f32 %v1725_v19, %v1724_v63  ;;  %v1763_v44 = vpack.c.bf16 %v1719_v52, %v1719_v52 }
 0x2db   :  { %v1749_v0 = vrot.slane %v1748_v32, 4  ;;  %v1739_v58 = vrot.slane %v1738_v10, 1  ;;  %v1733_v50 = vadd.f32 %v1732_v53, %v1731_v7  ;;  %v5935_v7 = vmov 0  }
 0x2dc   :  { %v1756_v34 = vrot.slane %v1755_v28, 4  ;;  %v1744_v55 = vrot.slane %v1743_v42, 2  ;;  %v1764_v1 = vpack.c.bf16 %v1726_v18, %v1726_v18  ;;  %v1850_v13 = vunpack.c.l.b16 %v1763_v44 }
 0x2dd   :  { %v1750_v24 = vadd.f32 %v1749_v0, %v1748_v32  ;;  %v1740_v36 = vadd.f32 %v1739_v58, %v1738_v10  ;;  %v1765_v54 = vpack.c.bf16 %v1733_v50, %v1733_v50  ;;  %v2151_v58 = vld [vmem:[%s5604_s7 + $0x8] sm:$0xff]  ;;  %v2897_v19 = vcombine.low %v2150_v27, %v2150_v27 }
 0x2de   :  { %v1745_v2 = vadd.f32 %v1744_v55, %v1743_v42  ;;  %v1757_v56 = vadd.f32 %v1756_v34, %v1755_v28  ;;  %v1851_v29 = vunpack.c.l.b16 %v1764_v1  ;;  %v2898_v34 = vcombine.high %v2150_v27, %v2150_v27  ;;  %v3143_v1 = vld [vmem:[#allocation10] sm:$0xff]   ;;  %v3162_v27 = vld [vmem:[#allocation10 + $0xe8] sm:$0xff]  }
 0x2df   :  { %v1751_v31 = vrot.slane %v1750_v24, 2  ;;  %v1766_v17 = vpack.c.bf16 %v1740_v36, %v1740_v36  ;;  %v1852_v32 = vunpack.c.l.b16 %v1765_v54  ;;  %v2900_v55 = vcombine.high %v2151_v58, %v2151_v58  ;;  %v3147_v54 = vld [vmem:[#allocation10 + $0x8] sm:$0xff]  }
 0x2e0   :  { %v1746_v9 = vrot.slane %v1745_v2, 1  ;;  %v1758_v38 = vrot.slane %v1757_v56, 2  ;;  %2901 = vmatprep.subr.msk.bf16.mxu0 %vm2188_vm11, %v2898_v34  ;;  %v2190_v52 = vsel %vm2188_vm11, %v2897_v19, 0  ;;  %v3164_v34 = vld [vmem:[#allocation10 + $0xa8] sm:$0xff]   ;;  %v3166_v19 = vld [vmem:[#allocation10 + $0xf0] sm:$0xff]  }
 0x2e1   :  { %v1752_v5 = vadd.f32 %v1751_v31, %v1750_v24  ;;  %v1853_v40 = vunpack.c.l.b16 %v1766_v17  ;;  %v2899_v24 = vcombine.low %v2151_v58, %v2151_v58  ;;  %2903 = vmatprep.subr.msk.bf16.mxu1 %vm2188_vm11, %v2900_v55  ;;  %v3163_v58 = vld [vmem:[#allocation10 + $0x28] sm:$0xff]   ;;  %v3165_v55 = vld [vmem:[#allocation10 + $0x70] sm:$0xff]  }
 0x2e2   :  { %v1747_v51 = vadd.f32 %v1746_v9, %v1745_v2  ;;  %v1759_v39 = vadd.f32 %v1758_v38, %v1757_v56 }
 0x2e3   :  { %v1753_v25 = vrot.slane %v1752_v5, 1  ;;  %v1858_v4 = vsel %vm1857_vm10, %v1853_v40, %v1849_v30  ;;  %v2196_v36 = vsel %vm2188_vm11, %v2899_v24, 0  ;;  %v3167_v24 = vld [vmem:[#allocation10 + $0x30] sm:$0xff]  }
 0x2e4   :  { %v1767_v6 = vpack.c.bf16 %v1747_v51, %v1747_v51  ;;  %v1760_v12 = vrot.slane %v1759_v39, 1  ;;  %v1862_v21 = vpack.c.b16 %v1858_v4, %v1858_v4  ;;  %v3142_v4 = vld [vmem:[#allocation10 + $0xc0] sm:$0xff]  }
 0x2e5   :  { %v1754_v60 = vadd.f32 %v1753_v25, %v1752_v5 }
 0x2e6   :  { %v1854_v43 = vunpack.c.l.b16 %v1767_v6  ;;  %v1761_v22 = vadd.f32 %v1760_v12, %v1759_v39 }
 0x2e7   :  { %v1768_v49 = vpack.c.bf16 %v1754_v60, %v1754_v60  ;;  %v3141_v60 = vld [vmem:[#allocation10 + $0x40] sm:$0xff]  }
 0x2e8   :  { %v1859_v47 = vsel %vm1857_vm10, %v1854_v43, %v1850_v13  ;;  %v1769_v14 = vpack.c.bf16 %v1761_v22, %v1761_v22  ;;  %v3144_v13 = vld [vmem:[#allocation10 + $0x80] sm:$0xff]   ;;  %v3145_v43 = vld [vmem:[#allocation10 + $0x48] sm:$0xff]  }
 0x2e9   :  { %v1863_v11 = vpack.c.b16 %v1859_v47, %v1859_v47  ;;  %v1855_v63 = vunpack.c.l.b16 %v1768_v49  ;;  %v3146_v22 = vld [vmem:[#allocation10 + $0xc8] sm:$0xff]   ;;  %v3149_v47 = vld [vmem:[#allocation10 + $0x50] sm:$0xff]  }
 0x2ea   :  { %v1856_v3 = vunpack.c.l.b16 %v1769_v14  ;;  %v3148_v49 = vld [vmem:[#allocation10 + $0x88] sm:$0xff]   ;;  %v3151_v14 = vld [vmem:[#allocation10 + $0x10] sm:$0xff]  }
 0x2eb   :  { %2094 = vmatprep.mubr.bf16.mxu0 %v1863_v11  ;;  %v1860_v10 = vsel %vm1857_vm10, %v1855_v63, %v1851_v29  ;;  %v3152_v11 = vld [vmem:[#allocation10 + $0x90] sm:$0xff]   ;;  %v3153_v29 = vld [vmem:[#allocation10 + $0x58] sm:$0xff]  }
 0x2ec   :  { %2095 = vmatmul.mubr.bf16.vlgmr.msra.gmra.mrb[8].mxu0 %v1862_v21  ;;  %v1861_v42 = vsel %vm1857_vm10, %v1856_v3, %v1852_v32  ;;  %v1864_v0 = vpack.c.b16 %v1860_v10, %v1860_v10  ;;  %v3150_v21 = vld [vmem:[#allocation10 + $0xd0] sm:$0xff]   ;;  %v3154_v63 = vld [vmem:[#allocation10 + $0xd8] sm:$0xff]   ;;  %v3157_v10 = vld [vmem:[#allocation10 + $0x60] sm:$0xff]  }
 0x2ed   :  { %v1865_v28 = vpack.c.b16 %v1861_v42, %v1861_v42  ;;  %2233 = vmatprep.mubr.bf16.mxu0 %v5935_v7  ;;  %2202 = vmatpush1.bf16.msra.mxu0 %v2190_v52  ;;  %v3155_v32 = vld [vmem:[#allocation10 + $0x18] sm:$0xff]   ;;  %v3158_v42 = vld [vmem:[#allocation10 + $0xe0] sm:$0xff]   ;;  %v3168_v52 = vld [vmem:[#allocation10 + $0xb0] sm:$0xff]  }
 0x2ee   :  { %2986 = vmatprep.subr.bf16.mxu0 %v3141_v60  ;;  %v3156_v3 = vld [vmem:[#allocation10 + $0x98] sm:$0xff]  }
 0x2ef   :  { %2134 = vmatprep.mubr.bf16.mxu1 %v1865_v28  ;;  %v3159_v28 = vld [vmem:[#allocation10 + $0x20] sm:$0xff]  }
 0x2f0   :  { %2135 = vmatmul.mubr.bf16.vlgmr.msra.gmra.mrb[8].mxu1 %v1864_v0  ;;  %v3161_v0 = vld [vmem:[#allocation10 + $0x68] sm:$0xff]  }
 0x2f1   :  { %2274 = vmatprep.mubr.bf16.mxu1 %v5935_v7  ;;  %2243 = vmatpush1.bf16.msra.mxu1 %v2196_v36  ;;  %v3160_v7 = vld [vmem:[#allocation10 + $0xa0] sm:$0xff]   ;;  %v3169_v36 = vld [vmem:[#allocation10 + $0x78] sm:$0xff]  }
 0x2f2   :  { %3014 = vmatprep.subr.bf16.mxu1 %v3142_v4 }
 0x3bf   :  { %v2958_v2 = vpop.f32.mrb[8].mxu0 }
 0x3c0   :  { %v2959_v53 = vpop.f32.mrb[9].mxu0 }
 0x3c1   :  { %v2960_v56 = vadd.f32 %v2959_v53, %v2958_v2  ;;  %v2961_v31 = vpop.f32.mrb[10].mxu0  ;;  %v3170_v2 = vld [vmem:[#allocation10 + $0xf8] sm:$0xff]  }
 0x3c2   :  { %v2962_v9 = vpop.f32.mrb[11].mxu0  ;;  %v3171_v53 = vld [vmem:[#allocation10 + $0x38] sm:$0xff]  }
 0x3c3   :  { %v2980_v17 = vpop.f32.mrb[8].mxu1  ;;  %v2097_v18 = vadd.f32 %v2960_v56, %v2863_v61  ;;  %v3172_v56 = vld [vmem:[#allocation10 + $0xb8] sm:$0xff]   ;;  %v5936_v61 = vld [vmem:[#allocation17_spill] sm:$0xff] }
 0x3c4   :  { %v2981_v38 = vpop.f32.mrb[9].mxu1  ;;  %v2152_v31 = vld [vmem:[%s5605_s8] sm:$0xf] }
 0x3c5   :  { %v2982_v5 = vadd.f32 %v2981_v38, %v2980_v17  ;;  %v2983_v44 = vpop.f32.mrb[10].mxu1  ;;  %v2157_v9 = vrot.slane %v2152_v31, %v5936_v61  ;;  %v5937_v17 = vld [vmem:[#allocation18_spill] sm:$0xff] }
 0x3c6   :  { %v2984_v51 = vpop.f32.mrb[11].mxu1  ;;  %v2165_v38 = vrot.slane %v2152_v31, %v5937_v17  ;;  %v5939_v44 = vld [vmem:[#allocation20_spill] sm:$0xff] }
 0x3c7   :  { %v2137_v40 = vadd.f32 %v2982_v5, %v2097_v18  ;;  %v5938_v18 = vld [vmem:[#allocation19_spill] sm:$0xff]  ;;  %v2169_v51 = vrot.slane %v2152_v31, %v5939_v44 }
 0x3c8   :  { %v2161_v5 = vrot.slane %v2152_v31, %v5938_v18 }
 0x3c9   :  { %v2896_v50 = vmul.f32 -1.442695, %v2137_v40 }
 0x3cb   :  { %3301 = vpow2.f32 %v2896_v50 }
 0x3d5   :  { %v3302_v39 = vpop.eup %3301 }
 0x3d6   :  { %v2145_v25 = vadd.f32 1.0, %v3302_v39 }
 0x3d8   :  { %3303 = vrcp.f32 %v2145_v25 }
 0x3e2   :  { %v3304_v30 = vpop.eup %3303 }
 0x3e3   :  { %v2148_v6 = vmul.f32 %v3304_v30, %v2137_v40 }
 0x3e5   :  { %v2149_v12 = vpack.c.bf16 %v2148_v6, %v2148_v6 }
 0x3e7   :  { %2902 = vmatmul.mubr.msk.bf16.vlgmr.msra.gmra.mrb[12].mxu0 %vm2184_vm12, %v2149_v12  ;;  %2904 = vmatmul.mubr.msk.bf16.vlgmr.msra.gmra.mrb[12].mxu1 %vm2184_vm12, %v2149_v12 }
 0x3e8   :  { %2987 = vmatpush3.bf16.msra.mxu0 %v3143_v1  ;;  %3015 = vmatpush3.bf16.msra.mxu1 %v3144_v13 }
 0x3e9   :  { %2988 = vmatprep.subr.bf16.mxu0 %v3145_v43  ;;  %3016 = vmatprep.subr.bf16.mxu1 %v3146_v22 }
 0x3ec   :  { %2989 = vmatpush3.bf16.msra.mxu0 %v3147_v54  ;;  %3017 = vmatpush3.bf16.msra.mxu1 %v3148_v49 }
 0x3ed   :  { %2990 = vmatprep.subr.bf16.mxu0 %v3149_v47  ;;  %3018 = vmatprep.subr.bf16.mxu1 %v3150_v21 }
 0x3f0   :  { %2991 = vmatpush3.bf16.msra.mxu0 %v3151_v14  ;;  %3019 = vmatpush3.bf16.msra.mxu1 %v3152_v11 }
 0x3f1   :  { %2992 = vmatprep.subr.bf16.mxu0 %v3153_v29  ;;  %3020 = vmatprep.subr.bf16.mxu1 %v3154_v63 }
 0x3f4   :  { %2993 = vmatpush3.bf16.msra.mxu0 %v3155_v32  ;;  %3021 = vmatpush3.bf16.msra.mxu1 %v3156_v3 }
 0x3f5   :  { %2994 = vmatprep.subr.bf16.mxu0 %v3157_v10  ;;  %3022 = vmatprep.subr.bf16.mxu1 %v3158_v42  ;;  %v3478_v42 = vmov 1966171168  }
 0x3f8   :  { %2995 = vmatpush3.bf16.msra.mxu0 %v3159_v28  ;;  %3023 = vmatpush3.bf16.msra.mxu1 %v3160_v7  ;;  %v2314_v28 = vunpack.c.l.s4 %v3478_v42 }
 0x3f9   :  { %2996 = vmatprep.subr.bf16.mxu0 %v3161_v0  ;;  %3024 = vmatprep.subr.bf16.mxu1 %v3162_v27 }
 0x3fa   :  { %v2315_v7 = vunpack.c.0.s8 %v2314_v28  ;;  %v3321_v28 = vld [vmem:[#allocation2] sm:$0xff] }
 0x3fc   :  { %2997 = vmatpush3.bf16.msra.mxu0 %v3163_v58  ;;  %3025 = vmatpush3.bf16.msra.mxu1 %v3164_v34  ;;  %v5940_v58 = vld [vmem:[#allocation16_spill] sm:$0xff] }
 0x3fd   :  { %2998 = vmatprep.subr.bf16.mxu0 %v3165_v55  ;;  %3026 = vmatprep.subr.bf16.mxu1 %v3166_v19  ;;  %v2318_v34 = vsub.s32 %v2315_v7, %v5940_v58 }
 0x400   :  { %2999 = vmatpush3.bf16.msra.mxu0 %v3167_v24  ;;  %3027 = vmatpush3.bf16.msra.mxu1 %v3168_v52 }
 0x401   :  { %3000 = vmatprep.subr.bf16.mxu0 %v3169_v36  ;;  %3028 = vmatprep.subr.bf16.mxu1 %v3170_v2 }
 0x404   :  { %3001 = vmatpush3.bf16.msra.mxu0 %v3171_v53  ;;  %3029 = vmatpush3.bf16.msra.mxu1 %v3172_v56 }
 0x4ba   :  { %v2235_v40 = vpop.f32.mrb[12].mxu0  ;;  %v2276_v50 = vpop.f32.mrb[12].mxu1 }
 0x4bb   :  { %v2236_v39 = vadd.f32 %v2235_v40, %v2157_v9  ;;  %v2277_v25 = vadd.f32 %v2276_v50, %v2165_v38  ;;  %v2237_v30 = vpop.f32.mrb[13].mxu0  ;;  %v2278_v6 = vpop.f32.mrb[13].mxu1 }
 0x4bc   :  { %v2238_v12 = vadd.f32 %v2237_v30, %v2161_v5  ;;  %v2279_v60 = vadd.f32 %v2278_v6, %v2169_v51  ;;  %v2239_v4 = vpop.f32.mrb[14].mxu0  ;;  %v2280_v1 = vpop.f32.mrb[14].mxu1 }
 0x4bd   :  { %v2905_v13 = vmul.f32 -1.442695, %v2236_v39  ;;  %v2907_v43 = vmul.f32 -1.442695, %v2277_v25  ;;  %v2240_v22 = vpop.f32.mrb[15].mxu0  ;;  %v2281_v54 = vpop.f32.mrb[15].mxu1 }
 0x4be   :  { %v2906_v49 = vmul.f32 -1.442695, %v2238_v12  ;;  %v2908_v47 = vmul.f32 -1.442695, %v2279_v60 }
 0x4bf   :  { %3305 = vpow2.f32 %v2905_v13 }
 0x4c0   :  { %3307 = vpow2.f32 %v2907_v43 }
 0x4c1   :  { %3309 = vpow2.f32 %v2906_v49 }
 0x4c2   :  { %3311 = vpow2.f32 %v2908_v47  ;;  %v2909_v47 = vld [vmem:[%s5607_s10] ss:$0 sm:$0xff]  ;;  %s3479_s10 = smov [#allocation11]  }
 0x4c3   :  { %s2781_s24 = sshll.u32 %s3479_s10, 4  ;;  %s2782_s24 = int_to_ptr.vmem [resolvable:$true] %s2781_s24 }
 0x4c4   :  { %s3435_s25 = scalar_lea.vmem %s2782_s24, 512  ;;  %p3440_p13 = scmp.lt.s32.totalorder %s2782_s24, %s2782_s24 }
 0x4c5   :  { %p3436_p12 = scmp.ne.s32.totalorder %s2782_s24, %s3435_s25  ;;  %p3441_p0 = scmp.lt.s32.totalorder %s3435_s25, %s3435_s25 }
 0x4c7   :  { %p3442_p1 = por %p3441_p0, %p3440_p13 }
 0x4c9   :  { %v3306_v21 = vpop.eup %3305  ;;  %p3443_p2 = pnand %p3442_p1, %p3436_p12 }
 0x4ca   :  { %v3308_v14 = vpop.eup %3307  ;;  %v2295_v11 = vadd.f32 1.0, %v3306_v21 }
 0x4cb   :  { %v3310_v29 = vpop.eup %3309  ;;  %v2297_v63 = vadd.f32 1.0, %v3308_v14 }
 0x4cc   :  { %v3312_v32 = vpop.eup %3311  ;;  %3313 = vrcp.f32 %v2295_v11  ;;  %v2296_v3 = vadd.f32 1.0, %v3310_v29 }
 0x4cd   :  { %3315 = vrcp.f32 %v2297_v63  ;;  %v2298_v10 = vadd.f32 1.0, %v3312_v32 }
 0x4ce   :  { %3317 = vrcp.f32 %v2296_v3 }
 0x4cf   :  { %3319 = vrcp.f32 %v2298_v10 }
 0x4d6   :  { %v3314_v0 = vpop.eup %3313 }
 0x4d7   :  { %v3316_v27 = vpop.eup %3315 }
 0x4d8   :  { %v3318_v55 = vpop.eup %3317 }
 0x4d9   :  { %v3320_v19 = vpop.eup %3319  ;;  %v2311_v24 = vcombine.low %v3314_v0, %v3318_v55 }
 0x4da   :  { %v2312_v52 = vcombine.low %v3316_v27, %v3320_v19  ;;  %v3322_v19 = vld [vmem:[#allocation2 + $0x8] sm:$0xff] }
 0x4db   :  { %v2319_v36 = vrot.slane %v2311_v24, %v2318_v34 }
 0x4dc   :  { %v2326_v2 = vrot.slane %v2312_v52, %v2318_v34 }
 0x4de   :  { %v2327_v53 = vcombine.low %v2319_v36, %v2326_v2  ;;  %v2328_v56 = vcombine.high %v2319_v36, %v2326_v2 }
 0x4e0   :  { %v2335_v31 = vrot.slane %v2327_v53, %v2318_v34  ;;  %v2342_v9 = vrot.slane %v2328_v56, %v2318_v34 }
 0x4e2   :  { %v2350_v38 = vrot.slane %v2335_v31, %v5938_v18  ;;  %v2358_v5 = vrot.slane %v2335_v31, %v5939_v44  ;;  %v2346_v51 = vrot.slane %v2335_v31, %v5936_v61  ;;  %v2354_v40 = vrot.slane %v2335_v31, %v5937_v17 }
 0x4e3   :  { %v2366_v50 = vrot.slane %v2342_v9, %v5938_v18  ;;  %v2374_v39 = vrot.slane %v2342_v9, %v5939_v44  ;;  %v2362_v25 = vrot.slane %v2342_v9, %v5936_v61  ;;  %v2370_v30 = vrot.slane %v2342_v9, %v5937_v17 }
 0x4e4   :  { %v2384_v6 = vmul.f32 %v2350_v38, %v5478_v45  ;;  %v2388_v12 = vmul.f32 %v2350_v38, %v5475_v8  ;;  %v2386_v60 = vmul.f32 %v2358_v5, %v5494_v41  ;;  %v2390_v4 = vmul.f32 %v2358_v5, %v5491_v20 }
 0x4e5   :  { %v2383_v1 = vmul.f32 %v2346_v51, %v5471_v15  ;;  %v2387_v13 = vmul.f32 %v2346_v51, %v5468_v37  ;;  %v2385_v18 = vmul.f32 %v2354_v40, %v5488_v57  ;;  %v2389_v44 = vmul.f32 %v2354_v40, %v5485_v16 }
 0x4e6   :  { %v2400_v43 = vpack.c.bf16 %v2388_v12, %v2384_v6  ;;  %v2402_v61 = vpack.c.bf16 %v2390_v4, %v2386_v60  ;;  %v2392_v17 = vmul.f32 %v2366_v50, %v5509_v35  ;;  %v2396_v45 = vmul.f32 %v2366_v50, %v5512_v23  ;;  %v3323_v50 = vld [vmem:[#allocation2 + $0x10] sm:$0xff] }
 0x4e7   :  { %v2399_v22 = vpack.c.bf16 %v2387_v13, %v2383_v1  ;;  %v2401_v8 = vpack.c.bf16 %v2389_v44, %v2385_v18  ;;  %v2394_v41 = vmul.f32 %v2374_v39, %v5523_v62  ;;  %v2398_v20 = vmul.f32 %v2374_v39, %v5526_v26 }
 0x4e8   :  { %2702 = vmatprep.mubr.bf16.mxu0 %v2400_v43  ;;  %2751 = vmatprep.mubr.bf16.mxu1 %v2402_v61  ;;  %v2404_v15 = vpack.c.bf16 %v2396_v45, %v2392_v17  ;;  %v2391_v16 = vmul.f32 %v2362_v25, %v5501_v33  ;;  %v2395_v57 = vmul.f32 %v2362_v25, %v5504_v59 }
 0x4e9   :  { %2703 = vmatmul.mubr.bf16.vlgmr.msra.gmra.mrb[16].mxu0 %v2399_v22  ;;  %2752 = vmatmul.mubr.bf16.vlgmr.msra.gmra.mrb[16].mxu1 %v2401_v8  ;;  %v2406_v37 = vpack.c.bf16 %v2398_v20, %v2394_v41  ;;  %v2393_v35 = vmul.f32 %v2370_v30, %v5517_v46  ;;  %v2397_v23 = vmul.f32 %v2370_v30, %v5520_v48  ;;  %v3324_v30 = vld [vmem:[#allocation2 + $0x18] sm:$0xff] }
 0x4ea   :  { %2710 = vmatprep.mubr.bf16.mxu0 %v2404_v15  ;;  %v2403_v54 = vpack.c.bf16 %v2395_v57, %v2391_v16 }
 0x4eb   :  { %2759 = vmatprep.mubr.bf16.mxu1 %v2406_v37  ;;  %v2405_v62 = vpack.c.bf16 %v2397_v23, %v2393_v35 }
 0x4f1   :  { %2711 = vmatmul.mubr.bf16.gmra.mrb[20].mxu0 %v2403_v54  ;;  %2760 = vmatmul.mubr.bf16.gmra.mrb[20].mxu1 %v2405_v62 }
 0x5bc   :  { %v3002_v26 = vpop.f32.mrb[16].mxu0  ;;  %v3030_v49 = vpop.f32.mrb[16].mxu1 }
 0x5bd   :  { %v3003_v21 = vpop.f32.mrb[17].mxu0  ;;  %v3031_v14 = vpop.f32.mrb[17].mxu1 }
 0x5be   :  { %v3004_v11 = vadd.f32 %v3003_v21, %v3002_v26  ;;  %v3032_v33 = vadd.f32 %v3031_v14, %v3030_v49  ;;  %v3005_v29 = vpop.f32.mrb[18].mxu0  ;;  %v3033_v59 = vpop.f32.mrb[18].mxu1 }
 0x5bf   :  { %v3006_v63 = vpop.f32.mrb[19].mxu0  ;;  %v3034_v46 = vpop.f32.mrb[19].mxu1 }
 0x5c0   :  { %v2705_v32 = vadd.f32 %v3004_v11, %v2909_v47  ;;  %v3007_v48 = vadd.f32 %v3006_v63, %v3005_v29  ;;  %v3035_v3 = vadd.f32 %v3034_v46, %v3033_v59 }
 0x5c2   :  { %v2754_v10 = vadd.f32 %v3032_v33, %v2705_v32  ;;  %v2708_v42 = vadd.f32 %v3007_v48, %v2909_v47 }
 0x5c4   :  { %v2768_v7 = vadd.f32 %v3321_v28, %v2754_v10  ;;  %v2757_v0 = vadd.f32 %v3035_v3, %v2708_v42  ;;  %v3008_v27 = vpop.f32.mrb[20].mxu0  ;;  %v3036_v58 = vpop.f32.mrb[20].mxu1 }
 0x5c5   :  { %v3009_v34 = vpop.f32.mrb[21].mxu0  ;;  %v3037_v55 = vpop.f32.mrb[21].mxu1 }
 0x5c6   :  { %2772 = vst [vmem:[#allocation11] sm:$0xff] %v2768_v7  ;;  %v2769_v24 = vadd.f32 %v3322_v19, %v2757_v0  ;;  %v3010_v52 = vadd.f32 %v3009_v34, %v3008_v27  ;;  %v3038_v36 = vadd.f32 %v3037_v55, %v3036_v58  ;;  %v3011_v2 = vpop.f32.mrb[22].mxu0  ;;  %v3039_v53 = vpop.f32.mrb[22].mxu1 }
 0x5c7   :  { %v3012_v56 = vpop.f32.mrb[23].mxu0  ;;  %v3040_v31 = vpop.f32.mrb[23].mxu1 }
 0x5c8   :  { %2773 = vst [vmem:[#allocation11 + $0x8] sm:$0xff] %v2769_v24  ;;  %v2713_v9 = vadd.f32 %v3010_v52, %v2909_v47  ;;  %v3013_v38 = vadd.f32 %v3012_v56, %v3011_v2  ;;  %v3041_v5 = vadd.f32 %v3040_v31, %v3039_v53 }
 0x5ca   :  { %v2762_v51 = vadd.f32 %v3038_v36, %v2713_v9  ;;  %v2716_v40 = vadd.f32 %v3013_v38, %v2909_v47 }
 0x5cc   :  { %v2770_v39 = vadd.f32 %v3323_v50, %v2762_v51  ;;  %v2765_v25 = vadd.f32 %v3041_v5, %v2716_v40 }
 0x5ce   :  { %2774 = vst [vmem:[#allocation11 + $0x10] sm:$0xff] %v2770_v39  ;;  %v2771_v6 = vadd.f32 %v3324_v30, %v2765_v25 }
 0x5d0   :  { %2775 = vst [vmem:[#allocation11 + $0x18] sm:$0xff] %v2771_v6 }
 0x5d1   :  { %3446 = shalt.err (!%p3443_p2)
}
 0x5d2   :  { %s3447_s26 = scalar_lea.hbm %s5608_s11, 512 }
 0x5d3   :  { %p3448_p3 = scmp.ne.s32.totalorder %s5608_s11, %s3447_s26  ;;  %p3451_p4 = scmp.lt.u32.totalorder %s3447_s26, %s5608_s11 }
 0x5d5   :  { %p3453_p5 = pnand %p3451_p4, %p3448_p3 }
 0x5d7   :  { %3456 = shalt.err (!%p3453_p5)
}
 0x5d8   :  { %2787 = dma.vmem_to_hbm [thread:$0]  %s2782_s24, 512, %s5608_s11, [#allocation4], %s3468_s4, %s3468_s4, %s3469_s20  }
 0x5d9   :  { %3463 = dma.done.wait [#allocation4], 512  }
 0x5da   :  { %3464 = vsyncadd [#allocation4], 4294966784 }
 0x5db   :  { %2791 = vsyncpa [#allocation3], 1 }
 0x5dc   :  { %2792 = vsyncpa [#allocation6], 1 }
 0x5dd   :  { %2793 = vsyncpa [#allocation9], 1 }
 0x5de   :  { %2794 = vsyncpa [#allocation4], 1 }

</bundles_post_ra>
